<compile_context>
chip_gen: v7x
topology: tpu7x:2x2x1
jax: 0.10.0
libtpu: 0.0.40
codegen_flags: <defaults>
</compile_context>

<pallas_src>
import jax
import jax.numpy as jnp
from jax.experimental import pallas as pl
from jax.experimental.pallas import tpu as pltpu


# ---------------------------------------------------------------------------
# Pallas kernels
# ---------------------------------------------------------------------------
def _conv1_relu_pool_kernel(p_ref, w_ref, b_ref, o_ref):
    """One M-tile of conv1 (as matmul) + bias + ReLU + 2x2 maxpool.

    p_ref: (4*TM, 128) bf16  -- 4 pooling-tap patch slabs stacked along rows
    w_ref: (128, 8)    bf16  -- packed conv1 weight (constant across the grid)
    b_ref: (1, 8)      f32
    o_ref: (TM, 8)     bf16  -- pooled + ReLU'd activations, rows ordered (b,i,j)
    """
    tm = o_ref.shape[0]
    # Single merged MXU dot over all 4 taps (one RHS push).
    z = jnp.dot(p_ref[...], w_ref[...], preferred_element_type=jnp.float32)
    # 2x2 maxpool == max over the 4 taps (bias tap-invariant, ReLU monotone).
    z = jnp.maximum(jnp.maximum(z[0:tm], z[tm:2 * tm]),
                    jnp.maximum(z[2 * tm:3 * tm], z[3 * tm:4 * tm]))
    o_ref[...] = jnp.maximum(z + b_ref[...], 0.0).astype(o_ref.dtype)


def _conv2_fc_kernel(p_ref, c2w_ref, c2b_ref, f1w_ref, f1b_ref,
                     f2w_ref, f2b_ref, f3w_ref, f3b_ref, o_ref):
    """Fused conv2 (+bias+ReLU+2x2 maxpool) -> fc1 -> fc2 -> fc3.

    p_ref : (4*25*G, 256) bf16  conv2 im2col patches, rows (tap, pos p=i*5+j, g)
                                with the batch group zero-padded from B to G
                                (G a multiple of 16 -> whole sublane tiles)
    c2w   : (256, 16) bf16 ; c2b: (1, 16) f32
    f1w   : (25, 16, 128) bf16  per-pooled-position fc1 weight blocks
    f2w/f3w: (128, 128) bf16 ; f*b: (1, 128) f32
    o_ref : (G, 128) f32        logits (rows >= B and cols >= 10 are padding)
    """
    r = p_ref.shape[0] // 4          # rows per tap = 25 * G
    g = r // 25                      # padded batch group size (multiple of 16)

    # conv2: one merged dot over all 4 pooling taps, then tap-max + bias + ReLU.
    z = jnp.dot(p_ref[...], c2w_ref[...], preferred_element_type=jnp.float32)
    z = jnp.maximum(jnp.maximum(z[0:r], z[r:2 * r]),
                    jnp.maximum(z[2 * r:3 * r], z[3 * r:4 * r]))
    y2 = jnp.maximum(z + c2b_ref[...], 0.0).astype(jnp.bfloat16)    # (25*G, 16)

    # fc1: the NCHW flatten is realised as 25 accumulated position-block dots
    # (each block is one tile-aligned (G,16) row group) -> no sublane->lane
    # relayout inside the kernel.  Same total weight bytes as one (400,128) dot.
    acc = jnp.dot(y2[0:g], f1w_ref[0], preferred_element_type=jnp.float32)
    for p in range(1, 25):
        acc = acc + jnp.dot(y2[p * g:(p + 1) * g], f1w_ref[p],
                            preferred_element_type=jnp.float32)
    h = jnp.maximum(acc + f1b_ref[...], 0.0).astype(jnp.bfloat16)   # (G, 128)

    h = jnp.dot(h, f2w_ref[...], preferred_element_type=jnp.float32) + f2b_ref[...]
    h = jnp.maximum(h, 0.0).astype(jnp.bfloat16)
    o_ref[...] = (jnp.dot(h, f3w_ref[...], preferred_element_type=jnp.float32)
                  + f3b_ref[...])


# ---------------------------------------------------------------------------
# Pallas wrappers
# ---------------------------------------------------------------------------
def conv1_relu_pool(patches, w, b, tile_m, m_pad):
    n_tiles = m_pad // tile_m
    return pl.pallas_call(
        _conv1_relu_pool_kernel,
        out_shape=jax.ShapeDtypeStruct((m_pad, 8), jnp.bfloat16),
        grid=(n_tiles,),
        in_specs=[
            pl.BlockSpec((4 * tile_m, 128), lambda i: (i, 0)),   # streamed patches
            pl.BlockSpec((128, 8), lambda i: (0, 0)),            # VMEM-resident weight
            pl.BlockSpec((1, 8), lambda i: (0, 0)),              # VMEM-resident bias
        ],
        out_specs=pl.BlockSpec((tile_m, 8), lambda i: (i, 0)),
        compiler_params=pltpu.CompilerParams(
            dimension_semantics=("parallel",)),   # megacore-shardable on v7x
    )(patches, w, b)


def conv2_fc_fused(p2, pk, group):
    # Everything is tiny (<2 MB total) -> single full-VMEM block, no grid.
    return pl.pallas_call(
        _conv2_fc_kernel,
        out_shape=jax.ShapeDtypeStruct((group, 128), jnp.float32),
    )(p2, pk["c2w"], pk["c2b"], pk["f1w"], pk["f1b"],
      pk["f2w"], pk["f2b"], pk["f3w"], pk["f3b"])


# ---------------------------------------------------------------------------
# Wrapper glue: pooling-tap im2col patch extraction (fused XLA slices/concat)
# ---------------------------------------------------------------------------
def _conv1_patches(x_nhwc, tile_m, m_pad):
    """x: (B,32,32,3) f32 -> (n_tiles*4*tile_m, 128) bf16 conv1 patches.

    Row layout: tile-major, then tap (di*2+dj), then row m within the tile;
    global row m (over m_pad) is ordered (b, i, j) over pooled output positions.
    Columns ordered (dy, dx, c), zero-padded 75 -> 128.
    """
    B = x_nhwc.shape[0]
    m_real = B * 14 * 14
    cols = [x_nhwc[:, dy:dy + 28, dx:dx + 28, :] for dy in range(5) for dx in range(5)]
    p = jnp.concatenate(cols, axis=-1)                                 # (B,28,28,75)
    p = jnp.pad(p, ((0, 0), (0, 0), (0, 0), (0, 128 - 75)))
    p = p.reshape(B, 14, 2, 14, 2, 128).transpose(2, 4, 0, 1, 3, 5)    # (di,dj,b,i,j,K)
    p = p.reshape(4, m_real, 128)
    if m_pad > m_real:
        p = jnp.pad(p, ((0, 0), (0, m_pad - m_real), (0, 0)))
    n_tiles = m_pad // tile_m
    p = p.reshape(4, n_tiles, tile_m, 128).transpose(1, 0, 2, 3)
    return p.reshape(n_tiles * 4 * tile_m, 128).astype(jnp.bfloat16)


def _conv2_patches(y1_nhwc, group):
    """y1: (B,14,14,8) bf16 -> (4*25*group, 256) bf16 conv2 patches.

    Rows ordered (tap, pooled-position p=i*5+j, g) with the batch group
    zero-padded from B to `group` (a multiple of 16) so each per-position
    block is exactly a whole sublane tile inside the fused kernel.
    Columns ordered (dy, dx, c) over 8 (padded) channels, padded 200 -> 256.
    """
    B = y1_nhwc.shape[0]
    cols = [y1_nhwc[:, dy:dy + 10, dx:dx + 10, :] for dy in range(5) for dx in range(5)]
    p = jnp.concatenate(cols, axis=-1)                                 # (B,10,10,200)
    p = jnp.pad(p, ((0, 0), (0, 0), (0, 0), (0, 256 - 200)))
    p = p.reshape(B, 5, 2, 5, 2, 256).transpose(2, 4, 1, 3, 0, 5)      # (di,dj,i,j,b,K)
    p = p.reshape(4, 25, B, 256)
    if group > B:
        p = jnp.pad(p, ((0, 0), (0, 0), (0, group - B), (0, 0)))
    return p.reshape(4 * 25 * group, 256)


# ---------------------------------------------------------------------------
# One-time weight prepacking (hoisted out of the forward pass)
# ---------------------------------------------------------------------------
def prepack_params(params):
    f32, bf16 = jnp.float32, jnp.bfloat16

    # conv1: OIHW (6,3,5,5) -> rows (dy,dx,c), cols oc; K 75->128, OC 6->8.
    c1 = jnp.transpose(params["conv1_w"], (2, 3, 1, 0)).reshape(75, 6)
    c1 = jnp.pad(c1, ((0, 128 - 75), (0, 2)))
    c1b = jnp.pad(params["conv1_b"], (0, 2)).reshape(1, 8)

    # conv2: OIHW (16,6,5,5) -> rows (dy,dx,c) with c padded 6->8; K 200->256.
    c2 = jnp.transpose(params["conv2_w"], (2, 3, 1, 0))                 # (5,5,6,16)
    c2 = jnp.pad(c2, ((0, 0), (0, 0), (0, 2), (0, 0)))                  # (5,5,8,16)
    c2 = jnp.pad(c2.reshape(200, 16), ((0, 256 - 200), (0, 0)))
    c2b = params["conv2_b"].reshape(1, 16)

    # fc1: PyTorch flatten index = c*25 + (i*5+j).  Repack as 25 position
    # blocks (p, c, n) so the kernel contracts position-by-position; N 120->128.
    f1 = params["fc1_w"].reshape(120, 16, 25)                           # (n, c, p)
    f1 = jnp.transpose(f1, (2, 1, 0))                                   # (p, c, n)
    f1 = jnp.pad(f1, ((0, 0), (0, 0), (0, 128 - 120)))                  # (25,16,128)
    f1b = jnp.pad(params["fc1_b"], (0, 128 - 120)).reshape(1, 128)

    f2 = jnp.pad(params["fc2_w"].T, ((0, 128 - 120), (0, 128 - 84)))    # (128,128)
    f2b = jnp.pad(params["fc2_b"], (0, 128 - 84)).reshape(1, 128)
    f3 = jnp.pad(params["fc3_w"].T, ((0, 128 - 84), (0, 128 - 10)))     # (128,128)
    f3b = jnp.pad(params["fc3_b"], (0, 128 - 10)).reshape(1, 128)

    return {
        "c1w": c1.astype(bf16), "c1b": c1b.astype(f32),
        "c2w": c2.astype(bf16), "c2b": c2b.astype(f32),
        "f1w": f1.astype(bf16), "f1b": f1b.astype(f32),
        "f2w": f2.astype(bf16), "f2b": f2b.astype(f32),
        "f3w": f3.astype(bf16), "f3b": f3b.astype(f32),
    }


# ---------------------------------------------------------------------------
# Full forward pass (matches PyTorch CNN.forward)
# ---------------------------------------------------------------------------
def cnn_forward(x_nchw, pk):
    assert x_nchw.shape[1:] == (3, 32, 32), "model requires (B,3,32,32) input"
    B = x_nchw.shape[0]
    x = jnp.transpose(x_nchw, (0, 2, 3, 1)).astype(jnp.float32)         # NHWC

    # ----- conv1 + ReLU + pool  (Pallas kernel 1, M-tiled "parallel" grid) -----
    m_real = B * 14 * 14
    tile_m = 512 if m_real > 512 else ((m_real + 15) // 16) * 16        # mult of 16
    m_pad = ((m_real + tile_m - 1) // tile_m) * tile_m
    p1 = _conv1_patches(x, tile_m, m_pad)                                # (·, 128) bf16
    y1 = conv1_relu_pool(p1, pk["c1w"], pk["c1b"], tile_m, m_pad)        # (m_pad, 8) bf16
    if m_pad > m_real:
        y1 = y1[:m_real]
    y1 = y1.reshape(B, 14, 14, 8)

    # ----- conv2 + ReLU + pool + fc1 + fc2 + fc3  (Pallas kernel 2, fused) -----
    group = ((B + 15) // 16) * 16          # padded batch group (>=16, mult of 16)
    p2 = _conv2_patches(y1, group)                                       # (4*25*G, 256)
    out = conv2_fc_fused(p2, pk, group)                                  # (G, 128) f32
    return out[:B, :10]


# ---------------------------------------------------------------------------
# Pure-JAX f32 reference (built-in numerical self-check)
# ---------------------------------------------------------------------------
def reference_forward(x_nchw, params):
    x = x_nchw.astype(jnp.float32)

    def conv(z, w, b):
        y = jax.lax.conv_general_dilated(z, w, (1, 1), "VALID",
                                         dimension_numbers=("NCHW", "OIHW", "NCHW"))
        return y + b.reshape(1, -1, 1, 1)

    def pool(z):
        return jax.lax.reduce_window(z, -jnp.inf, jax.lax.max,
                                     (1, 1, 2, 2), (1, 1, 2, 2), "VALID")

    y = pool(jax.nn.relu(conv(x, params["conv1_w"], params["conv1_b"])))
    y = pool(jax.nn.relu(conv(y, params["conv2_w"], params["conv2_b"])))
    f = y.reshape(y.shape[0], -1)                                        # NCHW flatten
    h = jax.nn.relu(f @ params["fc1_w"].T + params["fc1_b"])
    h = jax.nn.relu(h @ params["fc2_w"].T + params["fc2_b"])
    return h @ params["fc3_w"].T + params["fc3_b"]


# ---------------------------------------------------------------------------
# Deterministic parameter init (PyTorch-default-style uniform, synthetic)
# ---------------------------------------------------------------------------
def init_params(key):
    def uni(k, shape, fan_in):
        bound = 1.0 / jnp.sqrt(float(fan_in))
        return jax.random.uniform(k, shape, jnp.float32, -bound, bound)

    ks = jax.random.split(key, 10)
    return {
        "conv1_w": uni(ks[0], (6, 3, 5, 5), 3 * 5 * 5),
        "conv1_b": uni(ks[1], (6,), 3 * 5 * 5),
        "conv2_w": uni(ks[2], (16, 6, 5, 5), 6 * 5 * 5),
        "conv2_b": uni(ks[3], (16,), 6 * 5 * 5),
        "fc1_w": uni(ks[4], (120, 400), 400),
        "fc1_b": uni(ks[5], (120,), 400),
        "fc2_w": uni(ks[6], (84, 120), 120),
        "fc2_b": uni(ks[7], (84,), 120),
        "fc3_w": uni(ks[8], (10, 84), 84),
        "fc3_b": uni(ks[9], (10,), 84),
    }


if __name__ == "__main__":
    key = jax.random.PRNGKey(0)
    k_param, k_input = jax.random.split(key)
    params = init_params(k_param)
    packed = prepack_params(params)          # one-time prepack, outside the forward

    # CIFAR-shaped input required by the module's 16*5*5 flatten: (B, 3, 32, 32)
    x = jax.random.normal(k_input, (2, 3, 32, 32), dtype=jnp.float32)

    fwd = jax.jit(cnn_forward)
    out = fwd(x, packed)
    jax.block_until_ready(out)
    assert out.shape == (2, 10) and out.dtype == jnp.float32

    # bf16 MXU operands (per perf review) vs. f32 reference -> loosened tolerance.
    ref = reference_forward(x, params)
    assert jnp.allclose(out, ref, rtol=5e-2, atol=1e-1), "Pallas output mismatch vs reference"

    print("KERNEL_OK")
</pallas_src>

<mosaic_0001>
module attributes {stable_mosaic.version = 11 : i64} {
  func.func @_conv1_relu_pool_kernel(%arg0: i32, %arg1: memref<1600x128xbf16, #tpu.memory_space<vmem>>, %arg2: memref<128x8xbf16, #tpu.memory_space<vmem>>, %arg3: memref<1x8xf32, #tpu.memory_space<vmem>>, %arg4: memref<400x8xbf16, #tpu.memory_space<vmem>>) attributes {dimension_semantics = [#tpu.dimension_semantics<parallel>], iteration_bounds = array<i64: 1>, scalar_prefetch = 0 : i64, scratch_operands = 0 : i64, tpu.core_type = #tpu.core_type<tc>, window_params = [{transform_indices = @transform_0, window_bounds = array<i64: 1600, 128>}, {pipeline_mode = #tpu.pipeline_mode<synchronous>, transform_indices = @transform_1, window_bounds = array<i64: 128, 8>}, {pipeline_mode = #tpu.pipeline_mode<synchronous>, transform_indices = @transform_2, window_bounds = array<i64: 1, 8>}, {transform_indices = @transform_3, window_bounds = array<i64: 400, 8>}]} {
    %c0 = arith.constant 0 : index
    %c0_0 = arith.constant 0 : index
    %0 = vector.load %arg1[%c0, %c0_0] : memref<1600x128xbf16, #tpu.memory_space<vmem>>, vector<1600x128xbf16>
    %c0_1 = arith.constant 0 : index
    %c0_2 = arith.constant 0 : index
    %1 = vector.load %arg2[%c0_1, %c0_2] : memref<128x8xbf16, #tpu.memory_space<vmem>>, vector<128x8xbf16>
    %cst = arith.constant dense<0.000000e+00> : vector<1600x8xf32>
    %2 = tpu.matmul %0, %1, %cst {dimension_numbers = #tpu.dot_dimension_numbers<[1], [0], [0], [1], [0, 0, 1, 1], [], []>} : vector<1600x128xbf16>, vector<128x8xbf16>, vector<1600x8xf32> -> vector<1600x8xf32>
    %3 = vector.extract_strided_slice %2 {offsets = [0, 0], sizes = [400, 8], strides = [1, 1]} : vector<1600x8xf32> to vector<400x8xf32>
    %4 = vector.extract_strided_slice %2 {offsets = [400, 0], sizes = [400, 8], strides = [1, 1]} : vector<1600x8xf32> to vector<400x8xf32>
    %5 = arith.maximumf %3, %4 : vector<400x8xf32>
    %6 = vector.extract_strided_slice %2 {offsets = [800, 0], sizes = [400, 8], strides = [1, 1]} : vector<1600x8xf32> to vector<400x8xf32>
    %7 = vector.extract_strided_slice %2 {offsets = [1200, 0], sizes = [400, 8], strides = [1, 1]} : vector<1600x8xf32> to vector<400x8xf32>
    %8 = arith.maximumf %6, %7 : vector<400x8xf32>
    %9 = arith.maximumf %5, %8 : vector<400x8xf32>
    %c0_3 = arith.constant 0 : index
    %c0_4 = arith.constant 0 : index
    %10 = vector.load %arg3[%c0_3, %c0_4] : memref<1x8xf32, #tpu.memory_space<vmem>>, vector<1x8xf32>
    %11 = vector.broadcast %10 : vector<1x8xf32> to vector<400x8xf32>
    %12 = arith.addf %9, %11 : vector<400x8xf32>
    %cst_5 = arith.constant 0.000000e+00 : f32
    %13 = vector.broadcast %cst_5 : f32 to vector<400x8xf32>
    %14 = arith.maximumf %12, %13 : vector<400x8xf32>
    %15 = arith.truncf %14 : vector<400x8xf32> to vector<400x8xbf16>
    %c0_6 = arith.constant 0 : index
    %c0_7 = arith.constant 0 : index
    %16 = vector.load %arg4[%c0_6, %c0_7] : memref<400x8xbf16, #tpu.memory_space<vmem>>, vector<400x8xbf16>
    tpu.vector_store %arg4[%c0_6, %c0_7], %15 {strides = array<i32>} : memref<400x8xbf16, #tpu.memory_space<vmem>>, vector<400x8xbf16>,
    return
  }
  func.func @transform_0(%arg0: i32) -> (i32, i32) {
    %c0_i32 = arith.constant 0 : i32
    %c0_i32_0 = arith.constant 0 : i32
    return %arg0, %c0_i32 : i32, i32
  }
  func.func @transform_1(%arg0: i32) -> (i32, i32) {
    %c0_i32 = arith.constant 0 : i32
    %c0_i32_0 = arith.constant 0 : i32
    %c0_i32_1 = arith.constant 0 : i32
    return %c0_i32, %c0_i32_0 : i32, i32
  }
  func.func @transform_2(%arg0: i32) -> (i32, i32) {
    %c0_i32 = arith.constant 0 : i32
    %c0_i32_0 = arith.constant 0 : i32
    %c0_i32_1 = arith.constant 0 : i32
    return %c0_i32, %c0_i32_0 : i32, i32
  }
  func.func @transform_3(%arg0: i32) -> (i32, i32) {
    %c0_i32 = arith.constant 0 : i32
    %c0_i32_0 = arith.constant 0 : i32
    return %arg0, %c0_i32 : i32, i32
  }
}

module attributes {stable_mosaic.version = 11 : i64} {
  func.func @_conv2_fc_kernel(%arg0: memref<1600x256xbf16, #tpu.memory_space<vmem>>, %arg1: memref<256x16xbf16, #tpu.memory_space<vmem>>, %arg2: memref<1x16xf32, #tpu.memory_space<vmem>>, %arg3: memref<25x16x128xbf16, #tpu.memory_space<vmem>>, %arg4: memref<1x128xf32, #tpu.memory_space<vmem>>, %arg5: memref<128x128xbf16, #tpu.memory_space<vmem>>, %arg6: memref<1x128xf32, #tpu.memory_space<vmem>>, %arg7: memref<128x128xbf16, #tpu.memory_space<vmem>>, %arg8: memref<1x128xf32, #tpu.memory_space<vmem>>, %arg9: memref<16x128xf32, #tpu.memory_space<vmem>>) attributes {dimension_semantics = [], scalar_prefetch = 0 : i64, scratch_operands = 0 : i64, tpu.core_type = #tpu.core_type<tc>} {
    %c0 = arith.constant 0 : index
    %c0_0 = arith.constant 0 : index
    %0 = vector.load %arg0[%c0, %c0_0] : memref<1600x256xbf16, #tpu.memory_space<vmem>>, vector<1600x256xbf16>
    %c0_1 = arith.constant 0 : index
    %c0_2 = arith.constant 0 : index
    %1 = vector.load %arg1[%c0_1, %c0_2] : memref<256x16xbf16, #tpu.memory_space<vmem>>, vector<256x16xbf16>
    %cst = arith.constant dense<0.000000e+00> : vector<1600x16xf32>
    %2 = tpu.matmul %0, %1, %cst {dimension_numbers = #tpu.dot_dimension_numbers<[1], [0], [0], [1], [0, 0, 1, 1], [], []>} : vector<1600x256xbf16>, vector<256x16xbf16>, vector<1600x16xf32> -> vector<1600x16xf32>
    %3 = vector.extract_strided_slice %2 {offsets = [0, 0], sizes = [400, 16], strides = [1, 1]} : vector<1600x16xf32> to vector<400x16xf32>
    %4 = vector.extract_strided_slice %2 {offsets = [400, 0], sizes = [400, 16], strides = [1, 1]} : vector<1600x16xf32> to vector<400x16xf32>
    %5 = arith.maximumf %3, %4 : vector<400x16xf32>
    %6 = vector.extract_strided_slice %2 {offsets = [800, 0], sizes = [400, 16], strides = [1, 1]} : vector<1600x16xf32> to vector<400x16xf32>
    %7 = vector.extract_strided_slice %2 {offsets = [1200, 0], sizes = [400, 16], strides = [1, 1]} : vector<1600x16xf32> to vector<400x16xf32>
    %8 = arith.maximumf %6, %7 : vector<400x16xf32>
    %9 = arith.maximumf %5, %8 : vector<400x16xf32>
    %c0_3 = arith.constant 0 : index
    %c0_4 = arith.constant 0 : index
    %10 = vector.load %arg2[%c0_3, %c0_4] : memref<1x16xf32, #tpu.memory_space<vmem>>, vector<1x16xf32>
    %11 = vector.broadcast %10 : vector<1x16xf32> to vector<400x16xf32>
    %12 = arith.addf %9, %11 : vector<400x16xf32>
    %cst_5 = arith.constant 0.000000e+00 : f32
    %13 = vector.broadcast %cst_5 : f32 to vector<400x16xf32>
    %14 = arith.maximumf %12, %13 : vector<400x16xf32>
    %15 = arith.truncf %14 : vector<400x16xf32> to vector<400x16xbf16>
    %16 = vector.extract_strided_slice %15 {offsets = [0, 0], sizes = [16, 16], strides = [1, 1]} : vector<400x16xbf16> to vector<16x16xbf16>
    %c0_6 = arith.constant 0 : index
    %c0_7 = arith.constant 0 : index
    %c0_8 = arith.constant 0 : index
    %17 = vector.load %arg3[%c0_6, %c0_7, %c0_8] : memref<25x16x128xbf16, #tpu.memory_space<vmem>>, vector<1x16x128xbf16>
    %18 = vector.shape_cast %17 : vector<1x16x128xbf16> to vector<16x128xbf16>
    %cst_9 = arith.constant dense<0.000000e+00> : vector<16x128xf32>
    %19 = tpu.matmul %16, %18, %cst_9 {dimension_numbers = #tpu.dot_dimension_numbers<[1], [0], [0], [1], [0, 0, 1, 1], [], []>} : vector<16x16xbf16>, vector<16x128xbf16>, vector<16x128xf32> -> vector<16x128xf32>
    %20 = vector.extract_strided_slice %15 {offsets = [16, 0], sizes = [16, 16], strides = [1, 1]} : vector<400x16xbf16> to vector<16x16xbf16>
    %c1 = arith.constant 1 : index
    %c0_10 = arith.constant 0 : index
    %c0_11 = arith.constant 0 : index
    %21 = vector.load %arg3[%c1, %c0_10, %c0_11] : memref<25x16x128xbf16, #tpu.memory_space<vmem>>, vector<1x16x128xbf16>
    %22 = vector.shape_cast %21 : vector<1x16x128xbf16> to vector<16x128xbf16>
    %cst_12 = arith.constant dense<0.000000e+00> : vector<16x128xf32>
    %23 = tpu.matmul %20, %22, %cst_12 {dimension_numbers = #tpu.dot_dimension_numbers<[1], [0], [0], [1], [0, 0, 1, 1], [], []>} : vector<16x16xbf16>, vector<16x128xbf16>, vector<16x128xf32> -> vector<16x128xf32>
    %24 = arith.addf %19, %23 : vector<16x128xf32>
    %25 = vector.extract_strided_slice %15 {offsets = [32, 0], sizes = [16, 16], strides = [1, 1]} : vector<400x16xbf16> to vector<16x16xbf16>
    %c2 = arith.constant 2 : index
    %c0_13 = arith.constant 0 : index
    %c0_14 = arith.constant 0 : index
    %26 = vector.load %arg3[%c2, %c0_13, %c0_14] : memref<25x16x128xbf16, #tpu.memory_space<vmem>>, vector<1x16x128xbf16>
    %27 = vector.shape_cast %26 : vector<1x16x128xbf16> to vector<16x128xbf16>
    %cst_15 = arith.constant dense<0.000000e+00> : vector<16x128xf32>
    %28 = tpu.matmul %25, %27, %cst_15 {dimension_numbers = #tpu.dot_dimension_numbers<[1], [0], [0], [1], [0, 0, 1, 1], [], []>} : vector<16x16xbf16>, vector<16x128xbf16>, vector<16x128xf32> -> vector<16x128xf32>
    %29 = arith.addf %24, %28 : vector<16x128xf32>
    %30 = vector.extract_strided_slice %15 {offsets = [48, 0], sizes = [16, 16], strides = [1, 1]} : vector<400x16xbf16> to vector<16x16xbf16>
    %c3 = arith.constant 3 : index
    %c0_16 = arith.constant 0 : index
    %c0_17 = arith.constant 0 : index
    %31 = vector.load %arg3[%c3, %c0_16, %c0_17] : memref<25x16x128xbf16, #tpu.memory_space<vmem>>, vector<1x16x128xbf16>
    %32 = vector.shape_cast %31 : vector<1x16x128xbf16> to vector<16x128xbf16>
    %cst_18 = arith.constant dense<0.000000e+00> : vector<16x128xf32>
    %33 = tpu.matmul %30, %32, %cst_18 {dimension_numbers = #tpu.dot_dimension_numbers<[1], [0], [0], [1], [0, 0, 1, 1], [], []>} : vector<16x16xbf16>, vector<16x128xbf16>, vector<16x128xf32> -> vector<16x128xf32>
    %34 = arith.addf %29, %33 : vector<16x128xf32>
    %35 = vector.extract_strided_slice %15 {offsets = [64, 0], sizes = [16, 16], strides = [1, 1]} : vector<400x16xbf16> to vector<16x16xbf16>
    %c4 = arith.constant 4 : index
    %c0_19 = arith.constant 0 : index
    %c0_20 = arith.constant 0 : index
    %36 = vector.load %arg3[%c4, %c0_19, %c0_20] : memref<25x16x128xbf16, #tpu.memory_space<vmem>>, vector<1x16x128xbf16>
    %37 = vector.shape_cast %36 : vector<1x16x128xbf16> to vector<16x128xbf16>
    %cst_21 = arith.constant dense<0.000000e+00> : vector<16x128xf32>
    %38 = tpu.matmul %35, %37, %cst_21 {dimension_numbers = #tpu.dot_dimension_numbers<[1], [0], [0], [1], [0, 0, 1, 1], [], []>} : vector<16x16xbf16>, vector<16x128xbf16>, vector<16x128xf32> -> vector<16x128xf32>
    %39 = arith.addf %34, %38 : vector<16x128xf32>
    %40 = vector.extract_strided_slice %15 {offsets = [80, 0], sizes = [16, 16], strides = [1, 1]} : vector<400x16xbf16> to vector<16x16xbf16>
    %c5 = arith.constant 5 : index
    %c0_22 = arith.constant 0 : index
    %c0_23 = arith.constant 0 : index
    %41 = vector.load %arg3[%c5, %c0_22, %c0_23] : memref<25x16x128xbf16, #tpu.memory_space<vmem>>, vector<1x16x128xbf16>
    %42 = vector.shape_cast %41 : vector<1x16x128xbf16> to vector<16x128xbf16>
    %cst_24 = arith.constant dense<0.000000e+00> : vector<16x128xf32>
    %43 = tpu.matmul %40, %42, %cst_24 {dimension_numbers = #tpu.dot_dimension_numbers<[1], [0], [0], [1], [0, 0, 1, 1], [], []>} : vector<16x16xbf16>, vector<16x128xbf16>, vector<16x128xf32> -> vector<16x128xf32>
    %44 = arith.addf %39, %43 : vector<16x128xf32>
    %45 = vector.extract_strided_slice %15 {offsets = [96, 0], sizes = [16, 16], strides = [1, 1]} : vector<400x16xbf16> to vector<16x16xbf16>
    %c6 = arith.constant 6 : index
    %c0_25 = arith.constant 0 : index
    %c0_26 = arith.constant 0 : index
    %46 = vector.load %arg3[%c6, %c0_25, %c0_26] : memref<25x16x128xbf16, #tpu.memory_space<vmem>>, vector<1x16x128xbf16>
    %47 = vector.shape_cast %46 : vector<1x16x128xbf16> to vector<16x128xbf16>
    %cst_27 = arith.constant dense<0.000000e+00> : vector<16x128xf32>
    %48 = tpu.matmul %45, %47, %cst_27 {dimension_numbers = #tpu.dot_dimension_numbers<[1], [0], [0], [1], [0, 0, 1, 1], [], []>} : vector<16x16xbf16>, vector<16x128xbf16>, vector<16x128xf32> -> vector<16x128xf32>
    %49 = arith.addf %44, %48 : vector<16x128xf32>
    %50 = vector.extract_strided_slice %15 {offsets = [112, 0], sizes = [16, 16], strides = [1, 1]} : vector<400x16xbf16> to vector<16x16xbf16>
    %c7 = arith.constant 7 : index
    %c0_28 = arith.constant 0 : index
    %c0_29 = arith.constant 0 : index
    %51 = vector.load %arg3[%c7, %c0_28, %c0_29] : memref<25x16x128xbf16, #tpu.memory_space<vmem>>, vector<1x16x128xbf16>
    %52 = vector.shape_cast %51 : vector<1x16x128xbf16> to vector<16x128xbf16>
    %cst_30 = arith.constant dense<0.000000e+00> : vector<16x128xf32>
    %53 = tpu.matmul %50, %52, %cst_30 {dimension_numbers = #tpu.dot_dimension_numbers<[1], [0], [0], [1], [0, 0, 1, 1], [], []>} : vector<16x16xbf16>, vector<16x128xbf16>, vector<16x128xf32> -> vector<16x128xf32>
    %54 = arith.addf %49, %53 : vector<16x128xf32>
    %55 = vector.extract_strided_slice %15 {offsets = [128, 0], sizes = [16, 16], strides = [1, 1]} : vector<400x16xbf16> to vector<16x16xbf16>
    %c8 = arith.constant 8 : index
    %c0_31 = arith.constant 0 : index
    %c0_32 = arith.constant 0 : index
    %56 = vector.load %arg3[%c8, %c0_31, %c0_32] : memref<25x16x128xbf16, #tpu.memory_space<vmem>>, vector<1x16x128xbf16>
    %57 = vector.shape_cast %56 : vector<1x16x128xbf16> to vector<16x128xbf16>
    %cst_33 = arith.constant dense<0.000000e+00> : vector<16x128xf32>
    %58 = tpu.matmul %55, %57, %cst_33 {dimension_numbers = #tpu.dot_dimension_numbers<[1], [0], [0], [1], [0, 0, 1, 1], [], []>} : vector<16x16xbf16>, vector<16x128xbf16>, vector<16x128xf32> -> vector<16x128xf32>
    %59 = arith.addf %54, %58 : vector<16x128xf32>
    %60 = vector.extract_strided_slice %15 {offsets = [144, 0], sizes = [16, 16], strides = [1, 1]} : vector<400x16xbf16> to vector<16x16xbf16>
    %c9 = arith.constant 9 : index
    %c0_34 = arith.constant 0 : index
    %c0_35 = arith.constant 0 : index
    %61 = vector.load %arg3[%c9, %c0_34, %c0_35] : memref<25x16x128xbf16, #tpu.memory_space<vmem>>, vector<1x16x128xbf16>
    %62 = vector.shape_cast %61 : vector<1x16x128xbf16> to vector<16x128xbf16>
    %cst_36 = arith.constant dense<0.000000e+00> : vector<16x128xf32>
    %63 = tpu.matmul %60, %62, %cst_36 {dimension_numbers = #tpu.dot_dimension_numbers<[1], [0], [0], [1], [0, 0, 1, 1], [], []>} : vector<16x16xbf16>, vector<16x128xbf16>, vector<16x128xf32> -> vector<16x128xf32>
    %64 = arith.addf %59, %63 : vector<16x128xf32>
    %65 = vector.extract_strided_slice %15 {offsets = [160, 0], sizes = [16, 16], strides = [1, 1]} : vector<400x16xbf16> to vector<16x16xbf16>
    %c10 = arith.constant 10 : index
    %c0_37 = arith.constant 0 : index
    %c0_38 = arith.constant 0 : index
    %66 = vector.load %arg3[%c10, %c0_37, %c0_38] : memref<25x16x128xbf16, #tpu.memory_space<vmem>>, vector<1x16x128xbf16>
    %67 = vector.shape_cast %66 : vector<1x16x128xbf16> to vector<16x128xbf16>
    %cst_39 = arith.constant dense<0.000000e+00> : vector<16x128xf32>
    %68 = tpu.matmul %65, %67, %cst_39 {dimension_numbers = #tpu.dot_dimension_numbers<[1], [0], [0], [1], [0, 0, 1, 1], [], []>} : vector<16x16xbf16>, vector<16x128xbf16>, vector<16x128xf32> -> vector<16x128xf32>
    %69 = arith.addf %64, %68 : vector<16x128xf32>
    %70 = vector.extract_strided_slice %15 {offsets = [176, 0], sizes = [16, 16], strides = [1, 1]} : vector<400x16xbf16> to vector<16x16xbf16>
    %c11 = arith.constant 11 : index
    %c0_40 = arith.constant 0 : index
    %c0_41 = arith.constant 0 : index
    %71 = vector.load %arg3[%c11, %c0_40, %c0_41] : memref<25x16x128xbf16, #tpu.memory_space<vmem>>, vector<1x16x128xbf16>
    %72 = vector.shape_cast %71 : vector<1x16x128xbf16> to vector<16x128xbf16>
    %cst_42 = arith.constant dense<0.000000e+00> : vector<16x128xf32>
    %73 = tpu.matmul %70, %72, %cst_42 {dimension_numbers = #tpu.dot_dimension_numbers<[1], [0], [0], [1], [0, 0, 1, 1], [], []>} : vector<16x16xbf16>, vector<16x128xbf16>, vector<16x128xf32> -> vector<16x128xf32>
    %74 = arith.addf %69, %73 : vector<16x128xf32>
    %75 = vector.extract_strided_slice %15 {offsets = [192, 0], sizes = [16, 16], strides = [1, 1]} : vector<400x16xbf16> to vector<16x16xbf16>
    %c12 = arith.constant 12 : index
    %c0_43 = arith.constant 0 : index
    %c0_44 = arith.constant 0 : index
    %76 = vector.load %arg3[%c12, %c0_43, %c0_44] : memref<25x16x128xbf16, #tpu.memory_space<vmem>>, vector<1x16x128xbf16>
    %77 = vector.shape_cast %76 : vector<1x16x128xbf16> to vector<16x128xbf16>
    %cst_45 = arith.constant dense<0.000000e+00> : vector<16x128xf32>
    %78 = tpu.matmul %75, %77, %cst_45 {dimension_numbers = #tpu.dot_dimension_numbers<[1], [0], [0], [1], [0, 0, 1, 1], [], []>} : vector<16x16xbf16>, vector<16x128xbf16>, vector<16x128xf32> -> vector<16x128xf32>
    %79 = arith.addf %74, %78 : vector<16x128xf32>
    %80 = vector.extract_strided_slice %15 {offsets = [208, 0], sizes = [16, 16], strides = [1, 1]} : vector<400x16xbf16> to vector<16x16xbf16>
    %c13 = arith.constant 13 : index
    %c0_46 = arith.constant 0 : index
    %c0_47 = arith.constant 0 : index
    %81 = vector.load %arg3[%c13, %c0_46, %c0_47] : memref<25x16x128xbf16, #tpu.memory_space<vmem>>, vector<1x16x128xbf16>
    %82 = vector.shape_cast %81 : vector<1x16x128xbf16> to vector<16x128xbf16>
    %cst_48 = arith.constant dense<0.000000e+00> : vector<16x128xf32>
    %83 = tpu.matmul %80, %82, %cst_48 {dimension_numbers = #tpu.dot_dimension_numbers<[1], [0], [0], [1], [0, 0, 1, 1], [], []>} : vector<16x16xbf16>, vector<16x128xbf16>, vector<16x128xf32> -> vector<16x128xf32>
    %84 = arith.addf %79, %83 : vector<16x128xf32>
    %85 = vector.extract_strided_slice %15 {offsets = [224, 0], sizes = [16, 16], strides = [1, 1]} : vector<400x16xbf16> to vector<16x16xbf16>
    %c14 = arith.constant 14 : index
    %c0_49 = arith.constant 0 : index
    %c0_50 = arith.constant 0 : index
    %86 = vector.load %arg3[%c14, %c0_49, %c0_50] : memref<25x16x128xbf16, #tpu.memory_space<vmem>>, vector<1x16x128xbf16>
    %87 = vector.shape_cast %86 : vector<1x16x128xbf16> to vector<16x128xbf16>
    %cst_51 = arith.constant dense<0.000000e+00> : vector<16x128xf32>
    %88 = tpu.matmul %85, %87, %cst_51 {dimension_numbers = #tpu.dot_dimension_numbers<[1], [0], [0], [1], [0, 0, 1, 1], [], []>} : vector<16x16xbf16>, vector<16x128xbf16>, vector<16x128xf32> -> vector<16x128xf32>
    %89 = arith.addf %84, %88 : vector<16x128xf32>
    %90 = vector.extract_strided_slice %15 {offsets = [240, 0], sizes = [16, 16], strides = [1, 1]} : vector<400x16xbf16> to vector<16x16xbf16>
    %c15 = arith.constant 15 : index
    %c0_52 = arith.constant 0 : index
    %c0_53 = arith.constant 0 : index
    %91 = vector.load %arg3[%c15, %c0_52, %c0_53] : memref<25x16x128xbf16, #tpu.memory_space<vmem>>, vector<1x16x128xbf16>
    %92 = vector.shape_cast %91 : vector<1x16x128xbf16> to vector<16x128xbf16>
    %cst_54 = arith.constant dense<0.000000e+00> : vector<16x128xf32>
    %93 = tpu.matmul %90, %92, %cst_54 {dimension_numbers = #tpu.dot_dimension_numbers<[1], [0], [0], [1], [0, 0, 1, 1], [], []>} : vector<16x16xbf16>, vector<16x128xbf16>, vector<16x128xf32> -> vector<16x128xf32>
    %94 = arith.addf %89, %93 : vector<16x128xf32>
    %95 = vector.extract_strided_slice %15 {offsets = [256, 0], sizes = [16, 16], strides = [1, 1]} : vector<400x16xbf16> to vector<16x16xbf16>
    %c16 = arith.constant 16 : index
    %c0_55 = arith.constant 0 : index
    %c0_56 = arith.constant 0 : index
    %96 = vector.load %arg3[%c16, %c0_55, %c0_56] : memref<25x16x128xbf16, #tpu.memory_space<vmem>>, vector<1x16x128xbf16>
    %97 = vector.shape_cast %96 : vector<1x16x128xbf16> to vector<16x128xbf16>
    %cst_57 = arith.constant dense<0.000000e+00> : vector<16x128xf32>
    %98 = tpu.matmul %95, %97, %cst_57 {dimension_numbers = #tpu.dot_dimension_numbers<[1], [0], [0], [1], [0, 0, 1, 1], [], []>} : vector<16x16xbf16>, vector<16x128xbf16>, vector<16x128xf32> -> vector<16x128xf32>
    %99 = arith.addf %94, %98 : vector<16x128xf32>
    %100 = vector.extract_strided_slice %15 {offsets = [272, 0], sizes = [16, 16], strides = [1, 1]} : vector<400x16xbf16> to vector<16x16xbf16>
    %c17 = arith.constant 17 : index
    %c0_58 = arith.constant 0 : index
    %c0_59 = arith.constant 0 : index
    %101 = vector.load %arg3[%c17, %c0_58, %c0_59] : memref<25x16x128xbf16, #tpu.memory_space<vmem>>, vector<1x16x128xbf16>
    %102 = vector.shape_cast %101 : vector<1x16x128xbf16> to vector<16x128xbf16>
    %cst_60 = arith.constant dense<0.000000e+00> : vector<16x128xf32>
    %103 = tpu.matmul %100, %102, %cst_60 {dimension_numbers = #tpu.dot_dimension_numbers<[1], [0], [0], [1], [0, 0, 1, 1], [], []>} : vector<16x16xbf16>, vector<16x128xbf16>, vector<16x128xf32> -> vector<16x128xf32>
    %104 = arith.addf %99, %103 : vector<16x128xf32>
    %105 = vector.extract_strided_slice %15 {offsets = [288, 0], sizes = [16, 16], strides = [1, 1]} : vector<400x16xbf16> to vector<16x16xbf16>
    %c18 = arith.constant 18 : index
    %c0_61 = arith.constant 0 : index
    %c0_62 = arith.constant 0 : index
    %106 = vector.load %arg3[%c18, %c0_61, %c0_62] : memref<25x16x128xbf16, #tpu.memory_space<vmem>>, vector<1x16x128xbf16>
    %107 = vector.shape_cast %106 : vector<1x16x128xbf16> to vector<16x128xbf16>
    %cst_63 = arith.constant dense<0.000000e+00> : vector<16x128xf32>
    %108 = tpu.matmul %105, %107, %cst_63 {dimension_numbers = #tpu.dot_dimension_numbers<[1], [0], [0], [1], [0, 0, 1, 1], [], []>} : vector<16x16xbf16>, vector<16x128xbf16>, vector<16x128xf32> -> vector<16x128xf32>
    %109 = arith.addf %104, %108 : vector<16x128xf32>
    %110 = vector.extract_strided_slice %15 {offsets = [304, 0], sizes = [16, 16], strides = [1, 1]} : vector<400x16xbf16> to vector<16x16xbf16>
    %c19 = arith.constant 19 : index
    %c0_64 = arith.constant 0 : index
    %c0_65 = arith.constant 0 : index
    %111 = vector.load %arg3[%c19, %c0_64, %c0_65] : memref<25x16x128xbf16, #tpu.memory_space<vmem>>, vector<1x16x128xbf16>
    %112 = vector.shape_cast %111 : vector<1x16x128xbf16> to vector<16x128xbf16>
    %cst_66 = arith.constant dense<0.000000e+00> : vector<16x128xf32>
    %113 = tpu.matmul %110, %112, %cst_66 {dimension_numbers = #tpu.dot_dimension_numbers<[1], [0], [0], [1], [0, 0, 1, 1], [], []>} : vector<16x16xbf16>, vector<16x128xbf16>, vector<16x128xf32> -> vector<16x128xf32>
    %114 = arith.addf %109, %113 : vector<16x128xf32>
    %115 = vector.extract_strided_slice %15 {offsets = [320, 0], sizes = [16, 16], strides = [1, 1]} : vector<400x16xbf16> to vector<16x16xbf16>
    %c20 = arith.constant 20 : index
    %c0_67 = arith.constant 0 : index
    %c0_68 = arith.constant 0 : index
    %116 = vector.load %arg3[%c20, %c0_67, %c0_68] : memref<25x16x128xbf16, #tpu.memory_space<vmem>>, vector<1x16x128xbf16>
    %117 = vector.shape_cast %116 : vector<1x16x128xbf16> to vector<16x128xbf16>
    %cst_69 = arith.constant dense<0.000000e+00> : vector<16x128xf32>
    %118 = tpu.matmul %115, %117, %cst_69 {dimension_numbers = #tpu.dot_dimension_numbers<[1], [0], [0], [1], [0, 0, 1, 1], [], []>} : vector<16x16xbf16>, vector<16x128xbf16>, vector<16x128xf32> -> vector<16x128xf32>
    %119 = arith.addf %114, %118 : vector<16x128xf32>
    %120 = vector.extract_strided_slice %15 {offsets = [336, 0], sizes = [16, 16], strides = [1, 1]} : vector<400x16xbf16> to vector<16x16xbf16>
    %c21 = arith.constant 21 : index
    %c0_70 = arith.constant 0 : index
    %c0_71 = arith.constant 0 : index
    %121 = vector.load %arg3[%c21, %c0_70, %c0_71] : memref<25x16x128xbf16, #tpu.memory_space<vmem>>, vector<1x16x128xbf16>
    %122 = vector.shape_cast %121 : vector<1x16x128xbf16> to vector<16x128xbf16>
    %cst_72 = arith.constant dense<0.000000e+00> : vector<16x128xf32>
    %123 = tpu.matmul %120, %122, %cst_72 {dimension_numbers = #tpu.dot_dimension_numbers<[1], [0], [0], [1], [0, 0, 1, 1], [], []>} : vector<16x16xbf16>, vector<16x128xbf16>, vector<16x128xf32> -> vector<16x128xf32>
    %124 = arith.addf %119, %123 : vector<16x128xf32>
    %125 = vector.extract_strided_slice %15 {offsets = [352, 0], sizes = [16, 16], strides = [1, 1]} : vector<400x16xbf16> to vector<16x16xbf16>
    %c22 = arith.constant 22 : index
    %c0_73 = arith.constant 0 : index
    %c0_74 = arith.constant 0 : index
    %126 = vector.load %arg3[%c22, %c0_73, %c0_74] : memref<25x16x128xbf16, #tpu.memory_space<vmem>>, vector<1x16x128xbf16>
    %127 = vector.shape_cast %126 : vector<1x16x128xbf16> to vector<16x128xbf16>
    %cst_75 = arith.constant dense<0.000000e+00> : vector<16x128xf32>
    %128 = tpu.matmul %125, %127, %cst_75 {dimension_numbers = #tpu.dot_dimension_numbers<[1], [0], [0], [1], [0, 0, 1, 1], [], []>} : vector<16x16xbf16>, vector<16x128xbf16>, vector<16x128xf32> -> vector<16x128xf32>
    %129 = arith.addf %124, %128 : vector<16x128xf32>
    %130 = vector.extract_strided_slice %15 {offsets = [368, 0], sizes = [16, 16], strides = [1, 1]} : vector<400x16xbf16> to vector<16x16xbf16>
    %c23 = arith.constant 23 : index
    %c0_76 = arith.constant 0 : index
    %c0_77 = arith.constant 0 : index
    %131 = vector.load %arg3[%c23, %c0_76, %c0_77] : memref<25x16x128xbf16, #tpu.memory_space<vmem>>, vector<1x16x128xbf16>
    %132 = vector.shape_cast %131 : vector<1x16x128xbf16> to vector<16x128xbf16>
    %cst_78 = arith.constant dense<0.000000e+00> : vector<16x128xf32>
    %133 = tpu.matmul %130, %132, %cst_78 {dimension_numbers = #tpu.dot_dimension_numbers<[1], [0], [0], [1], [0, 0, 1, 1], [], []>} : vector<16x16xbf16>, vector<16x128xbf16>, vector<16x128xf32> -> vector<16x128xf32>
    %134 = arith.addf %129, %133 : vector<16x128xf32>
    %135 = vector.extract_strided_slice %15 {offsets = [384, 0], sizes = [16, 16], strides = [1, 1]} : vector<400x16xbf16> to vector<16x16xbf16>
    %c24 = arith.constant 24 : index
    %c0_79 = arith.constant 0 : index
    %c0_80 = arith.constant 0 : index
    %136 = vector.load %arg3[%c24, %c0_79, %c0_80] : memref<25x16x128xbf16, #tpu.memory_space<vmem>>, vector<1x16x128xbf16>
    %137 = vector.shape_cast %136 : vector<1x16x128xbf16> to vector<16x128xbf16>
    %cst_81 = arith.constant dense<0.000000e+00> : vector<16x128xf32>
    %138 = tpu.matmul %135, %137, %cst_81 {dimension_numbers = #tpu.dot_dimension_numbers<[1], [0], [0], [1], [0, 0, 1, 1], [], []>} : vector<16x16xbf16>, vector<16x128xbf16>, vector<16x128xf32> -> vector<16x128xf32>
    %139 = arith.addf %134, %138 : vector<16x128xf32>
    %c0_82 = arith.constant 0 : index
    %c0_83 = arith.constant 0 : index
    %140 = vector.load %arg4[%c0_82, %c0_83] : memref<1x128xf32, #tpu.memory_space<vmem>>, vector<1x128xf32>
    %141 = vector.broadcast %140 : vector<1x128xf32> to vector<16x128xf32>
    %142 = arith.addf %139, %141 : vector<16x128xf32>
    %cst_84 = arith.constant 0.000000e+00 : f32
    %143 = vector.broadcast %cst_84 : f32 to vector<16x128xf32>
    %144 = arith.maximumf %142, %143 : vector<16x128xf32>
    %145 = arith.truncf %144 : vector<16x128xf32> to vector<16x128xbf16>
    %c0_85 = arith.constant 0 : index
    %c0_86 = arith.constant 0 : index
    %146 = vector.load %arg5[%c0_85, %c0_86] : memref<128x128xbf16, #tpu.memory_space<vmem>>, vector<128x128xbf16>
    %cst_87 = arith.constant dense<0.000000e+00> : vector<16x128xf32>
    %147 = tpu.matmul %145, %146, %cst_87 {dimension_numbers = #tpu.dot_dimension_numbers<[1], [0], [0], [1], [0, 0, 1, 1], [], []>} : vector<16x128xbf16>, vector<128x128xbf16>, vector<16x128xf32> -> vector<16x128xf32>
    %c0_88 = arith.constant 0 : index
    %c0_89 = arith.constant 0 : index
    %148 = vector.load %arg6[%c0_88, %c0_89] : memref<1x128xf32, #tpu.memory_space<vmem>>, vector<1x128xf32>
    %149 = vector.broadcast %148 : vector<1x128xf32> to vector<16x128xf32>
    %150 = arith.addf %147, %149 : vector<16x128xf32>
    %cst_90 = arith.constant 0.000000e+00 : f32
    %151 = vector.broadcast %cst_90 : f32 to vector<16x128xf32>
    %152 = arith.maximumf %150, %151 : vector<16x128xf32>
    %153 = arith.truncf %152 : vector<16x128xf32> to vector<16x128xbf16>
    %c0_91 = arith.constant 0 : index
    %c0_92 = arith.constant 0 : index
    %154 = vector.load %arg7[%c0_91, %c0_92] : memref<128x128xbf16, #tpu.memory_space<vmem>>, vector<128x128xbf16>
    %cst_93 = arith.constant dense<0.000000e+00> : vector<16x128xf32>
    %155 = tpu.matmul %153, %154, %cst_93 {dimension_numbers = #tpu.dot_dimension_numbers<[1], [0], [0], [1], [0, 0, 1, 1], [], []>} : vector<16x128xbf16>, vector<128x128xbf16>, vector<16x128xf32> -> vector<16x128xf32>
    %c0_94 = arith.constant 0 : index
    %c0_95 = arith.constant 0 : index
    %156 = vector.load %arg8[%c0_94, %c0_95] : memref<1x128xf32, #tpu.memory_space<vmem>>, vector<1x128xf32>
    %157 = vector.broadcast %156 : vector<1x128xf32> to vector<16x128xf32>
    %158 = arith.addf %155, %157 : vector<16x128xf32>
    %c0_96 = arith.constant 0 : index
    %c0_97 = arith.constant 0 : index
    %159 = vector.load %arg9[%c0_96, %c0_97] : memref<16x128xf32, #tpu.memory_space<vmem>>, vector<16x128xf32>
    tpu.vector_store %arg9[%c0_96, %c0_97], %158 {strides = array<i32>} : memref<16x128xf32, #tpu.memory_space<vmem>>, vector<16x128xf32>,
    return
  }
}

</mosaic_0001>

<bundles_post_ra>
// kernel: cnn_forward.2
= control target key start
LH: loop header
LB: loop body
LE: loop exit
PB: predicated region body
PF: predicated region fallthrough
CT: control target
= control target key end

     0   :  { %vm2169_vm0 = vcmask 60416   ;;  %s3780_s1 = inlined_call_operand.vmem [shape: bf16[128,8], index: 1, kind: input, shape index: {}]   ;;  %s3781_s0 = inlined_call_operand.vmem [shape: bf16[1600,128], index: 0, kind: input, shape index: {}]   ;;  %s3782_s2 = inlined_call_operand.vmem [shape: f32[1,8], index: 2, kind: input, shape index: {}]   ;;  %s3783_s3 = inlined_call_operand.vmem [shape: bf16[400,8], index: 3, kind: output, shape index: {}]  }
   0x1   :  { %v2773_v0 = vld [vmem:[%s3780_s1] sm:$0xff]   ;;  %v2774_v1 = vld [vmem:[%s3780_s1 + $0x8] sm:$0xff]   ;;  %v2775_v2 = vld [vmem:[%s3780_s1 + $0x10] sm:$0xff]  }
   0x2   :  { %2541 = vmatprep.subr.bf16.mxu0 %v2773_v0  ;;  %2757 = vmatprep.subr.bf16.mxu1 %v2773_v0  ;;  %v2776_v3 = vld [vmem:[%s3780_s1 + $0x18] sm:$0xff]   ;;  %v2781_v4 = vld [vmem:[%s3781_s0] sm:$0xff]   ;;  %v2782_v5 = vld [vmem:[%s3781_s0 + $0x190] sm:$0xff]  }
   0x3   :  { %2542 = vmatpush3.bf16.msra.mxu0 %v2773_v0  ;;  %2765 = vmatpush3.bf16.msra.mxu1 %v2773_v0  ;;  %v2777_v6 = vld [vmem:[%s3780_s1 + $0x20] sm:$0xff]   ;;  %v2778_v7 = vld [vmem:[%s3780_s1 + $0x28] sm:$0xff]   ;;  %v2779_v8 = vld [vmem:[%s3780_s1 + $0x30] sm:$0xff]  }
   0x4   :  { %2543 = vmatprep.subr.bf16.mxu0 %v2774_v1  ;;  %2758 = vmatprep.subr.bf16.mxu1 %v2774_v1  ;;  %v2780_v9 = vld [vmem:[%s3780_s1 + $0x38] sm:$0xff]   ;;  %v2783_v10 = vld [vmem:[%s3781_s0 + $0x8] sm:$0xff]   ;;  %v2785_v12 = vld [vmem:[%s3781_s0 + $0x10] sm:$0xff]  }
   0x5   :  { %2557 = vmatprep.mubr.bf16.mxu0 %v2781_v4  ;;  %2657 = vmatprep.mubr.bf16.mxu1 %v2782_v5  ;;  %v2784_v11 = vld [vmem:[%s3781_s0 + $0x198] sm:$0xff]   ;;  %v2786_v13 = vld [vmem:[%s3781_s0 + $0x1a0] sm:$0xff]   ;;  %v2788_v15 = vld [vmem:[%s3781_s0 + $0x1a8] sm:$0xff]  }
   0x6   :  { %v2787_v14 = vld [vmem:[%s3781_s0 + $0x18] sm:$0xff]   ;;  %v2789_v16 = vld [vmem:[%s3781_s0 + $0x20] sm:$0xff]   ;;  %v2790_v17 = vld [vmem:[%s3781_s0 + $0x1b0] sm:$0xff]  }
   0x7   :  { %2544 = vmatpush3.bf16.msra.mxu0 %v2774_v1  ;;  %2766 = vmatpush3.bf16.msra.mxu1 %v2774_v1  ;;  %v2791_v18 = vld [vmem:[%s3781_s0 + $0x28] sm:$0xff]   ;;  %v2792_v19 = vld [vmem:[%s3781_s0 + $0x1b8] sm:$0xff]   ;;  %v2793_v20 = vld [vmem:[%s3781_s0 + $0x30] sm:$0xff]  }
   0x8   :  { %2545 = vmatprep.subr.bf16.mxu0 %v2775_v2  ;;  %2759 = vmatprep.subr.bf16.mxu1 %v2775_v2  ;;  %v2794_v21 = vld [vmem:[%s3781_s0 + $0x1c0] sm:$0xff]   ;;  %v2795_v22 = vld [vmem:[%s3781_s0 + $0x38] sm:$0xff]   ;;  %v2796_v23 = vld [vmem:[%s3781_s0 + $0x1c8] sm:$0xff]  }
   0x9   :  { %v2797_v24 = vld [vmem:[%s3781_s0 + $0x40] sm:$0xff]   ;;  %v2798_v25 = vld [vmem:[%s3781_s0 + $0x1d0] sm:$0xff]   ;;  %v2799_v26 = vld [vmem:[%s3781_s0 + $0x48] sm:$0xff]  }
   0xa   :  { %v2800_v27 = vld [vmem:[%s3781_s0 + $0x1d8] sm:$0xff]   ;;  %v2801_v28 = vld [vmem:[%s3781_s0 + $0x50] sm:$0xff]   ;;  %v2802_v29 = vld [vmem:[%s3781_s0 + $0x1e0] sm:$0xff]  }
   0xb   :  { %2546 = vmatpush3.bf16.msra.mxu0 %v2775_v2  ;;  %2767 = vmatpush3.bf16.msra.mxu1 %v2775_v2  ;;  %v2803_v30 = vld [vmem:[%s3781_s0 + $0x58] sm:$0xff]   ;;  %v2804_v31 = vld [vmem:[%s3781_s0 + $0x1e8] sm:$0xff]   ;;  %v2805_v32 = vld [vmem:[%s3781_s0 + $0x60] sm:$0xff]  }
   0xc   :  { %2547 = vmatprep.subr.bf16.mxu0 %v2776_v3  ;;  %2760 = vmatprep.subr.bf16.mxu1 %v2776_v3  ;;  %v2806_v33 = vld [vmem:[%s3781_s0 + $0x1f0] sm:$0xff]   ;;  %v2807_v34 = vld [vmem:[%s3781_s0 + $0x68] sm:$0xff]   ;;  %v2808_v35 = vld [vmem:[%s3781_s0 + $0x1f8] sm:$0xff]  }
   0xd   :  { %v2809_v36 = vld [vmem:[%s3781_s0 + $0x70] sm:$0xff]   ;;  %v2810_v37 = vld [vmem:[%s3781_s0 + $0x200] sm:$0xff]   ;;  %v2811_v38 = vld [vmem:[%s3781_s0 + $0x78] sm:$0xff]  }
   0xe   :  { %v2812_v39 = vld [vmem:[%s3781_s0 + $0x208] sm:$0xff]   ;;  %v2813_v40 = vld [vmem:[%s3781_s0 + $0x80] sm:$0xff]   ;;  %v2814_v41 = vld [vmem:[%s3781_s0 + $0x210] sm:$0xff]  }
   0xf   :  { %2548 = vmatpush3.bf16.msra.mxu0 %v2776_v3  ;;  %2768 = vmatpush3.bf16.msra.mxu1 %v2776_v3  ;;  %v2815_v42 = vld [vmem:[%s3781_s0 + $0x88] sm:$0xff]   ;;  %v2816_v43 = vld [vmem:[%s3781_s0 + $0x218] sm:$0xff]   ;;  %v2817_v44 = vld [vmem:[%s3781_s0 + $0x90] sm:$0xff]  }
  0x10   :  { %2549 = vmatprep.subr.bf16.mxu0 %v2777_v6  ;;  %2761 = vmatprep.subr.bf16.mxu1 %v2777_v6  ;;  %v2818_v45 = vld [vmem:[%s3781_s0 + $0x220] sm:$0xff]   ;;  %v2819_v46 = vld [vmem:[%s3781_s0 + $0x98] sm:$0xff]   ;;  %v2820_v47 = vld [vmem:[%s3781_s0 + $0x228] sm:$0xff]  }
  0x11   :  { %v2821_v48 = vld [vmem:[%s3781_s0 + $0xa0] sm:$0xff]   ;;  %v2822_v49 = vld [vmem:[%s3781_s0 + $0x230] sm:$0xff]   ;;  %v2823_v50 = vld [vmem:[%s3781_s0 + $0xa8] sm:$0xff]  }
  0x12   :  { %v2824_v51 = vld [vmem:[%s3781_s0 + $0x238] sm:$0xff]   ;;  %v2825_v52 = vld [vmem:[%s3781_s0 + $0xb0] sm:$0xff]   ;;  %v2826_v53 = vld [vmem:[%s3781_s0 + $0x240] sm:$0xff]  }
  0x13   :  { %2550 = vmatpush3.bf16.msra.mxu0 %v2777_v6  ;;  %2769 = vmatpush3.bf16.msra.mxu1 %v2777_v6  ;;  %v2827_v54 = vld [vmem:[%s3781_s0 + $0xb8] sm:$0xff]   ;;  %v2828_v55 = vld [vmem:[%s3781_s0 + $0x248] sm:$0xff]   ;;  %v2829_v56 = vld [vmem:[%s3781_s0 + $0xc0] sm:$0xff]  }
  0x14   :  { %2551 = vmatprep.subr.bf16.mxu0 %v2778_v7  ;;  %2762 = vmatprep.subr.bf16.mxu1 %v2778_v7  ;;  %v2830_v57 = vld [vmem:[%s3781_s0 + $0x250] sm:$0xff]   ;;  %v2831_v58 = vld [vmem:[%s3781_s0 + $0xc8] sm:$0xff]   ;;  %v2832_v59 = vld [vmem:[%s3781_s0 + $0x258] sm:$0xff]  }
  0x15   :  { %v2833_v60 = vld [vmem:[%s3781_s0 + $0xd0] sm:$0xff]   ;;  %v2834_v61 = vld [vmem:[%s3781_s0 + $0x260] sm:$0xff]   ;;  %v2835_v62 = vld [vmem:[%s3781_s0 + $0xd8] sm:$0xff]  }
  0x16   :  { %v2836_v63 = vld [vmem:[%s3781_s0 + $0x268] sm:$0xff]   ;;  %v2837_v0 = vld [vmem:[%s3781_s0 + $0xe0] sm:$0xff]   ;;  %v2838_v1 = vld [vmem:[%s3781_s0 + $0x270] sm:$0xff]  }
  0x17   :  { %2552 = vmatpush3.bf16.msra.mxu0 %v2778_v7  ;;  %2770 = vmatpush3.bf16.msra.mxu1 %v2778_v7  ;;  %v2839_v2 = vld [vmem:[%s3781_s0 + $0xe8] sm:$0xff]   ;;  %v2840_v3 = vld [vmem:[%s3781_s0 + $0x278] sm:$0xff]   ;;  %v2841_v4 = vld [vmem:[%s3781_s0 + $0xf0] sm:$0xff]  }
  0x18   :  { %2553 = vmatprep.subr.bf16.mxu0 %v2779_v8  ;;  %2763 = vmatprep.subr.bf16.mxu1 %v2779_v8  ;;  %v2842_v5 = vld [vmem:[%s3781_s0 + $0x280] sm:$0xff]   ;;  %v2843_v6 = vld [vmem:[%s3781_s0 + $0xf8] sm:$0xff]   ;;  %v2844_v7 = vld [vmem:[%s3781_s0 + $0x288] sm:$0xff]  }
  0x1b   :  { %2554 = vmatpush3.bf16.msra.mxu0 %v2779_v8  ;;  %2771 = vmatpush3.bf16.msra.mxu1 %v2779_v8  ;;  %v2845_v8 = vld [vmem:[%s3781_s0 + $0x100] sm:$0xff]  }
  0x1c   :  { %2555 = vmatprep.subr.bf16.mxu0 %v2780_v9  ;;  %2764 = vmatprep.subr.bf16.mxu1 %v2780_v9 }
  0x1f   :  { %2556 = vmatpush3.bf16.msra.mxu0 %v2780_v9  ;;  %2772 = vmatpush3.bf16.msra.mxu1 %v2780_v9  ;;  %v2846_v9 = vld [vmem:[%s3781_s0 + $0x290] sm:$0xff]  }
  0x22   :  { %2558 = vmatmul.mubr.bf16.vlgmr.msra.gmra.mrb[0].mxu0 %v2783_v10  ;;  %2658 = vmatmul.mubr.bf16.vlgmr.msra.gmra.mrb[0].mxu1 %v2784_v11  ;;  %v2847_v10 = vld [vmem:[%s3781_s0 + $0x108] sm:$0xff]   ;;  %v2848_v11 = vld [vmem:[%s3781_s0 + $0x298] sm:$0xff]  }
  0x23   :  { %2561 = vmatprep.mubr.bf16.mxu0 %v2785_v12  ;;  %2661 = vmatprep.mubr.bf16.mxu1 %v2786_v13  ;;  %v2849_v12 = vld [vmem:[%s3781_s0 + $0x110] sm:$0xff]   ;;  %v2850_v13 = vld [vmem:[%s3781_s0 + $0x2a0] sm:$0xff]  }
  0x2a   :  { %2562 = vmatmul.mubr.bf16.gmra.mrb[4].mxu0 %v2787_v14  ;;  %2662 = vmatmul.mubr.bf16.gmra.mrb[4].mxu1 %v2788_v15  ;;  %v2851_v14 = vld [vmem:[%s3781_s0 + $0x118] sm:$0xff]   ;;  %v2852_v15 = vld [vmem:[%s3781_s0 + $0x2a8] sm:$0xff]  }
  0x2b   :  { %2565 = vmatprep.mubr.bf16.mxu0 %v2789_v16  ;;  %2665 = vmatprep.mubr.bf16.mxu1 %v2790_v17  ;;  %v2853_v16 = vld [vmem:[%s3781_s0 + $0x120] sm:$0xff]   ;;  %v2854_v17 = vld [vmem:[%s3781_s0 + $0x2b0] sm:$0xff]  }
  0x32   :  { %2566 = vmatmul.mubr.bf16.gmra.mrb[8].mxu0 %v2791_v18  ;;  %2666 = vmatmul.mubr.bf16.gmra.mrb[8].mxu1 %v2792_v19  ;;  %v2855_v18 = vld [vmem:[%s3781_s0 + $0x128] sm:$0xff]   ;;  %v2856_v19 = vld [vmem:[%s3781_s0 + $0x2b8] sm:$0xff]  }
  0x33   :  { %2569 = vmatprep.mubr.bf16.mxu0 %v2793_v20  ;;  %2669 = vmatprep.mubr.bf16.mxu1 %v2794_v21  ;;  %v2857_v20 = vld [vmem:[%s3781_s0 + $0x130] sm:$0xff]   ;;  %v2858_v21 = vld [vmem:[%s3781_s0 + $0x2c0] sm:$0xff]  }
  0x3a   :  { %2570 = vmatmul.mubr.bf16.gmra.mrb[12].mxu0 %v2795_v22  ;;  %2670 = vmatmul.mubr.bf16.gmra.mrb[12].mxu1 %v2796_v23  ;;  %v2859_v22 = vld [vmem:[%s3781_s0 + $0x138] sm:$0xff]   ;;  %v2860_v23 = vld [vmem:[%s3781_s0 + $0x2c8] sm:$0xff]  }
  0x3b   :  { %2573 = vmatprep.mubr.bf16.mxu0 %v2797_v24  ;;  %2673 = vmatprep.mubr.bf16.mxu1 %v2798_v25  ;;  %v2861_v24 = vld [vmem:[%s3781_s0 + $0x140] sm:$0xff]   ;;  %v2862_v25 = vld [vmem:[%s3781_s0 + $0x2d0] sm:$0xff]  }
  0x42   :  { %2574 = vmatmul.mubr.bf16.gmra.mrb[16].mxu0 %v2799_v26  ;;  %2674 = vmatmul.mubr.bf16.gmra.mrb[16].mxu1 %v2800_v27  ;;  %v2863_v26 = vld [vmem:[%s3781_s0 + $0x148] sm:$0xff]   ;;  %v2864_v27 = vld [vmem:[%s3781_s0 + $0x2d8] sm:$0xff]  }
  0x43   :  { %2577 = vmatprep.mubr.bf16.mxu0 %v2801_v28  ;;  %2677 = vmatprep.mubr.bf16.mxu1 %v2802_v29  ;;  %v2865_v28 = vld [vmem:[%s3781_s0 + $0x150] sm:$0xff]   ;;  %v2866_v29 = vld [vmem:[%s3781_s0 + $0x2e0] sm:$0xff]  }
  0x4a   :  { %2578 = vmatmul.mubr.bf16.gmra.mrb[20].mxu0 %v2803_v30  ;;  %2678 = vmatmul.mubr.bf16.gmra.mrb[20].mxu1 %v2804_v31  ;;  %v2867_v30 = vld [vmem:[%s3781_s0 + $0x158] sm:$0xff]   ;;  %v2868_v31 = vld [vmem:[%s3781_s0 + $0x2e8] sm:$0xff]  }
  0x4b   :  { %2581 = vmatprep.mubr.bf16.mxu0 %v2805_v32  ;;  %2681 = vmatprep.mubr.bf16.mxu1 %v2806_v33  ;;  %v2869_v32 = vld [vmem:[%s3781_s0 + $0x160] sm:$0xff]   ;;  %v2870_v33 = vld [vmem:[%s3781_s0 + $0x2f0] sm:$0xff]  }
  0x52   :  { %2582 = vmatmul.mubr.bf16.gmra.mrb[24].mxu0 %v2807_v34  ;;  %2682 = vmatmul.mubr.bf16.gmra.mrb[24].mxu1 %v2808_v35  ;;  %v2871_v34 = vld [vmem:[%s3781_s0 + $0x168] sm:$0xff]   ;;  %v2872_v35 = vld [vmem:[%s3781_s0 + $0x2f8] sm:$0xff]  }
  0x53   :  { %2585 = vmatprep.mubr.bf16.mxu0 %v2809_v36  ;;  %2685 = vmatprep.mubr.bf16.mxu1 %v2810_v37  ;;  %v2873_v36 = vld [vmem:[%s3781_s0 + $0x170] sm:$0xff]   ;;  %v2874_v37 = vld [vmem:[%s3781_s0 + $0x300] sm:$0xff]  }
  0x5a   :  { %2586 = vmatmul.mubr.bf16.gmra.mrb[28].mxu0 %v2811_v38  ;;  %2686 = vmatmul.mubr.bf16.gmra.mrb[28].mxu1 %v2812_v39  ;;  %v2875_v38 = vld [vmem:[%s3781_s0 + $0x178] sm:$0xff]   ;;  %v2876_v39 = vld [vmem:[%s3781_s0 + $0x308] sm:$0xff]  }
  0x5b   :  { %2589 = vmatprep.mubr.bf16.mxu0 %v2813_v40  ;;  %2689 = vmatprep.mubr.bf16.mxu1 %v2814_v41  ;;  %v2877_v40 = vld [vmem:[%s3781_s0 + $0x180] sm:$0xff]   ;;  %v2878_v41 = vld [vmem:[%s3781_s0 + $0x310] sm:$0xff]  }
  0x62   :  { %2590 = vmatmul.mubr.bf16.gmra.mrb[32].mxu0 %v2815_v42  ;;  %2690 = vmatmul.mubr.bf16.gmra.mrb[32].mxu1 %v2816_v43  ;;  %v2879_v42 = vld [vmem:[%s3781_s0 + $0x188] sm:$0xff]   ;;  %v2880_v43 = vld [vmem:[%s3781_s0 + $0x318] sm:$0xff]  }
  0x63   :  { %2593 = vmatprep.mubr.bf16.mxu0 %v2817_v44  ;;  %2693 = vmatprep.mubr.bf16.mxu1 %v2818_v45 }
  0x6a   :  { %2594 = vmatmul.mubr.bf16.gmra.mrb[36].mxu0 %v2819_v46  ;;  %2694 = vmatmul.mubr.bf16.gmra.mrb[36].mxu1 %v2820_v47 }
  0x6b   :  { %2597 = vmatprep.mubr.bf16.mxu0 %v2821_v48  ;;  %2697 = vmatprep.mubr.bf16.mxu1 %v2822_v49 }
  0x72   :  { %2598 = vmatmul.mubr.bf16.gmra.mrb[40].mxu0 %v2823_v50  ;;  %2698 = vmatmul.mubr.bf16.gmra.mrb[40].mxu1 %v2824_v51 }
  0x73   :  { %2601 = vmatprep.mubr.bf16.mxu0 %v2825_v52  ;;  %2701 = vmatprep.mubr.bf16.mxu1 %v2826_v53 }
  0x7a   :  { %2602 = vmatmul.mubr.bf16.gmra.mrb[44].mxu0 %v2827_v54  ;;  %2702 = vmatmul.mubr.bf16.gmra.mrb[44].mxu1 %v2828_v55 }
  0x7b   :  { %2605 = vmatprep.mubr.bf16.mxu0 %v2829_v56  ;;  %2705 = vmatprep.mubr.bf16.mxu1 %v2830_v57 }
  0x82   :  { %2606 = vmatmul.mubr.bf16.gmra.mrb[48].mxu0 %v2831_v58  ;;  %2706 = vmatmul.mubr.bf16.gmra.mrb[48].mxu1 %v2832_v59 }
  0x83   :  { %2609 = vmatprep.mubr.bf16.mxu0 %v2833_v60  ;;  %2709 = vmatprep.mubr.bf16.mxu1 %v2834_v61 }
  0x8a   :  { %2610 = vmatmul.mubr.bf16.gmra.mrb[52].mxu0 %v2835_v62  ;;  %2710 = vmatmul.mubr.bf16.gmra.mrb[52].mxu1 %v2836_v63 }
  0x8b   :  { %2613 = vmatprep.mubr.bf16.mxu0 %v2837_v0  ;;  %2713 = vmatprep.mubr.bf16.mxu1 %v2838_v1 }
  0x92   :  { %2614 = vmatmul.mubr.bf16.gmra.mrb[56].mxu0 %v2839_v2  ;;  %2714 = vmatmul.mubr.bf16.gmra.mrb[56].mxu1 %v2840_v3 }
  0x93   :  { %2617 = vmatprep.mubr.bf16.mxu0 %v2841_v4  ;;  %2717 = vmatprep.mubr.bf16.mxu1 %v2842_v5 }
  0x9a   :  { %2618 = vmatmul.mubr.bf16.gmra.mrb[60].mxu0 %v2843_v6  ;;  %2718 = vmatmul.mubr.bf16.gmra.mrb[60].mxu1 %v2844_v7 }
  0x9b   :  { %2621 = vmatprep.mubr.bf16.mxu0 %v2845_v8  ;;  %2721 = vmatprep.mubr.bf16.mxu1 %v2846_v9 }
  0xa2   :  { %2622 = vmatmul.mubr.bf16.gmra.mrb[64].mxu0 %v2847_v10  ;;  %2722 = vmatmul.mubr.bf16.gmra.mrb[64].mxu1 %v2848_v11 }
  0xa3   :  { %2625 = vmatprep.mubr.bf16.mxu0 %v2849_v12  ;;  %2725 = vmatprep.mubr.bf16.mxu1 %v2850_v13 }
  0xaa   :  { %2626 = vmatmul.mubr.bf16.gmra.mrb[68].mxu0 %v2851_v14  ;;  %2726 = vmatmul.mubr.bf16.gmra.mrb[68].mxu1 %v2852_v15 }
  0xab   :  { %2629 = vmatprep.mubr.bf16.mxu0 %v2853_v16  ;;  %2729 = vmatprep.mubr.bf16.mxu1 %v2854_v17 }
  0xb2   :  { %2630 = vmatmul.mubr.bf16.gmra.mrb[72].mxu0 %v2855_v18  ;;  %2730 = vmatmul.mubr.bf16.gmra.mrb[72].mxu1 %v2856_v19 }
  0xb3   :  { %2633 = vmatprep.mubr.bf16.mxu0 %v2857_v20  ;;  %2733 = vmatprep.mubr.bf16.mxu1 %v2858_v21 }
  0xba   :  { %2634 = vmatmul.mubr.bf16.gmra.mrb[76].mxu0 %v2859_v22  ;;  %2734 = vmatmul.mubr.bf16.gmra.mrb[76].mxu1 %v2860_v23 }
  0xbb   :  { %2637 = vmatprep.mubr.bf16.mxu0 %v2861_v24  ;;  %2737 = vmatprep.mubr.bf16.mxu1 %v2862_v25 }
  0xc2   :  { %2638 = vmatmul.mubr.bf16.gmra.mrb[80].mxu0 %v2863_v26  ;;  %2738 = vmatmul.mubr.bf16.gmra.mrb[80].mxu1 %v2864_v27 }
  0xc3   :  { %2641 = vmatprep.mubr.bf16.mxu0 %v2865_v28  ;;  %2741 = vmatprep.mubr.bf16.mxu1 %v2866_v29 }
  0xca   :  { %2642 = vmatmul.mubr.bf16.gmra.mrb[84].mxu0 %v2867_v30  ;;  %2742 = vmatmul.mubr.bf16.gmra.mrb[84].mxu1 %v2868_v31 }
  0xcb   :  { %2645 = vmatprep.mubr.bf16.mxu0 %v2869_v32  ;;  %2745 = vmatprep.mubr.bf16.mxu1 %v2870_v33 }
  0xd2   :  { %2646 = vmatmul.mubr.bf16.gmra.mrb[88].mxu0 %v2871_v34  ;;  %2746 = vmatmul.mubr.bf16.gmra.mrb[88].mxu1 %v2872_v35 }
  0xd3   :  { %2649 = vmatprep.mubr.bf16.mxu0 %v2873_v36  ;;  %2749 = vmatprep.mubr.bf16.mxu1 %v2874_v37 }
  0xda   :  { %2650 = vmatmul.mubr.bf16.gmra.mrb[92].mxu0 %v2875_v38  ;;  %2750 = vmatmul.mubr.bf16.gmra.mrb[92].mxu1 %v2876_v39 }
  0xdb   :  { %2653 = vmatprep.mubr.bf16.mxu0 %v2877_v40  ;;  %2753 = vmatprep.mubr.bf16.mxu1 %v2878_v41 }
  0xe2   :  { %2654 = vmatmul.mubr.bf16.gmra.mrb[96].mxu0 %v2879_v42  ;;  %2754 = vmatmul.mubr.bf16.gmra.mrb[96].mxu1 %v2880_v43 }
  0xf5   :  { %v3225_v44 = vpop.f32.mrb[0].mxu0  ;;  %v3227_v45 = vpop.f32.mrb[0].mxu1 }
  0xf6   :  { %v3229_v46 = vpop.f32.mrb[1].mxu0  ;;  %v3231_v47 = vpop.f32.mrb[1].mxu1 }
  0xf7   :  { %v3233_v48 = vpop.f32.mrb[2].mxu0  ;;  %v3235_v49 = vpop.f32.mrb[2].mxu1 }
  0xf8   :  { %v3237_v50 = vpop.f32.mrb[3].mxu0  ;;  %v3239_v51 = vpop.f32.mrb[3].mxu1 }
  0xfd   :  { %v3241_v52 = vpop.f32.mrb[4].mxu0  ;;  %v3243_v53 = vpop.f32.mrb[4].mxu1 }
  0xfe   :  { %v3245_v54 = vpop.f32.mrb[5].mxu0  ;;  %v3247_v55 = vpop.f32.mrb[5].mxu1 }
  0xff   :  { %v3249_v56 = vpop.f32.mrb[6].mxu0  ;;  %v3251_v57 = vpop.f32.mrb[6].mxu1 }
 0x100   :  { %v3253_v58 = vpop.f32.mrb[7].mxu0  ;;  %v3255_v59 = vpop.f32.mrb[7].mxu1 }
 0x105   :  { %v3257_v60 = vpop.f32.mrb[8].mxu0  ;;  %v3259_v61 = vpop.f32.mrb[8].mxu1 }
 0x106   :  { %v3261_v62 = vpop.f32.mrb[9].mxu0  ;;  %v3263_v63 = vpop.f32.mrb[9].mxu1 }
 0x107   :  { %v3265_v0 = vpop.f32.mrb[10].mxu0  ;;  %v3267_v1 = vpop.f32.mrb[10].mxu1 }
 0x108   :  { %v3269_v2 = vpop.f32.mrb[11].mxu0  ;;  %v3271_v3 = vpop.f32.mrb[11].mxu1 }
 0x10d   :  { %v3273_v4 = vpop.f32.mrb[12].mxu0  ;;  %v3275_v5 = vpop.f32.mrb[12].mxu1 }
 0x10e   :  { %v3277_v6 = vpop.f32.mrb[13].mxu0  ;;  %v3279_v7 = vpop.f32.mrb[13].mxu1 }
 0x10f   :  { %v3281_v8 = vpop.f32.mrb[14].mxu0  ;;  %v3283_v9 = vpop.f32.mrb[14].mxu1 }
 0x110   :  { %v3285_v10 = vpop.f32.mrb[15].mxu0  ;;  %v3287_v11 = vpop.f32.mrb[15].mxu1 }
 0x115   :  { %v3289_v12 = vpop.f32.mrb[16].mxu0  ;;  %v3291_v13 = vpop.f32.mrb[16].mxu1 }
 0x116   :  { %v3293_v14 = vpop.f32.mrb[17].mxu0  ;;  %v3295_v15 = vpop.f32.mrb[17].mxu1 }
 0x117   :  { %v3297_v16 = vpop.f32.mrb[18].mxu0  ;;  %v3299_v17 = vpop.f32.mrb[18].mxu1 }
 0x118   :  { %v3301_v18 = vpop.f32.mrb[19].mxu0  ;;  %v3303_v19 = vpop.f32.mrb[19].mxu1 }
 0x11d   :  { %v3305_v20 = vpop.f32.mrb[20].mxu0  ;;  %v3307_v21 = vpop.f32.mrb[20].mxu1 }
 0x11e   :  { %v3309_v22 = vpop.f32.mrb[21].mxu0  ;;  %v3311_v23 = vpop.f32.mrb[21].mxu1 }
 0x11f   :  { %v3313_v24 = vpop.f32.mrb[22].mxu0  ;;  %v3315_v25 = vpop.f32.mrb[22].mxu1 }
 0x120   :  { %3784 = vst [vmem:[#allocation2_spill] sm:$0xff] %v3313_v24  ;;  %3785 = vst [vmem:[#allocation3_spill] sm:$0xff] %v3315_v25  ;;  %v3317_v26 = vpop.f32.mrb[23].mxu0  ;;  %v3319_v27 = vpop.f32.mrb[23].mxu1 }
 0x125   :  { %v3321_v28 = vpop.f32.mrb[24].mxu0  ;;  %v3323_v29 = vpop.f32.mrb[24].mxu1 }
 0x126   :  { %3786 = vst [vmem:[#allocation4_spill] sm:$0xff] %v3321_v28  ;;  %3787 = vst [vmem:[#allocation5_spill] sm:$0xff] %v3323_v29  ;;  %v3325_v30 = vpop.f32.mrb[25].mxu0  ;;  %v3327_v31 = vpop.f32.mrb[25].mxu1 }
 0x127   :  { %v3329_v32 = vpop.f32.mrb[26].mxu0  ;;  %v3331_v33 = vpop.f32.mrb[26].mxu1 }
 0x128   :  { %3788 = vst [vmem:[#allocation6_spill] sm:$0xff] %v3329_v32  ;;  %3789 = vst [vmem:[#allocation7_spill] sm:$0xff] %v3331_v33  ;;  %v3333_v34 = vpop.f32.mrb[27].mxu0  ;;  %v3335_v35 = vpop.f32.mrb[27].mxu1 }
 0x129   :  { %3790 = vst [vmem:[#allocation8_spill] sm:$0xff] %v3333_v34  ;;  %3791 = vst [vmem:[#allocation9_spill] sm:$0xff] %v3335_v35 }
 0x12d   :  { %v3337_v36 = vpop.f32.mrb[28].mxu0  ;;  %v3339_v37 = vpop.f32.mrb[28].mxu1 }
 0x12e   :  { %3792 = vst [vmem:[#allocation10_spill] sm:$0xff] %v3337_v36  ;;  %3793 = vst [vmem:[#allocation11_spill] sm:$0xff] %v3339_v37  ;;  %v3341_v38 = vpop.f32.mrb[29].mxu0  ;;  %v3343_v39 = vpop.f32.mrb[29].mxu1 }
 0x12f   :  { %3794 = vst [vmem:[#allocation12_spill] sm:$0xff] %v3341_v38  ;;  %3795 = vst [vmem:[#allocation13_spill] sm:$0xff] %v3343_v39  ;;  %v3345_v40 = vpop.f32.mrb[30].mxu0  ;;  %v3347_v41 = vpop.f32.mrb[30].mxu1 }
 0x130   :  { %3796 = vst [vmem:[#allocation14_spill] sm:$0xff] %v3345_v40  ;;  %3797 = vst [vmem:[#allocation15_spill] sm:$0xff] %v3347_v41  ;;  %v3349_v42 = vpop.f32.mrb[31].mxu0  ;;  %v3351_v43 = vpop.f32.mrb[31].mxu1 }
 0x131   :  { %3798 = vst [vmem:[#allocation16_spill] sm:$0xff] %v3349_v42  ;;  %3799 = vst [vmem:[#allocation17_spill] sm:$0xff] %v3351_v43 }
 0x135   :  { %v3353_v33 = vpop.f32.mrb[32].mxu0  ;;  %v3355_v32 = vpop.f32.mrb[32].mxu1 }
 0x136   :  { %3800 = vst [vmem:[#allocation18_spill] sm:$0xff] %v3353_v33  ;;  %3801 = vst [vmem:[#allocation19_spill] sm:$0xff] %v3355_v32  ;;  %v3357_v29 = vpop.f32.mrb[33].mxu0  ;;  %v3359_v36 = vpop.f32.mrb[33].mxu1 }
 0x137   :  { %3802 = vst [vmem:[#allocation20_spill] sm:$0xff] %v3357_v29  ;;  %3803 = vst [vmem:[#allocation21_spill] sm:$0xff] %v3359_v36  ;;  %v3361_v37 = vpop.f32.mrb[34].mxu0  ;;  %v3363_v28 = vpop.f32.mrb[34].mxu1 }
 0x138   :  { %3804 = vst [vmem:[#allocation22_spill] sm:$0xff] %v3361_v37  ;;  %3805 = vst [vmem:[#allocation23_spill] sm:$0xff] %v3363_v28  ;;  %v3365_v39 = vpop.f32.mrb[35].mxu0  ;;  %v3367_v40 = vpop.f32.mrb[35].mxu1 }
 0x139   :  { %3806 = vst [vmem:[#allocation24_spill] sm:$0xff] %v3365_v39  ;;  %3807 = vst [vmem:[#allocation25_spill] sm:$0xff] %v3367_v40 }
 0x13d   :  { %v3369_v41 = vpop.f32.mrb[36].mxu0  ;;  %v3371_v42 = vpop.f32.mrb[36].mxu1 }
 0x13e   :  { %3808 = vst [vmem:[#allocation26_spill] sm:$0xff] %v3369_v41  ;;  %3809 = vst [vmem:[#allocation27_spill] sm:$0xff] %v3371_v42  ;;  %v3373_v43 = vpop.f32.mrb[37].mxu0  ;;  %v3375_v33 = vpop.f32.mrb[37].mxu1 }
 0x13f   :  { %3810 = vst [vmem:[#allocation28_spill] sm:$0xff] %v3373_v43  ;;  %3811 = vst [vmem:[#allocation29_spill] sm:$0xff] %v3375_v33  ;;  %v3377_v32 = vpop.f32.mrb[38].mxu0  ;;  %v3379_v29 = vpop.f32.mrb[38].mxu1 }
 0x140   :  { %3812 = vst [vmem:[#allocation30_spill] sm:$0xff] %v3377_v32  ;;  %3813 = vst [vmem:[#allocation31_spill] sm:$0xff] %v3379_v29  ;;  %v3381_v36 = vpop.f32.mrb[39].mxu0  ;;  %v3383_v37 = vpop.f32.mrb[39].mxu1 }
 0x141   :  { %3814 = vst [vmem:[#allocation32_spill] sm:$0xff] %v3381_v36  ;;  %3815 = vst [vmem:[#allocation33_spill] sm:$0xff] %v3383_v37 }
 0x145   :  { %v3385_v28 = vpop.f32.mrb[40].mxu0  ;;  %v3387_v39 = vpop.f32.mrb[40].mxu1 }
 0x146   :  { %3816 = vst [vmem:[#allocation34_spill] sm:$0xff] %v3385_v28  ;;  %3817 = vst [vmem:[#allocation35_spill] sm:$0xff] %v3387_v39  ;;  %v3389_v40 = vpop.f32.mrb[41].mxu0  ;;  %v3391_v41 = vpop.f32.mrb[41].mxu1 }
 0x147   :  { %3818 = vst [vmem:[#allocation36_spill] sm:$0xff] %v3389_v40  ;;  %3819 = vst [vmem:[#allocation37_spill] sm:$0xff] %v3391_v41  ;;  %v3393_v42 = vpop.f32.mrb[42].mxu0  ;;  %v3395_v43 = vpop.f32.mrb[42].mxu1 }
 0x148   :  { %3820 = vst [vmem:[#allocation38_spill] sm:$0xff] %v3393_v42  ;;  %3821 = vst [vmem:[#allocation39_spill] sm:$0xff] %v3395_v43  ;;  %v3397_v33 = vpop.f32.mrb[43].mxu0  ;;  %v3399_v32 = vpop.f32.mrb[43].mxu1 }
 0x149   :  { %3822 = vst [vmem:[#allocation40_spill] sm:$0xff] %v3397_v33  ;;  %3823 = vst [vmem:[#allocation41_spill] sm:$0xff] %v3399_v32 }
 0x14d   :  { %v3401_v29 = vpop.f32.mrb[44].mxu0  ;;  %v3403_v36 = vpop.f32.mrb[44].mxu1 }
 0x14e   :  { %3824 = vst [vmem:[#allocation42_spill] sm:$0xff] %v3401_v29  ;;  %3825 = vst [vmem:[#allocation43_spill] sm:$0xff] %v3403_v36  ;;  %v3405_v37 = vpop.f32.mrb[45].mxu0  ;;  %v3407_v28 = vpop.f32.mrb[45].mxu1 }
 0x14f   :  { %3826 = vst [vmem:[#allocation44_spill] sm:$0xff] %v3405_v37  ;;  %3827 = vst [vmem:[#allocation45_spill] sm:$0xff] %v3407_v28  ;;  %v3409_v39 = vpop.f32.mrb[46].mxu0  ;;  %v3411_v40 = vpop.f32.mrb[46].mxu1 }
 0x150   :  { %3828 = vst [vmem:[#allocation46_spill] sm:$0xff] %v3409_v39  ;;  %3829 = vst [vmem:[#allocation47_spill] sm:$0xff] %v3411_v40  ;;  %v3413_v41 = vpop.f32.mrb[47].mxu0  ;;  %v3415_v42 = vpop.f32.mrb[47].mxu1  ;;  %v3426_v39 = vld [vmem:[%s3782_s2] ss:$0 sm:$0xff] }
 0x151   :  { %3830 = vst [vmem:[#allocation48_spill] sm:$0xff] %v3413_v41  ;;  %3831 = vst [vmem:[#allocation49_spill] sm:$0xff] %v3415_v42 }
 0x155   :  { %v2607_v43 = vpop.f32.mrb[48].mxu0  ;;  %v2707_v33 = vpop.f32.mrb[48].mxu1 }
 0x156   :  { %v1712_v32 = vmax.f32 %v3229_v46, %v2607_v43  ;;  %v1762_v29 = vmax.f32 %v3231_v47, %v2707_v33  ;;  %v3419_v38 = vpop.f32.mrb[49].mxu0  ;;  %v3421_v36 = vpop.f32.mrb[49].mxu1 }
 0x157   :  { %3832 = vst [vmem:[#allocation50_spill] sm:$0xff] %v3419_v38  ;;  %3833 = vst [vmem:[#allocation51_spill] sm:$0xff] %v3421_v36  ;;  %v2608_v40 = vpop.f32.mrb[50].mxu0  ;;  %v2708_v28 = vpop.f32.mrb[50].mxu1 }
 0x158   :  { %v1812_v41 = vmax.f32 %v1712_v32, %v1762_v29  ;;  %v1713_v42 = vmax.f32 %v3237_v50, %v2608_v40  ;;  %v1763_v37 = vmax.f32 %v3239_v51, %v2708_v28  ;;  %v3430_v25 = vpop.f32.mrb[51].mxu0  ;;  %v3432_v46 = vpop.f32.mrb[51].mxu1 }
 0x15a   :  { %v1869_v47 = vadd.f32 %v3426_v39, %v1812_v41  ;;  %v1813_v33 = vmax.f32 %v1713_v42, %v1763_v37 }
 0x15c   :  { %v1919_v43 = vmax.f32 %v1869_v47, 0.0  ;;  %v1870_v36 = vadd.f32 %v3426_v39, %v1813_v33 }
 0x15d   :  { %v2611_v38 = vpop.f32.mrb[52].mxu0  ;;  %v2711_v24 = vpop.f32.mrb[52].mxu1 }
 0x15e   :  { %v2383_v35 = vpack.c.bf16 %v1919_v43, %v1919_v43  ;;  %v1920_v34 = vmax.f32 %v1870_v36, 0.0  ;;  %v1716_v29 = vmax.f32 %v3245_v54, %v2611_v38  ;;  %v1766_v50 = vmax.f32 %v3247_v55, %v2711_v24  ;;  %v1121_v51 = vpop.f32.mrb[53].mxu0  ;;  %v1521_v28 = vpop.f32.mrb[53].mxu1 }
 0x15f   :  { %v1714_v32 = vmax.f32 %v3225_v44, %v1121_v51  ;;  %v1764_v40 = vmax.f32 %v3227_v45, %v1521_v28  ;;  %v2612_v41 = vpop.f32.mrb[54].mxu0  ;;  %v2712_v37 = vpop.f32.mrb[54].mxu1 }
 0x160   :  { %2170 = vst.msk [vmem:[%s3783_s3] sm:$0xf] %vm2169_vm0, %v2383_v35  ;;  %v2384_v42 = vpack.c.bf16 %v1920_v34, %v1920_v34  ;;  %v1816_v47 = vmax.f32 %v1716_v29, %v1766_v50  ;;  %v1717_v36 = vmax.f32 %v3253_v58, %v2612_v41  ;;  %v1767_v54 = vmax.f32 %v3255_v59, %v2712_v37  ;;  %v1124_v55 = vpop.f32.mrb[55].mxu0  ;;  %v1524_v24 = vpop.f32.mrb[55].mxu1 }
 0x161   :  { %v1814_v38 = vmax.f32 %v1714_v32, %v1764_v40  ;;  %v1715_v44 = vmax.f32 %v3233_v48, %v1124_v55  ;;  %v1765_v45 = vmax.f32 %v3235_v49, %v1524_v24 }
 0x162   :  { %2171 = vst.msk [vmem:[%s3783_s3 + $0x4] sm:$0xf] %vm2169_vm0, %v2384_v42  ;;  %v1873_v35 = vadd.f32 %v3426_v39, %v1816_v47  ;;  %v1817_v34 = vmax.f32 %v1717_v36, %v1767_v54 }
 0x163   :  { %v1871_v33 = vadd.f32 %v3426_v39, %v1814_v38  ;;  %v1815_v58 = vmax.f32 %v1715_v44, %v1765_v45 }
 0x164   :  { %v1923_v43 = vmax.f32 %v1873_v35, 0.0  ;;  %v1874_v59 = vadd.f32 %v3426_v39, %v1817_v34 }
 0x165   :  { %v1921_v29 = vmax.f32 %v1871_v33, 0.0  ;;  %v1872_v50 = vadd.f32 %v3426_v39, %v1815_v58  ;;  %v2615_v48 = vpop.f32.mrb[56].mxu0  ;;  %v2715_v51 = vpop.f32.mrb[56].mxu1 }
 0x166   :  { %v2387_v49 = vpack.c.bf16 %v1923_v43, %v1923_v43  ;;  %v1924_v28 = vmax.f32 %v1874_v59, 0.0  ;;  %v1720_v32 = vmax.f32 %v3261_v62, %v2615_v48  ;;  %v1770_v40 = vmax.f32 %v3263_v63, %v2715_v51  ;;  %v1137_v41 = vpop.f32.mrb[57].mxu0  ;;  %v1537_v37 = vpop.f32.mrb[57].mxu1 }
 0x167   :  { %v2385_v42 = vpack.c.bf16 %v1921_v29, %v1921_v29  ;;  %v1922_v47 = vmax.f32 %v1872_v50, 0.0  ;;  %v1718_v36 = vmax.f32 %v3241_v52, %v1137_v41  ;;  %v1768_v54 = vmax.f32 %v3243_v53, %v1537_v37  ;;  %v2616_v55 = vpop.f32.mrb[58].mxu0  ;;  %v2716_v24 = vpop.f32.mrb[58].mxu1 }
 0x168   :  { %2174 = vst.msk [vmem:[%s3783_s3 + $0x10] sm:$0xf] %vm2169_vm0, %v2387_v49  ;;  %v2388_v38 = vpack.c.bf16 %v1924_v28, %v1924_v28  ;;  %v1820_v44 = vmax.f32 %v1720_v32, %v1770_v40  ;;  %v1721_v62 = vmax.f32 %v3269_v2, %v2616_v55  ;;  %v1771_v63 = vmax.f32 %v3271_v3, %v2716_v24  ;;  %v1140_v45 = vpop.f32.mrb[59].mxu0  ;;  %v1540_v35 = vpop.f32.mrb[59].mxu1 }
 0x169   :  { %2172 = vst.msk [vmem:[%s3783_s3 + $0x8] sm:$0xf] %vm2169_vm0, %v2385_v42  ;;  %v2386_v52 = vpack.c.bf16 %v1922_v47, %v1922_v47  ;;  %v1818_v53 = vmax.f32 %v1718_v36, %v1768_v54  ;;  %v1719_v34 = vmax.f32 %v3249_v56, %v1140_v45  ;;  %v1769_v33 = vmax.f32 %v3251_v57, %v1540_v35 }
 0x16a   :  { %2175 = vst.msk [vmem:[%s3783_s3 + $0x14] sm:$0xf] %vm2169_vm0, %v2388_v38  ;;  %v1877_v2 = vadd.f32 %v3426_v39, %v1820_v44  ;;  %v1821_v3 = vmax.f32 %v1721_v62, %v1771_v63 }
 0x16b   :  { %2173 = vst.msk [vmem:[%s3783_s3 + $0xc] sm:$0xf] %vm2169_vm0, %v2386_v52  ;;  %v1875_v58 = vadd.f32 %v3426_v39, %v1818_v53  ;;  %v1819_v43 = vmax.f32 %v1719_v34, %v1769_v33 }
 0x16c   :  { %v1927_v59 = vmax.f32 %v1877_v2, 0.0  ;;  %v1878_v56 = vadd.f32 %v3426_v39, %v1821_v3 }
 0x16d   :  { %v1925_v57 = vmax.f32 %v1875_v58, 0.0  ;;  %v1876_v29 = vadd.f32 %v3426_v39, %v1819_v43  ;;  %v2619_v50 = vpop.f32.mrb[60].mxu0  ;;  %v2719_v48 = vpop.f32.mrb[60].mxu1 }
 0x16e   :  { %v2391_v51 = vpack.c.bf16 %v1927_v59, %v1927_v59  ;;  %v1928_v49 = vmax.f32 %v1878_v56, 0.0  ;;  %v1724_v28 = vmax.f32 %v3277_v6, %v2619_v50  ;;  %v1774_v32 = vmax.f32 %v3279_v7, %v2719_v48  ;;  %v1153_v40 = vpop.f32.mrb[61].mxu0  ;;  %v1553_v41 = vpop.f32.mrb[61].mxu1 }
 0x16f   :  { %v2389_v37 = vpack.c.bf16 %v1925_v57, %v1925_v57  ;;  %v1926_v42 = vmax.f32 %v1876_v29, 0.0  ;;  %v1722_v47 = vmax.f32 %v3257_v60, %v1153_v40  ;;  %v1772_v36 = vmax.f32 %v3259_v61, %v1553_v41  ;;  %v2620_v54 = vpop.f32.mrb[62].mxu0  ;;  %v2720_v55 = vpop.f32.mrb[62].mxu1 }
 0x170   :  { %2178 = vst.msk [vmem:[%s3783_s3 + $0x20] sm:$0xf] %vm2169_vm0, %v2391_v51  ;;  %v2392_v24 = vpack.c.bf16 %v1928_v49, %v1928_v49  ;;  %v1824_v38 = vmax.f32 %v1724_v28, %v1774_v32  ;;  %v1725_v6 = vmax.f32 %v3285_v10, %v2620_v54  ;;  %v1775_v7 = vmax.f32 %v3287_v11, %v2720_v55  ;;  %v1156_v44 = vpop.f32.mrb[63].mxu0  ;;  %v1556_v62 = vpop.f32.mrb[63].mxu1 }
 0x171   :  { %2176 = vst.msk [vmem:[%s3783_s3 + $0x18] sm:$0xf] %vm2169_vm0, %v2389_v37  ;;  %v2390_v60 = vpack.c.bf16 %v1926_v42, %v1926_v42  ;;  %v1822_v61 = vmax.f32 %v1722_v47, %v1772_v36  ;;  %v1723_v63 = vmax.f32 %v3265_v0, %v1156_v44  ;;  %v1773_v45 = vmax.f32 %v3267_v1, %v1556_v62 }
 0x172   :  { %2179 = vst.msk [vmem:[%s3783_s3 + $0x24] sm:$0xf] %vm2169_vm0, %v2392_v24  ;;  %v1881_v10 = vadd.f32 %v3426_v39, %v1824_v38  ;;  %v1825_v11 = vmax.f32 %v1725_v6, %v1775_v7 }
 0x173   :  { %2177 = vst.msk [vmem:[%s3783_s3 + $0x1c] sm:$0xf] %vm2169_vm0, %v2390_v60  ;;  %v1879_v35 = vadd.f32 %v3426_v39, %v1822_v61  ;;  %v1823_v52 = vmax.f32 %v1723_v63, %v1773_v45 }
 0x174   :  { %v1931_v53 = vmax.f32 %v1881_v10, 0.0  ;;  %v1882_v0 = vadd.f32 %v3426_v39, %v1825_v11 }
 0x175   :  { %v1929_v1 = vmax.f32 %v1879_v35, 0.0  ;;  %v1880_v34 = vadd.f32 %v3426_v39, %v1823_v52  ;;  %v2623_v33 = vpop.f32.mrb[64].mxu0  ;;  %v2723_v2 = vpop.f32.mrb[64].mxu1 }
 0x176   :  { %v2395_v3 = vpack.c.bf16 %v1931_v53, %v1931_v53  ;;  %v1932_v58 = vmax.f32 %v1882_v0, 0.0  ;;  %v1728_v43 = vmax.f32 %v3293_v14, %v2623_v33  ;;  %v1778_v59 = vmax.f32 %v3295_v15, %v2723_v2  ;;  %v1169_v56 = vpop.f32.mrb[65].mxu0  ;;  %v1569_v57 = vpop.f32.mrb[65].mxu1 }
 0x177   :  { %v2393_v29 = vpack.c.bf16 %v1929_v1, %v1929_v1  ;;  %v1930_v50 = vmax.f32 %v1880_v34, 0.0  ;;  %v1726_v48 = vmax.f32 %v3273_v4, %v1169_v56  ;;  %v1776_v51 = vmax.f32 %v3275_v5, %v1569_v57  ;;  %v2624_v49 = vpop.f32.mrb[66].mxu0  ;;  %v2724_v28 = vpop.f32.mrb[66].mxu1 }
 0x178   :  { %2182 = vst.msk [vmem:[%s3783_s3 + $0x30] sm:$0xf] %vm2169_vm0, %v2395_v3  ;;  %v2396_v32 = vpack.c.bf16 %v1932_v58, %v1932_v58  ;;  %v1828_v40 = vmax.f32 %v1728_v43, %v1778_v59  ;;  %v1729_v14 = vmax.f32 %v3301_v18, %v2624_v49  ;;  %v1779_v15 = vmax.f32 %v3303_v19, %v2724_v28  ;;  %v1172_v41 = vpop.f32.mrb[67].mxu0  ;;  %v1572_v37 = vpop.f32.mrb[67].mxu1 }
 0x179   :  { %2180 = vst.msk [vmem:[%s3783_s3 + $0x28] sm:$0xf] %vm2169_vm0, %v2393_v29  ;;  %v2394_v4 = vpack.c.bf16 %v1930_v50, %v1930_v50  ;;  %v1826_v5 = vmax.f32 %v1726_v48, %v1776_v51  ;;  %v1727_v42 = vmax.f32 %v3281_v8, %v1172_v41  ;;  %v1777_v47 = vmax.f32 %v3283_v9, %v1572_v37 }
 0x17a   :  { %2183 = vst.msk [vmem:[%s3783_s3 + $0x34] sm:$0xf] %vm2169_vm0, %v2396_v32  ;;  %v1885_v18 = vadd.f32 %v3426_v39, %v1828_v40  ;;  %v1829_v19 = vmax.f32 %v1729_v14, %v1779_v15 }
 0x17b   :  { %2181 = vst.msk [vmem:[%s3783_s3 + $0x2c] sm:$0xf] %vm2169_vm0, %v2394_v4  ;;  %v1883_v36 = vadd.f32 %v3426_v39, %v1826_v5  ;;  %v1827_v54 = vmax.f32 %v1727_v42, %v1777_v47 }
 0x17c   :  { %v1935_v55 = vmax.f32 %v1885_v18, 0.0  ;;  %v1886_v8 = vadd.f32 %v3426_v39, %v1829_v19 }
 0x17d   :  { %v1933_v9 = vmax.f32 %v1883_v36, 0.0  ;;  %v1884_v24 = vadd.f32 %v3426_v39, %v1827_v54  ;;  %v2627_v38 = vpop.f32.mrb[68].mxu0  ;;  %v2727_v6 = vpop.f32.mrb[68].mxu1  ;;  %v3836_v54 = vld [vmem:[#allocation2_spill] sm:$0xff] }
 0x17e   :  { %v2399_v7 = vpack.c.bf16 %v1935_v55, %v1935_v55  ;;  %v1936_v44 = vmax.f32 %v1886_v8, 0.0  ;;  %v1732_v62 = vmax.f32 %v3309_v22, %v2627_v38  ;;  %v1782_v60 = vmax.f32 %v3311_v23, %v2727_v6  ;;  %v1185_v61 = vpop.f32.mrb[69].mxu0  ;;  %v1585_v63 = vpop.f32.mrb[69].mxu1  ;;  %v3837_v8 = vld [vmem:[#allocation3_spill] sm:$0xff] }
 0x17f   :  { %v2397_v45 = vpack.c.bf16 %v1933_v9, %v1933_v9  ;;  %v1934_v10 = vmax.f32 %v1884_v24, 0.0  ;;  %v1730_v11 = vmax.f32 %v3289_v12, %v1185_v61  ;;  %v1780_v35 = vmax.f32 %v3291_v13, %v1585_v63  ;;  %v2628_v52 = vpop.f32.mrb[70].mxu0  ;;  %v2728_v53 = vpop.f32.mrb[70].mxu1 }
 0x180   :  { %2186 = vst.msk [vmem:[%s3783_s3 + $0x40] sm:$0xf] %vm2169_vm0, %v2399_v7  ;;  %v2400_v0 = vpack.c.bf16 %v1936_v44, %v1936_v44  ;;  %v1832_v1 = vmax.f32 %v1732_v62, %v1782_v60  ;;  %v1733_v22 = vmax.f32 %v3317_v26, %v2628_v52  ;;  %v1783_v23 = vmax.f32 %v3319_v27, %v2728_v53  ;;  %v1188_v34 = vpop.f32.mrb[71].mxu0  ;;  %v1588_v33 = vpop.f32.mrb[71].mxu1  ;;  %v3839_v53 = vld [vmem:[#allocation13_spill] sm:$0xff] }
 0x181   :  { %2184 = vst.msk [vmem:[%s3783_s3 + $0x38] sm:$0xf] %vm2169_vm0, %v2397_v45  ;;  %v2398_v12 = vpack.c.bf16 %v1934_v10, %v1934_v10  ;;  %v1830_v13 = vmax.f32 %v1730_v11, %v1780_v35  ;;  %v1731_v2 = vmax.f32 %v3297_v16, %v1188_v34  ;;  %v1781_v3 = vmax.f32 %v3299_v17, %v1588_v33  ;;  %v3838_v35 = vld [vmem:[#allocation12_spill] sm:$0xff] }
 0x182   :  { %2187 = vst.msk [vmem:[%s3783_s3 + $0x44] sm:$0xf] %vm2169_vm0, %v2400_v0  ;;  %v1889_v26 = vadd.f32 %v3426_v39, %v1832_v1  ;;  %v1833_v27 = vmax.f32 %v1733_v22, %v1783_v23  ;;  %v3840_v33 = vld [vmem:[#allocation4_spill] sm:$0xff] }
 0x183   :  { %2185 = vst.msk [vmem:[%s3783_s3 + $0x3c] sm:$0xf] %vm2169_vm0, %v2398_v12  ;;  %v1887_v58 = vadd.f32 %v3426_v39, %v1830_v13  ;;  %v1831_v43 = vmax.f32 %v1731_v2, %v1781_v3  ;;  %v3841_v13 = vld [vmem:[#allocation5_spill] sm:$0xff] }
 0x184   :  { %v1939_v59 = vmax.f32 %v1889_v26, 0.0  ;;  %v1890_v16 = vadd.f32 %v3426_v39, %v1833_v27 }
 0x185   :  { %v1937_v17 = vmax.f32 %v1887_v58, 0.0  ;;  %v1888_v56 = vadd.f32 %v3426_v39, %v1831_v43  ;;  %v2631_v57 = vpop.f32.mrb[72].mxu0  ;;  %v2731_v29 = vpop.f32.mrb[72].mxu1  ;;  %v3842_v43 = vld [vmem:[#allocation16_spill] sm:$0xff] }
 0x186   :  { %v2403_v50 = vpack.c.bf16 %v1939_v59, %v1939_v59  ;;  %v1940_v48 = vmax.f32 %v1890_v16, 0.0  ;;  %v1736_v51 = vmax.f32 %v3325_v30, %v2631_v57  ;;  %v1786_v49 = vmax.f32 %v3327_v31, %v2731_v29  ;;  %v1201_v28 = vpop.f32.mrb[73].mxu0  ;;  %v1601_v32 = vpop.f32.mrb[73].mxu1  ;;  %v3834_v30 = vld [vmem:[#allocation8_spill] sm:$0xff]  ;;  %v3835_v31 = vld [vmem:[#allocation9_spill] sm:$0xff] }
 0x187   :  { %v2401_v40 = vpack.c.bf16 %v1937_v17, %v1937_v17  ;;  %v1938_v14 = vmax.f32 %v1888_v56, 0.0  ;;  %v1734_v15 = vmax.f32 %v3305_v20, %v1201_v28  ;;  %v1784_v41 = vmax.f32 %v3307_v21, %v1601_v32  ;;  %v2632_v37 = vpop.f32.mrb[74].mxu0  ;;  %v2732_v4 = vpop.f32.mrb[74].mxu1  ;;  %v3843_v16 = vld [vmem:[#allocation17_spill] sm:$0xff] }
 0x188   :  { %2190 = vst.msk [vmem:[%s3783_s3 + $0x50] sm:$0xf] %vm2169_vm0, %v2403_v50  ;;  %v2404_v5 = vpack.c.bf16 %v1940_v48, %v1940_v48  ;;  %v1836_v42 = vmax.f32 %v1736_v51, %v1786_v49  ;;  %v1737_v47 = vmax.f32 %v3834_v30, %v2632_v37  ;;  %v1787_v18 = vmax.f32 %v3835_v31, %v2732_v4  ;;  %v1204_v19 = vpop.f32.mrb[75].mxu0  ;;  %v1604_v36 = vpop.f32.mrb[75].mxu1  ;;  %v3844_v48 = vld [vmem:[#allocation6_spill] sm:$0xff]  ;;  %v3845_v49 = vld [vmem:[#allocation7_spill] sm:$0xff] }
 0x189   :  { %2188 = vst.msk [vmem:[%s3783_s3 + $0x48] sm:$0xf] %vm2169_vm0, %v2401_v40  ;;  %v2402_v20 = vpack.c.bf16 %v1938_v14, %v1938_v14  ;;  %v1834_v21 = vmax.f32 %v1734_v15, %v1784_v41  ;;  %v1735_v55 = vmax.f32 %v3836_v54, %v1204_v19  ;;  %v1785_v9 = vmax.f32 %v3837_v8, %v1604_v36  ;;  %v3847_v36 = vld [vmem:[#allocation21_spill] sm:$0xff] }
 0x18a   :  { %2191 = vst.msk [vmem:[%s3783_s3 + $0x54] sm:$0xf] %vm2169_vm0, %v2404_v5  ;;  %v1893_v24 = vadd.f32 %v3426_v39, %v1836_v42  ;;  %v1837_v38 = vmax.f32 %v1737_v47, %v1787_v18  ;;  %v3846_v18 = vld [vmem:[#allocation20_spill] sm:$0xff] }
 0x18b   :  { %2189 = vst.msk [vmem:[%s3783_s3 + $0x4c] sm:$0xf] %vm2169_vm0, %v2402_v20  ;;  %v1891_v6 = vadd.f32 %v3426_v39, %v1834_v21  ;;  %v1835_v7 = vmax.f32 %v1735_v55, %v1785_v9  ;;  %v3848_v9 = vld [vmem:[#allocation10_spill] sm:$0xff] }
 0x18c   :  { %v1943_v44 = vmax.f32 %v1893_v24, 0.0  ;;  %v1894_v62 = vadd.f32 %v3426_v39, %v1837_v38  ;;  %v3849_v38 = vld [vmem:[#allocation11_spill] sm:$0xff] }
 0x18d   :  { %v1941_v60 = vmax.f32 %v1891_v6, 0.0  ;;  %v1892_v61 = vadd.f32 %v3426_v39, %v1835_v7  ;;  %v2635_v63 = vpop.f32.mrb[76].mxu0  ;;  %v2735_v45 = vpop.f32.mrb[76].mxu1 }
 0x18e   :  { %v2407_v10 = vpack.c.bf16 %v1943_v44, %v1943_v44  ;;  %v1944_v11 = vmax.f32 %v1894_v62, 0.0  ;;  %v1740_v52 = vmax.f32 %v3838_v35, %v2635_v63  ;;  %v1790_v0 = vmax.f32 %v3839_v53, %v2735_v45  ;;  %v1217_v1 = vpop.f32.mrb[77].mxu0  ;;  %v1617_v22 = vpop.f32.mrb[77].mxu1  ;;  %v3851_v45 = vld [vmem:[#allocation25_spill] sm:$0xff] }
 0x18f   :  { %v2405_v23 = vpack.c.bf16 %v1941_v60, %v1941_v60  ;;  %v1942_v34 = vmax.f32 %v1892_v61, 0.0  ;;  %v1738_v12 = vmax.f32 %v3840_v33, %v1217_v1  ;;  %v1788_v2 = vmax.f32 %v3841_v13, %v1617_v22  ;;  %v2636_v3 = vpop.f32.mrb[78].mxu0  ;;  %v2736_v26 = vpop.f32.mrb[78].mxu1  ;;  %v3850_v61 = vld [vmem:[#allocation24_spill] sm:$0xff]  ;;  %v3853_v22 = vld [vmem:[#allocation15_spill] sm:$0xff] }
 0x190   :  { %2194 = vst.msk [vmem:[%s3783_s3 + $0x60] sm:$0xf] %vm2169_vm0, %v2407_v10  ;;  %v2408_v27 = vpack.c.bf16 %v1944_v11, %v1944_v11  ;;  %v1840_v58 = vmax.f32 %v1740_v52, %v1790_v0  ;;  %v1741_v59 = vmax.f32 %v3842_v43, %v2636_v3  ;;  %v1791_v17 = vmax.f32 %v3843_v16, %v2736_v26  ;;  %v1220_v56 = vpop.f32.mrb[79].mxu0  ;;  %v1620_v57 = vpop.f32.mrb[79].mxu1  ;;  %v3852_v0 = vld [vmem:[#allocation14_spill] sm:$0xff] }
 0x191   :  { %2192 = vst.msk [vmem:[%s3783_s3 + $0x58] sm:$0xf] %vm2169_vm0, %v2405_v23  ;;  %v2406_v29 = vpack.c.bf16 %v1942_v34, %v1942_v34  ;;  %v1838_v50 = vmax.f32 %v1738_v12, %v1788_v2  ;;  %v1739_v51 = vmax.f32 %v3844_v48, %v1220_v56  ;;  %v1789_v28 = vmax.f32 %v3845_v49, %v1620_v57  ;;  %v3855_v57 = vld [vmem:[#allocation29_spill] sm:$0xff] }
 0x192   :  { %2195 = vst.msk [vmem:[%s3783_s3 + $0x64] sm:$0xf] %vm2169_vm0, %v2408_v27  ;;  %v1897_v32 = vadd.f32 %v3426_v39, %v1840_v58  ;;  %v1841_v40 = vmax.f32 %v1741_v59, %v1791_v17  ;;  %v3854_v17 = vld [vmem:[#allocation28_spill] sm:$0xff] }
 0x193   :  { %2193 = vst.msk [vmem:[%s3783_s3 + $0x5c] sm:$0xf] %vm2169_vm0, %v2406_v29  ;;  %v1895_v14 = vadd.f32 %v3426_v39, %v1838_v50  ;;  %v1839_v15 = vmax.f32 %v1739_v51, %v1789_v28  ;;  %v3856_v28 = vld [vmem:[#allocation18_spill] sm:$0xff] }
 0x194   :  { %v1947_v41 = vmax.f32 %v1897_v32, 0.0  ;;  %v1898_v37 = vadd.f32 %v3426_v39, %v1841_v40  ;;  %v3857_v40 = vld [vmem:[#allocation19_spill] sm:$0xff] }
 0x195   :  { %v1945_v4 = vmax.f32 %v1895_v14, 0.0  ;;  %v1896_v5 = vadd.f32 %v3426_v39, %v1839_v15  ;;  %v2639_v42 = vpop.f32.mrb[80].mxu0  ;;  %v2739_v30 = vpop.f32.mrb[80].mxu1 }
 0x196   :  { %v2411_v47 = vpack.c.bf16 %v1947_v41, %v1947_v41  ;;  %v1948_v31 = vmax.f32 %v1898_v37, 0.0  ;;  %v1744_v19 = vmax.f32 %v3846_v18, %v2639_v42  ;;  %v1794_v20 = vmax.f32 %v3847_v36, %v2739_v30  ;;  %v1233_v21 = vpop.f32.mrb[81].mxu0  ;;  %v1633_v54 = vpop.f32.mrb[81].mxu1  ;;  %v3859_v30 = vld [vmem:[#allocation33_spill] sm:$0xff] }
 0x197   :  { %v2409_v55 = vpack.c.bf16 %v1945_v4, %v1945_v4  ;;  %v1946_v8 = vmax.f32 %v1896_v5, 0.0  ;;  %v1742_v24 = vmax.f32 %v3848_v9, %v1233_v21  ;;  %v1792_v6 = vmax.f32 %v3849_v38, %v1633_v54  ;;  %v2640_v7 = vpop.f32.mrb[82].mxu0  ;;  %v2740_v44 = vpop.f32.mrb[82].mxu1  ;;  %v3858_v5 = vld [vmem:[#allocation32_spill] sm:$0xff]  ;;  %v3861_v54 = vld [vmem:[#allocation23_spill] sm:$0xff] }
 0x198   :  { %2198 = vst.msk [vmem:[%s3783_s3 + $0x70] sm:$0xf] %vm2169_vm0, %v2411_v47  ;;  %v2412_v62 = vpack.c.bf16 %v1948_v31, %v1948_v31  ;;  %v1844_v60 = vmax.f32 %v1744_v19, %v1794_v20  ;;  %v1745_v63 = vmax.f32 %v3850_v61, %v2640_v7  ;;  %v1795_v10 = vmax.f32 %v3851_v45, %v2740_v44  ;;  %v1236_v11 = vpop.f32.mrb[83].mxu0  ;;  %v1636_v35 = vpop.f32.mrb[83].mxu1  ;;  %v3860_v20 = vld [vmem:[#allocation22_spill] sm:$0xff] }
 0x199   :  { %2196 = vst.msk [vmem:[%s3783_s3 + $0x68] sm:$0xf] %vm2169_vm0, %v2409_v55  ;;  %v2410_v52 = vpack.c.bf16 %v1946_v8, %v1946_v8  ;;  %v1842_v53 = vmax.f32 %v1742_v24, %v1792_v6  ;;  %v1743_v1 = vmax.f32 %v3852_v0, %v1236_v11  ;;  %v1793_v23 = vmax.f32 %v3853_v22, %v1636_v35  ;;  %v3863_v35 = vld [vmem:[#allocation37_spill] sm:$0xff] }
 0x19a   :  { %2199 = vst.msk [vmem:[%s3783_s3 + $0x74] sm:$0xf] %vm2169_vm0, %v2412_v62  ;;  %v1901_v34 = vadd.f32 %v3426_v39, %v1844_v60  ;;  %v1845_v33 = vmax.f32 %v1745_v63, %v1795_v10  ;;  %v3862_v10 = vld [vmem:[#allocation36_spill] sm:$0xff] }
 0x19b   :  { %2197 = vst.msk [vmem:[%s3783_s3 + $0x6c] sm:$0xf] %vm2169_vm0, %v2410_v52  ;;  %v1899_v12 = vadd.f32 %v3426_v39, %v1842_v53  ;;  %v1843_v13 = vmax.f32 %v1743_v1, %v1793_v23  ;;  %v3864_v23 = vld [vmem:[#allocation26_spill] sm:$0xff] }
 0x19c   :  { %v1951_v2 = vmax.f32 %v1901_v34, 0.0  ;;  %v1902_v3 = vadd.f32 %v3426_v39, %v1845_v33  ;;  %v3865_v33 = vld [vmem:[#allocation27_spill] sm:$0xff] }
 0x19d   :  { %v1949_v26 = vmax.f32 %v1899_v12, 0.0  ;;  %v1900_v27 = vadd.f32 %v3426_v39, %v1843_v13  ;;  %v2643_v58 = vpop.f32.mrb[84].mxu0  ;;  %v2743_v43 = vpop.f32.mrb[84].mxu1 }
 0x19e   :  { %v2415_v59 = vpack.c.bf16 %v1951_v2, %v1951_v2  ;;  %v1952_v16 = vmax.f32 %v1902_v3, 0.0  ;;  %v1748_v56 = vmax.f32 %v3854_v17, %v2643_v58  ;;  %v1798_v29 = vmax.f32 %v3855_v57, %v2743_v43  ;;  %v1249_v50 = vpop.f32.mrb[85].mxu0  ;;  %v1649_v48 = vpop.f32.mrb[85].mxu1  ;;  %v3867_v43 = vld [vmem:[#allocation41_spill] sm:$0xff] }
 0x19f   :  { %v2413_v51 = vpack.c.bf16 %v1949_v26, %v1949_v26  ;;  %v1950_v49 = vmax.f32 %v1900_v27, 0.0  ;;  %v1746_v32 = vmax.f32 %v3856_v28, %v1249_v50  ;;  %v1796_v14 = vmax.f32 %v3857_v40, %v1649_v48  ;;  %v2644_v15 = vpop.f32.mrb[86].mxu0  ;;  %v2744_v41 = vpop.f32.mrb[86].mxu1  ;;  %v3866_v27 = vld [vmem:[#allocation40_spill] sm:$0xff]  ;;  %v3869_v48 = vld [vmem:[#allocation31_spill] sm:$0xff] }
 0x1a0   :  { %2202 = vst.msk [vmem:[%s3783_s3 + $0x80] sm:$0xf] %vm2169_vm0, %v2415_v59  ;;  %v2416_v37 = vpack.c.bf16 %v1952_v16, %v1952_v16  ;;  %v1848_v4 = vmax.f32 %v1748_v56, %v1798_v29  ;;  %v1749_v42 = vmax.f32 %v3858_v5, %v2644_v15  ;;  %v1799_v47 = vmax.f32 %v3859_v30, %v2744_v41  ;;  %v1252_v31 = vpop.f32.mrb[87].mxu0  ;;  %v1652_v18 = vpop.f32.mrb[87].mxu1  ;;  %v3868_v29 = vld [vmem:[#allocation30_spill] sm:$0xff] }
 0x1a1   :  { %2200 = vst.msk [vmem:[%s3783_s3 + $0x78] sm:$0xf] %vm2169_vm0, %v2413_v51  ;;  %v2414_v19 = vpack.c.bf16 %v1950_v49, %v1950_v49  ;;  %v1846_v36 = vmax.f32 %v1746_v32, %v1796_v14  ;;  %v1747_v21 = vmax.f32 %v3860_v20, %v1252_v31  ;;  %v1797_v55 = vmax.f32 %v3861_v54, %v1652_v18  ;;  %v3871_v18 = vld [vmem:[#allocation45_spill] sm:$0xff] }
 0x1a2   :  { %2203 = vst.msk [vmem:[%s3783_s3 + $0x84] sm:$0xf] %vm2169_vm0, %v2416_v37  ;;  %v1905_v8 = vadd.f32 %v3426_v39, %v1848_v4  ;;  %v1849_v9 = vmax.f32 %v1749_v42, %v1799_v47  ;;  %v3870_v47 = vld [vmem:[#allocation44_spill] sm:$0xff] }
 0x1a3   :  { %2201 = vst.msk [vmem:[%s3783_s3 + $0x7c] sm:$0xf] %vm2169_vm0, %v2414_v19  ;;  %v1903_v24 = vadd.f32 %v3426_v39, %v1846_v36  ;;  %v1847_v38 = vmax.f32 %v1747_v21, %v1797_v55  ;;  %v3872_v55 = vld [vmem:[#allocation34_spill] sm:$0xff] }
 0x1a4   :  { %v1955_v6 = vmax.f32 %v1905_v8, 0.0  ;;  %v1906_v7 = vadd.f32 %v3426_v39, %v1849_v9  ;;  %v3873_v9 = vld [vmem:[#allocation35_spill] sm:$0xff] }
 0x1a5   :  { %v1953_v44 = vmax.f32 %v1903_v24, 0.0  ;;  %v1904_v62 = vadd.f32 %v3426_v39, %v1847_v38  ;;  %v2647_v60 = vpop.f32.mrb[88].mxu0  ;;  %v2747_v61 = vpop.f32.mrb[88].mxu1 }
 0x1a6   :  { %v2419_v63 = vpack.c.bf16 %v1955_v6, %v1955_v6  ;;  %v1956_v45 = vmax.f32 %v1906_v7, 0.0  ;;  %v1752_v11 = vmax.f32 %v3862_v10, %v2647_v60  ;;  %v1802_v52 = vmax.f32 %v3863_v35, %v2747_v61  ;;  %v1265_v53 = vpop.f32.mrb[89].mxu0  ;;  %v1665_v0 = vpop.f32.mrb[89].mxu1  ;;  %v3875_v61 = vld [vmem:[#allocation49_spill] sm:$0xff] }
 0x1a7   :  { %v2417_v1 = vpack.c.bf16 %v1953_v44, %v1953_v44  ;;  %v1954_v22 = vmax.f32 %v1904_v62, 0.0  ;;  %v1750_v34 = vmax.f32 %v3864_v23, %v1265_v53  ;;  %v1800_v12 = vmax.f32 %v3865_v33, %v1665_v0  ;;  %v2648_v13 = vpop.f32.mrb[90].mxu0  ;;  %v2748_v2 = vpop.f32.mrb[90].mxu1  ;;  %v3874_v62 = vld [vmem:[#allocation48_spill] sm:$0xff]  ;;  %v3877_v0 = vld [vmem:[#allocation39_spill] sm:$0xff] }
 0x1a8   :  { %2206 = vst.msk [vmem:[%s3783_s3 + $0x90] sm:$0xf] %vm2169_vm0, %v2419_v63  ;;  %v2420_v3 = vpack.c.bf16 %v1956_v45, %v1956_v45  ;;  %v1852_v26 = vmax.f32 %v1752_v11, %v1802_v52  ;;  %v1753_v58 = vmax.f32 %v3866_v27, %v2648_v13  ;;  %v1803_v59 = vmax.f32 %v3867_v43, %v2748_v2  ;;  %v1268_v16 = vpop.f32.mrb[91].mxu0  ;;  %v1668_v17 = vpop.f32.mrb[91].mxu1  ;;  %v3876_v52 = vld [vmem:[#allocation38_spill] sm:$0xff] }
 0x1a9   :  { %2204 = vst.msk [vmem:[%s3783_s3 + $0x88] sm:$0xf] %vm2169_vm0, %v2417_v1  ;;  %v2418_v56 = vpack.c.bf16 %v1954_v22, %v1954_v22  ;;  %v1850_v57 = vmax.f32 %v1750_v34, %v1800_v12  ;;  %v1751_v50 = vmax.f32 %v3868_v29, %v1268_v16  ;;  %v1801_v51 = vmax.f32 %v3869_v48, %v1668_v17  ;;  %v3879_v17 = vld [vmem:[#allocation51_spill] sm:$0xff] }
 0x1aa   :  { %2207 = vst.msk [vmem:[%s3783_s3 + $0x94] sm:$0xf] %vm2169_vm0, %v2420_v3  ;;  %v1909_v49 = vadd.f32 %v3426_v39, %v1852_v26  ;;  %v1853_v28 = vmax.f32 %v1753_v58, %v1803_v59  ;;  %v3878_v59 = vld [vmem:[#allocation50_spill] sm:$0xff] }
 0x1ab   :  { %2205 = vst.msk [vmem:[%s3783_s3 + $0x8c] sm:$0xf] %vm2169_vm0, %v2418_v56  ;;  %v1907_v32 = vadd.f32 %v3426_v39, %v1850_v57  ;;  %v1851_v40 = vmax.f32 %v1751_v50, %v1801_v51  ;;  %v3880_v51 = vld [vmem:[#allocation42_spill] sm:$0xff] }
 0x1ac   :  { %v1959_v14 = vmax.f32 %v1909_v49, 0.0  ;;  %v1910_v15 = vadd.f32 %v3426_v39, %v1853_v28  ;;  %v3881_v28 = vld [vmem:[#allocation43_spill] sm:$0xff] }
 0x1ad   :  { %v1957_v41 = vmax.f32 %v1907_v32, 0.0  ;;  %v1908_v37 = vadd.f32 %v3426_v39, %v1851_v40  ;;  %v2651_v4 = vpop.f32.mrb[92].mxu0  ;;  %v2751_v5 = vpop.f32.mrb[92].mxu1 }
 0x1ae   :  { %v2423_v42 = vpack.c.bf16 %v1959_v14, %v1959_v14  ;;  %v1960_v30 = vmax.f32 %v1910_v15, 0.0  ;;  %v1756_v31 = vmax.f32 %v3870_v47, %v2651_v4  ;;  %v1806_v19 = vmax.f32 %v3871_v18, %v2751_v5  ;;  %v1281_v36 = vpop.f32.mrb[93].mxu0  ;;  %v1681_v20 = vpop.f32.mrb[93].mxu1 }
 0x1af   :  { %v2421_v21 = vpack.c.bf16 %v1957_v41, %v1957_v41  ;;  %v1958_v54 = vmax.f32 %v1908_v37, 0.0  ;;  %v1754_v8 = vmax.f32 %v3872_v55, %v1281_v36  ;;  %v1804_v24 = vmax.f32 %v3873_v9, %v1681_v20  ;;  %v2652_v38 = vpop.f32.mrb[94].mxu0  ;;  %v2752_v6 = vpop.f32.mrb[94].mxu1 }
 0x1b0   :  { %2210 = vst.msk [vmem:[%s3783_s3 + $0xa0] sm:$0xf] %vm2169_vm0, %v2423_v42  ;;  %v2424_v7 = vpack.c.bf16 %v1960_v30, %v1960_v30  ;;  %v1856_v44 = vmax.f32 %v1756_v31, %v1806_v19  ;;  %v1757_v60 = vmax.f32 %v3874_v62, %v2652_v38  ;;  %v1807_v63 = vmax.f32 %v3875_v61, %v2752_v6  ;;  %v1284_v45 = vpop.f32.mrb[95].mxu0  ;;  %v1684_v10 = vpop.f32.mrb[95].mxu1  ;;  %v3882_v31 = vld [vmem:[#allocation46_spill] sm:$0xff]  ;;  %v3883_v19 = vld [vmem:[#allocation47_spill] sm:$0xff] }
 0x1b1   :  { %2208 = vst.msk [vmem:[%s3783_s3 + $0x98] sm:$0xf] %vm2169_vm0, %v2421_v21  ;;  %v2422_v11 = vpack.c.bf16 %v1958_v54, %v1958_v54  ;;  %v1854_v35 = vmax.f32 %v1754_v8, %v1804_v24  ;;  %v1755_v53 = vmax.f32 %v3876_v52, %v1284_v45  ;;  %v1805_v1 = vmax.f32 %v3877_v0, %v1684_v10 }
 0x1b2   :  { %2211 = vst.msk [vmem:[%s3783_s3 + $0xa4] sm:$0xf] %vm2169_vm0, %v2424_v7  ;;  %v1913_v22 = vadd.f32 %v3426_v39, %v1856_v44  ;;  %v1857_v23 = vmax.f32 %v1757_v60, %v1807_v63 }
 0x1b3   :  { %2209 = vst.msk [vmem:[%s3783_s3 + $0x9c] sm:$0xf] %vm2169_vm0, %v2422_v11  ;;  %v1911_v34 = vadd.f32 %v3426_v39, %v1854_v35  ;;  %v1855_v33 = vmax.f32 %v1755_v53, %v1805_v1 }
 0x1b4   :  { %v1963_v12 = vmax.f32 %v1913_v22, 0.0  ;;  %v1914_v13 = vadd.f32 %v3426_v39, %v1857_v23 }
 0x1b5   :  { %v1961_v2 = vmax.f32 %v1911_v34, 0.0  ;;  %v1912_v3 = vadd.f32 %v3426_v39, %v1855_v33  ;;  %v2655_v26 = vpop.f32.mrb[96].mxu0  ;;  %v2755_v27 = vpop.f32.mrb[96].mxu1 }
 0x1b6   :  { %v2427_v58 = vpack.c.bf16 %v1963_v12, %v1963_v12  ;;  %v1964_v43 = vmax.f32 %v1914_v13, 0.0  ;;  %v1760_v16 = vmax.f32 %v3878_v59, %v2655_v26  ;;  %v1810_v56 = vmax.f32 %v3879_v17, %v2755_v27  ;;  %v1297_v57 = vpop.f32.mrb[97].mxu0  ;;  %v1697_v29 = vpop.f32.mrb[97].mxu1 }
 0x1b7   :  { %v2425_v50 = vpack.c.bf16 %v1961_v2, %v1961_v2  ;;  %v1962_v48 = vmax.f32 %v1912_v3, 0.0  ;;  %v1758_v49 = vmax.f32 %v3880_v51, %v1297_v57  ;;  %v1808_v32 = vmax.f32 %v3881_v28, %v1697_v29  ;;  %v2656_v40 = vpop.f32.mrb[98].mxu0  ;;  %v2756_v14 = vpop.f32.mrb[98].mxu1 }
 0x1b8   :  { %2214 = vst.msk [vmem:[%s3783_s3 + $0xb0] sm:$0xf] %vm2169_vm0, %v2427_v58  ;;  %v2428_v15 = vpack.c.bf16 %v1964_v43, %v1964_v43  ;;  %v1860_v41 = vmax.f32 %v1760_v16, %v1810_v56  ;;  %v1761_v37 = vmax.f32 %v3430_v25, %v2656_v40  ;;  %v1811_v4 = vmax.f32 %v3432_v46, %v2756_v14  ;;  %v1300_v5 = vpop.f32.mrb[99].mxu0  ;;  %v1700_v42 = vpop.f32.mrb[99].mxu1 }
 0x1b9   :  { %2212 = vst.msk [vmem:[%s3783_s3 + $0xa8] sm:$0xf] %vm2169_vm0, %v2425_v50  ;;  %v2426_v30 = vpack.c.bf16 %v1962_v48, %v1962_v48  ;;  %v1858_v47 = vmax.f32 %v1758_v49, %v1808_v32  ;;  %v1759_v18 = vmax.f32 %v3882_v31, %v1300_v5  ;;  %v1809_v36 = vmax.f32 %v3883_v19, %v1700_v42 }
 0x1ba   :  { %2215 = vst.msk [vmem:[%s3783_s3 + $0xb4] sm:$0xf] %vm2169_vm0, %v2428_v15  ;;  %v1917_v25 = vadd.f32 %v3426_v39, %v1860_v41  ;;  %v1861_v46 = vmax.f32 %v1761_v37, %v1811_v4 }
 0x1bb   :  { %2213 = vst.msk [vmem:[%s3783_s3 + $0xac] sm:$0xf] %vm2169_vm0, %v2426_v30  ;;  %v1915_v20 = vadd.f32 %v3426_v39, %v1858_v47  ;;  %v1859_v21 = vmax.f32 %v1759_v18, %v1809_v36 }
 0x1bc   :  { %v1967_v54 = vmax.f32 %v1917_v25, 0.0  ;;  %v1918_v55 = vadd.f32 %v3426_v39, %v1861_v46 }
 0x1bd   :  { %v1965_v8 = vmax.f32 %v1915_v20, 0.0  ;;  %v1916_v9 = vadd.f32 %v3426_v39, %v1859_v21 }
 0x1be   :  { %v2431_v24 = vpack.c.bf16 %v1967_v54, %v1967_v54  ;;  %v1968_v38 = vmax.f32 %v1918_v55, 0.0 }
 0x1bf   :  { %v2429_v6 = vpack.c.bf16 %v1965_v8, %v1965_v8  ;;  %v1966_v7 = vmax.f32 %v1916_v9, 0.0 }
 0x1c0   :  { %2218 = vst.msk [vmem:[%s3783_s3 + $0xc0] sm:$0xf] %vm2169_vm0, %v2431_v24  ;;  %v2432_v44 = vpack.c.bf16 %v1968_v38, %v1968_v38 }
 0x1c1   :  { %2216 = vst.msk [vmem:[%s3783_s3 + $0xb8] sm:$0xf] %vm2169_vm0, %v2429_v6  ;;  %v2430_v62 = vpack.c.bf16 %v1966_v7, %v1966_v7 }
 0x1c2   :  { %2219 = vst.msk [vmem:[%s3783_s3 + $0xc4] sm:$0xf] %vm2169_vm0, %v2432_v44 }
 0x1c3   :  { %2217 = vst.msk [vmem:[%s3783_s3 + $0xbc] sm:$0xf] %vm2169_vm0, %v2430_v62 }

// kernel: cnn_forward.3
= control target key start
LH: loop header
LB: loop body
LE: loop exit
PB: predicated region body
PF: predicated region fallthrough
CT: control target
= control target key end

     0   :  { %v5076_v0 = vmov 0   ;;  %vm5078_vm0 = vmmov 0   ;;  %vm2487_vm1 = vcmask 130048   ;;  %s6746_s1 = inlined_call_operand.vmem [shape: bf16[256,16], index: 1, kind: input, shape index: {}]   ;;  %s6747_s0 = inlined_call_operand.vmem [shape: bf16[1600,256], index: 0, kind: input, shape index: {}]   ;;  %s6748_s3 = inlined_call_operand.vmem [shape: bf16[25,16,128], index: 3, kind: input, shape index: {}]   ;;  %s6749_s2 = inlined_call_operand.vmem [shape: f32[1,16], index: 2, kind: input, shape index: {}]   ;;  %s6750_s5 = inlined_call_operand.vmem [shape: bf16[128,128], index: 5, kind: input, shape index: {}]   ;;  %s6751_s7 = inlined_call_operand.vmem [shape: bf16[128,128], index: 7, kind: input, shape index: {}]   ;;  %s6752_s4 = inlined_call_operand.vmem [shape: f32[1,128], index: 4, kind: input, shape index: {}]   ;;  %s6753_s6 = inlined_call_operand.vmem [shape: f32[1,128], index: 6, kind: input, shape index: {}]   ;;  %s6754_s8 = inlined_call_operand.vmem [shape: f32[1,128], index: 8, kind: input, shape index: {}]   ;;  %s6755_s9 = inlined_call_operand.vmem [shape: f32[16,128], index: 9, kind: output, shape index: {}]  }
   0x1   :  { %1361 = vmatprep.subr.bf16.mxu0 %v5076_v0  ;;  %v4719_v1 = vld [vmem:[%s6746_s1] sm:$0xff]   ;;  %4684 = vmatprep.subr.bf16.mxu1 %v5076_v0  ;;  %v4720_v2 = vld [vmem:[%s6746_s1 + $0x8] sm:$0xff]   ;;  %v4721_v3 = vld [vmem:[%s6746_s1 + $0x10] sm:$0xff]  }
   0x2   :  { %1362 = vmatpush1.bf16.msra.mxu0 %v4719_v1  ;;  %4700 = vmatpush1.bf16.msra.mxu1 %v4719_v1  ;;  %v4722_v4 = vld [vmem:[%s6746_s1 + $0x18] sm:$0xff]   ;;  %v4723_v5 = vld [vmem:[%s6746_s1 + $0x20] sm:$0xff]   ;;  %v4724_v7 = vld [vmem:[%s6746_s1 + $0x28] sm:$0xff]  }
   0x3   :  { %1363 = vmatprep.subr.bf16.mxu0 %v5076_v0  ;;  %4685 = vmatprep.subr.bf16.mxu1 %v5076_v0  ;;  %v4737_v6 = vld [vmem:[%s6747_s0 + $0x4] ss:$8 sps:$4 sm:$0xff]   ;;  %v4725_v8 = vld [vmem:[%s6746_s1 + $0x30] sm:$0xff]   ;;  %v4726_v9 = vld [vmem:[%s6746_s1 + $0x38] sm:$0xff]  }
   0x4   :  { %1393 = vmatprep.mubr.bf16.mxu0 %v4737_v6  ;;  %v4727_v10 = vld [vmem:[%s6746_s1 + $0x40] sm:$0xff]   ;;  %v4728_v11 = vld [vmem:[%s6746_s1 + $0x48] sm:$0xff]   ;;  %v4729_v12 = vld [vmem:[%s6746_s1 + $0x50] sm:$0xff]  }
   0x5   :  { %v4730_v13 = vld [vmem:[%s6746_s1 + $0x58] sm:$0xff]   ;;  %v4731_v14 = vld [vmem:[%s6746_s1 + $0x60] sm:$0xff]   ;;  %v4732_v15 = vld [vmem:[%s6746_s1 + $0x68] sm:$0xff]  }
   0x6   :  { %1364 = vmatpush1.bf16.msra.mxu0 %v4720_v2  ;;  %4701 = vmatpush1.bf16.msra.mxu1 %v4720_v2  ;;  %v4733_v16 = vld [vmem:[%s6746_s1 + $0x70] sm:$0xff]   ;;  %v4734_v17 = vld [vmem:[%s6746_s1 + $0x78] sm:$0xff]   ;;  %v4735_v18 = vld [vmem:[%s6747_s0] ss:$8 sps:$4 sm:$0xff]  }
   0x7   :  { %1365 = vmatprep.subr.bf16.mxu0 %v5076_v0  ;;  %4686 = vmatprep.subr.bf16.mxu1 %v5076_v0  ;;  %v4738_v19 = vld [vmem:[%s6747_s0 + $0x14] ss:$8 sps:$4 sm:$0xff]   ;;  %v4786_v20 = vld [vmem:[%s6747_s0 + $0x430] ss:$8 sps:$4 sm:$0xff]   ;;  %v4741_v23 = vld [vmem:[%s6747_s0 + $0x24] ss:$8 sps:$4 sm:$0xff]  }
   0x8   :  { %v4788_v21 = vld [vmem:[%s6747_s0 + $0x434] ss:$8 sps:$4 sm:$0xff]   ;;  %v4740_v22 = vld [vmem:[%s6747_s0 + $0x10] ss:$8 sps:$4 sm:$0xff]   ;;  %v4792_v24 = vld [vmem:[%s6747_s0 + $0x444] ss:$8 sps:$4 sm:$0xff]  }
   0x9   :  { %1929 = vmatprep.mubr.bf16.mxu1 %v4788_v21  ;;  %v4794_v25 = vld [vmem:[%s6747_s0 + $0x440] ss:$8 sps:$4 sm:$0xff]   ;;  %v4744_v27 = vld [vmem:[%s6747_s0 + $0x34] ss:$8 sps:$4 sm:$0xff]   ;;  %v4800_v29 = vld [vmem:[%s6747_s0 + $0x450] ss:$8 sps:$4 sm:$0xff]  }
   0xa   :  { %1366 = vmatpush1.bf16.msra.mxu0 %v4721_v3  ;;  %4702 = vmatpush1.bf16.msra.mxu1 %v4721_v3  ;;  %v4743_v26 = vld [vmem:[%s6747_s0 + $0x20] ss:$8 sps:$4 sm:$0xff]   ;;  %v4798_v28 = vld [vmem:[%s6747_s0 + $0x454] ss:$8 sps:$4 sm:$0xff]   ;;  %v4746_v30 = vld [vmem:[%s6747_s0 + $0x30] ss:$8 sps:$4 sm:$0xff]  }
   0xb   :  { %1367 = vmatprep.subr.bf16.mxu0 %v5076_v0  ;;  %4687 = vmatprep.subr.bf16.mxu1 %v5076_v0  ;;  %v4747_v31 = vld [vmem:[%s6747_s0 + $0x44] ss:$8 sps:$4 sm:$0xff]   ;;  %v4806_v33 = vld [vmem:[%s6747_s0 + $0x460] ss:$8 sps:$4 sm:$0xff]   ;;  %v4750_v35 = vld [vmem:[%s6747_s0 + $0x54] ss:$8 sps:$4 sm:$0xff]  }
   0xc   :  { %v4804_v32 = vld [vmem:[%s6747_s0 + $0x464] ss:$8 sps:$4 sm:$0xff]   ;;  %v4749_v34 = vld [vmem:[%s6747_s0 + $0x40] ss:$8 sps:$4 sm:$0xff]   ;;  %v4810_v36 = vld [vmem:[%s6747_s0 + $0x474] ss:$8 sps:$4 sm:$0xff]  }
   0xd   :  { %v4812_v37 = vld [vmem:[%s6747_s0 + $0x470] ss:$8 sps:$4 sm:$0xff]   ;;  %v4753_v39 = vld [vmem:[%s6747_s0 + $0x64] ss:$8 sps:$4 sm:$0xff]   ;;  %v4818_v41 = vld [vmem:[%s6747_s0 + $0x480] ss:$8 sps:$4 sm:$0xff]  }
   0xe   :  { %1368 = vmatpush1.bf16.msra.mxu0 %v4722_v4  ;;  %4703 = vmatpush1.bf16.msra.mxu1 %v4722_v4  ;;  %v4752_v38 = vld [vmem:[%s6747_s0 + $0x50] ss:$8 sps:$4 sm:$0xff]   ;;  %v4816_v40 = vld [vmem:[%s6747_s0 + $0x484] ss:$8 sps:$4 sm:$0xff]   ;;  %v4755_v42 = vld [vmem:[%s6747_s0 + $0x60] ss:$8 sps:$4 sm:$0xff]  }
   0xf   :  { %1369 = vmatprep.subr.bf16.mxu0 %v5076_v0  ;;  %4688 = vmatprep.subr.bf16.mxu1 %v5076_v0  ;;  %v4756_v43 = vld [vmem:[%s6747_s0 + $0x74] ss:$8 sps:$4 sm:$0xff]   ;;  %v4824_v45 = vld [vmem:[%s6747_s0 + $0x490] ss:$8 sps:$4 sm:$0xff]   ;;  %v4759_v47 = vld [vmem:[%s6747_s0 + $0x84] ss:$8 sps:$4 sm:$0xff]  }
  0x10   :  { %v4822_v44 = vld [vmem:[%s6747_s0 + $0x494] ss:$8 sps:$4 sm:$0xff]   ;;  %v4758_v46 = vld [vmem:[%s6747_s0 + $0x70] ss:$8 sps:$4 sm:$0xff]   ;;  %v4828_v48 = vld [vmem:[%s6747_s0 + $0x4a4] ss:$8 sps:$4 sm:$0xff]  }
  0x11   :  { %v4830_v49 = vld [vmem:[%s6747_s0 + $0x4a0] ss:$8 sps:$4 sm:$0xff]   ;;  %v4762_v51 = vld [vmem:[%s6747_s0 + $0x94] ss:$8 sps:$4 sm:$0xff]   ;;  %v4836_v53 = vld [vmem:[%s6747_s0 + $0x4b0] ss:$8 sps:$4 sm:$0xff]  }
  0x12   :  { %1370 = vmatpush1.bf16.msra.mxu0 %v4723_v5  ;;  %4704 = vmatpush1.bf16.msra.mxu1 %v4723_v5  ;;  %v4761_v50 = vld [vmem:[%s6747_s0 + $0x80] ss:$8 sps:$4 sm:$0xff]   ;;  %v4834_v52 = vld [vmem:[%s6747_s0 + $0x4b4] ss:$8 sps:$4 sm:$0xff]   ;;  %v4764_v54 = vld [vmem:[%s6747_s0 + $0x90] ss:$8 sps:$4 sm:$0xff]  }
  0x13   :  { %1371 = vmatprep.subr.bf16.mxu0 %v5076_v0  ;;  %4689 = vmatprep.subr.bf16.mxu1 %v5076_v0  ;;  %v4765_v55 = vld [vmem:[%s6747_s0 + $0xa4] ss:$8 sps:$4 sm:$0xff]   ;;  %v4842_v57 = vld [vmem:[%s6747_s0 + $0x4c0] ss:$8 sps:$4 sm:$0xff]   ;;  %v4768_v59 = vld [vmem:[%s6747_s0 + $0xb4] ss:$8 sps:$4 sm:$0xff]  }
  0x14   :  { %v4840_v56 = vld [vmem:[%s6747_s0 + $0x4c4] ss:$8 sps:$4 sm:$0xff]   ;;  %v4767_v58 = vld [vmem:[%s6747_s0 + $0xa0] ss:$8 sps:$4 sm:$0xff]   ;;  %v4846_v60 = vld [vmem:[%s6747_s0 + $0x4d4] ss:$8 sps:$4 sm:$0xff]  }
  0x15   :  { %v4770_v61 = vld [vmem:[%s6747_s0 + $0xb0] ss:$8 sps:$4 sm:$0xff]   ;;  %v4771_v63 = vld [vmem:[%s6747_s0 + $0xc4] ss:$8 sps:$4 sm:$0xff]   ;;  %v4773_v1 = vld [vmem:[%s6747_s0 + $0xc0] ss:$8 sps:$4 sm:$0xff]  }
  0x16   :  { %1372 = vmatpush1.bf16.msra.mxu0 %v4724_v7  ;;  %4705 = vmatpush1.bf16.msra.mxu1 %v4724_v7  ;;  %v4848_v62 = vld [vmem:[%s6747_s0 + $0x4d0] ss:$8 sps:$4 sm:$0xff]   ;;  %v4854_v2 = vld [vmem:[%s6747_s0 + $0x4e0] ss:$8 sps:$4 sm:$0xff]   ;;  %v4774_v3 = vld [vmem:[%s6747_s0 + $0xd4] ss:$8 sps:$4 sm:$0xff]  }
  0x17   :  { %1373 = vmatprep.subr.bf16.mxu0 %v5076_v0  ;;  %4690 = vmatprep.subr.bf16.mxu1 %v5076_v0  ;;  %v4858_v4 = vld [vmem:[%s6747_s0 + $0x4f4] ss:$8 sps:$4 sm:$0xff]   ;;  %v4776_v5 = vld [vmem:[%s6747_s0 + $0xd0] ss:$8 sps:$4 sm:$0xff]   ;;  %v4777_v7 = vld [vmem:[%s6747_s0 + $0xe4] ss:$8 sps:$4 sm:$0xff]  }
  0x18   :  { %v4860_v6 = vld [vmem:[%s6747_s0 + $0x4f0] ss:$8 sps:$4 sm:$0xff]  }
  0x19   :  { %v4791_v21 = vld [vmem:[%s6747_s0 + $0x110] ss:$8 sps:$4 sm:$0xff]  }
  0x1a   :  { %1374 = vmatpush1.bf16.msra.mxu0 %v4725_v8  ;;  %4706 = vmatpush1.bf16.msra.mxu1 %v4725_v8  ;;  %v4864_v8 = vld [vmem:[%s6747_s0 + $0x504] ss:$8 sps:$4 sm:$0xff]  }
  0x1b   :  { %1375 = vmatprep.subr.bf16.mxu0 %v5076_v0  ;;  %4691 = vmatprep.subr.bf16.mxu1 %v5076_v0 }
  0x1e   :  { %1376 = vmatpush1.bf16.msra.mxu0 %v4726_v9  ;;  %4707 = vmatpush1.bf16.msra.mxu1 %v4726_v9  ;;  %v4779_v9 = vld [vmem:[%s6747_s0 + $0xe0] ss:$8 sps:$4 sm:$0xff]  }
  0x1f   :  { %1377 = vmatprep.subr.bf16.mxu0 %v5076_v0  ;;  %4692 = vmatprep.subr.bf16.mxu1 %v5076_v0 }
  0x22   :  { %1378 = vmatpush1.bf16.msra.mxu0 %v4727_v10  ;;  %4708 = vmatpush1.bf16.msra.mxu1 %v4727_v10  ;;  %v4866_v10 = vld [vmem:[%s6747_s0 + $0x500] ss:$8 sps:$4 sm:$0xff]  }
  0x23   :  { %1379 = vmatprep.subr.bf16.mxu0 %v5076_v0  ;;  %4693 = vmatprep.subr.bf16.mxu1 %v5076_v0 }
  0x26   :  { %1380 = vmatpush1.bf16.msra.mxu0 %v4728_v11  ;;  %4709 = vmatpush1.bf16.msra.mxu1 %v4728_v11  ;;  %v4780_v11 = vld [vmem:[%s6747_s0 + $0xf4] ss:$8 sps:$4 sm:$0xff]  }
  0x27   :  { %1381 = vmatprep.subr.bf16.mxu0 %v5076_v0  ;;  %4694 = vmatprep.subr.bf16.mxu1 %v5076_v0 }
  0x2a   :  { %1382 = vmatpush1.bf16.msra.mxu0 %v4729_v12  ;;  %4710 = vmatpush1.bf16.msra.mxu1 %v4729_v12  ;;  %v4870_v12 = vld [vmem:[%s6747_s0 + $0x514] ss:$8 sps:$4 sm:$0xff]  }
  0x2b   :  { %1383 = vmatprep.subr.bf16.mxu0 %v5076_v0  ;;  %4695 = vmatprep.subr.bf16.mxu1 %v5076_v0 }
  0x2e   :  { %1384 = vmatpush1.bf16.msra.mxu0 %v4730_v13  ;;  %4711 = vmatpush1.bf16.msra.mxu1 %v4730_v13  ;;  %v4782_v13 = vld [vmem:[%s6747_s0 + $0xf0] ss:$8 sps:$4 sm:$0xff]  }
  0x2f   :  { %1385 = vmatprep.subr.bf16.mxu0 %v5076_v0  ;;  %4696 = vmatprep.subr.bf16.mxu1 %v5076_v0 }
  0x32   :  { %1386 = vmatpush1.bf16.msra.mxu0 %v4731_v14  ;;  %4712 = vmatpush1.bf16.msra.mxu1 %v4731_v14  ;;  %v4872_v14 = vld [vmem:[%s6747_s0 + $0x510] ss:$8 sps:$4 sm:$0xff]  }
  0x33   :  { %1387 = vmatprep.subr.bf16.mxu0 %v5076_v0  ;;  %4697 = vmatprep.subr.bf16.mxu1 %v5076_v0 }
  0x36   :  { %1388 = vmatpush1.bf16.msra.mxu0 %v4732_v15  ;;  %4713 = vmatpush1.bf16.msra.mxu1 %v4732_v15  ;;  %v4783_v15 = vld [vmem:[%s6747_s0 + $0x104] ss:$8 sps:$4 sm:$0xff]  }
  0x37   :  { %1389 = vmatprep.subr.bf16.mxu0 %v5076_v0  ;;  %4698 = vmatprep.subr.bf16.mxu1 %v5076_v0 }
  0x3a   :  { %1390 = vmatpush1.bf16.msra.mxu0 %v4733_v16  ;;  %4714 = vmatpush1.bf16.msra.mxu1 %v4733_v16  ;;  %v4876_v16 = vld [vmem:[%s6747_s0 + $0x524] ss:$8 sps:$4 sm:$0xff]  }
  0x3b   :  { %1391 = vmatprep.subr.bf16.mxu0 %v5076_v0  ;;  %4699 = vmatprep.subr.bf16.mxu1 %v5076_v0  ;;  %v4852_v0 = vld [vmem:[%s6747_s0 + $0x4e4] ss:$8 sps:$4 sm:$0xff]  }
  0x3e   :  { %1392 = vmatpush1.bf16.msra.mxu0 %v4734_v17  ;;  %4715 = vmatpush1.bf16.msra.mxu1 %v4734_v17  ;;  %v4785_v17 = vld [vmem:[%s6747_s0 + $0x100] ss:$8 sps:$4 sm:$0xff]  }
  0x41   :  { %1394 = vmatmul.mubr.bf16.vlgmr.msra.gmra.mrb[0].mxu0 %v4735_v18  ;;  %1930 = vmatmul.mubr.bf16.vlgmr.msra.gmra.mrb[0].mxu1 %v4786_v20  ;;  %v4878_v18 = vld [vmem:[%s6747_s0 + $0x520] ss:$8 sps:$4 sm:$0xff]   ;;  %v4882_v20 = vld [vmem:[%s6747_s0 + $0x534] ss:$8 sps:$4 sm:$0xff]  }
  0x42   :  { %1401 = vmatprep.mubr.bf16.mxu0 %v4738_v19  ;;  %1937 = vmatprep.mubr.bf16.mxu1 %v4792_v24  ;;  %v4789_v19 = vld [vmem:[%s6747_s0 + $0x114] ss:$8 sps:$4 sm:$0xff]   ;;  %v4888_v24 = vld [vmem:[%s6747_s0 + $0x544] ss:$8 sps:$4 sm:$0xff]  }
  0x49   :  { %1402 = vmatmul.mubr.bf16.gmra.mrb[4].mxu0 %v4740_v22  ;;  %1938 = vmatmul.mubr.bf16.gmra.mrb[4].mxu1 %v4794_v25  ;;  %v4884_v22 = vld [vmem:[%s6747_s0 + $0x530] ss:$8 sps:$4 sm:$0xff]   ;;  %v4797_v25 = vld [vmem:[%s6747_s0 + $0x120] ss:$8 sps:$4 sm:$0xff]  }
  0x4a   :  { %1409 = vmatprep.mubr.bf16.mxu0 %v4741_v23  ;;  %1945 = vmatprep.mubr.bf16.mxu1 %v4798_v28  ;;  %v4795_v23 = vld [vmem:[%s6747_s0 + $0x124] ss:$8 sps:$4 sm:$0xff]   ;;  %v4894_v28 = vld [vmem:[%s6747_s0 + $0x554] ss:$8 sps:$4 sm:$0xff]  }
  0x51   :  { %1410 = vmatmul.mubr.bf16.gmra.mrb[8].mxu0 %v4743_v26  ;;  %1946 = vmatmul.mubr.bf16.gmra.mrb[8].mxu1 %v4800_v29  ;;  %v4890_v26 = vld [vmem:[%s6747_s0 + $0x540] ss:$8 sps:$4 sm:$0xff]   ;;  %v4803_v29 = vld [vmem:[%s6747_s0 + $0x130] ss:$8 sps:$4 sm:$0xff]  }
  0x52   :  { %1417 = vmatprep.mubr.bf16.mxu0 %v4744_v27  ;;  %1953 = vmatprep.mubr.bf16.mxu1 %v4804_v32  ;;  %v4801_v27 = vld [vmem:[%s6747_s0 + $0x134] ss:$8 sps:$4 sm:$0xff]   ;;  %v4900_v32 = vld [vmem:[%s6747_s0 + $0x564] ss:$8 sps:$4 sm:$0xff]  }
  0x59   :  { %1418 = vmatmul.mubr.bf16.gmra.mrb[12].mxu0 %v4746_v30  ;;  %1954 = vmatmul.mubr.bf16.gmra.mrb[12].mxu1 %v4806_v33  ;;  %v4896_v30 = vld [vmem:[%s6747_s0 + $0x550] ss:$8 sps:$4 sm:$0xff]   ;;  %v4809_v33 = vld [vmem:[%s6747_s0 + $0x140] ss:$8 sps:$4 sm:$0xff]  }
  0x5a   :  { %1425 = vmatprep.mubr.bf16.mxu0 %v4747_v31  ;;  %1961 = vmatprep.mubr.bf16.mxu1 %v4810_v36  ;;  %v4807_v31 = vld [vmem:[%s6747_s0 + $0x144] ss:$8 sps:$4 sm:$0xff]   ;;  %v4906_v36 = vld [vmem:[%s6747_s0 + $0x574] ss:$8 sps:$4 sm:$0xff]  }
  0x61   :  { %1426 = vmatmul.mubr.bf16.gmra.mrb[16].mxu0 %v4749_v34  ;;  %1962 = vmatmul.mubr.bf16.gmra.mrb[16].mxu1 %v4812_v37  ;;  %v4902_v34 = vld [vmem:[%s6747_s0 + $0x560] ss:$8 sps:$4 sm:$0xff]   ;;  %v4815_v37 = vld [vmem:[%s6747_s0 + $0x150] ss:$8 sps:$4 sm:$0xff]  }
  0x62   :  { %1433 = vmatprep.mubr.bf16.mxu0 %v4750_v35  ;;  %1969 = vmatprep.mubr.bf16.mxu1 %v4816_v40  ;;  %v4813_v35 = vld [vmem:[%s6747_s0 + $0x154] ss:$8 sps:$4 sm:$0xff]   ;;  %v4912_v40 = vld [vmem:[%s6747_s0 + $0x584] ss:$8 sps:$4 sm:$0xff]  }
  0x69   :  { %1434 = vmatmul.mubr.bf16.gmra.mrb[20].mxu0 %v4752_v38  ;;  %1970 = vmatmul.mubr.bf16.gmra.mrb[20].mxu1 %v4818_v41  ;;  %v4908_v38 = vld [vmem:[%s6747_s0 + $0x570] ss:$8 sps:$4 sm:$0xff]   ;;  %v4821_v41 = vld [vmem:[%s6747_s0 + $0x160] ss:$8 sps:$4 sm:$0xff]  }
  0x6a   :  { %1441 = vmatprep.mubr.bf16.mxu0 %v4753_v39  ;;  %1977 = vmatprep.mubr.bf16.mxu1 %v4822_v44  ;;  %v4819_v39 = vld [vmem:[%s6747_s0 + $0x164] ss:$8 sps:$4 sm:$0xff]   ;;  %v4918_v44 = vld [vmem:[%s6747_s0 + $0x594] ss:$8 sps:$4 sm:$0xff]  }
  0x71   :  { %1442 = vmatmul.mubr.bf16.gmra.mrb[24].mxu0 %v4755_v42  ;;  %1978 = vmatmul.mubr.bf16.gmra.mrb[24].mxu1 %v4824_v45  ;;  %v4914_v42 = vld [vmem:[%s6747_s0 + $0x580] ss:$8 sps:$4 sm:$0xff]   ;;  %v4827_v45 = vld [vmem:[%s6747_s0 + $0x170] ss:$8 sps:$4 sm:$0xff]  }
  0x72   :  { %1449 = vmatprep.mubr.bf16.mxu0 %v4756_v43  ;;  %1985 = vmatprep.mubr.bf16.mxu1 %v4828_v48  ;;  %v4825_v43 = vld [vmem:[%s6747_s0 + $0x174] ss:$8 sps:$4 sm:$0xff]   ;;  %v4924_v48 = vld [vmem:[%s6747_s0 + $0x5a4] ss:$8 sps:$4 sm:$0xff]  }
  0x79   :  { %1450 = vmatmul.mubr.bf16.gmra.mrb[28].mxu0 %v4758_v46  ;;  %1986 = vmatmul.mubr.bf16.gmra.mrb[28].mxu1 %v4830_v49  ;;  %v4920_v46 = vld [vmem:[%s6747_s0 + $0x590] ss:$8 sps:$4 sm:$0xff]   ;;  %v4833_v49 = vld [vmem:[%s6747_s0 + $0x180] ss:$8 sps:$4 sm:$0xff]  }
  0x7a   :  { %1457 = vmatprep.mubr.bf16.mxu0 %v4759_v47  ;;  %1993 = vmatprep.mubr.bf16.mxu1 %v4834_v52  ;;  %v4831_v47 = vld [vmem:[%s6747_s0 + $0x184] ss:$8 sps:$4 sm:$0xff]   ;;  %v4930_v52 = vld [vmem:[%s6747_s0 + $0x5b4] ss:$8 sps:$4 sm:$0xff]  }
  0x81   :  { %1458 = vmatmul.mubr.bf16.gmra.mrb[32].mxu0 %v4761_v50  ;;  %1994 = vmatmul.mubr.bf16.gmra.mrb[32].mxu1 %v4836_v53  ;;  %v4926_v50 = vld [vmem:[%s6747_s0 + $0x5a0] ss:$8 sps:$4 sm:$0xff]   ;;  %v4839_v53 = vld [vmem:[%s6747_s0 + $0x190] ss:$8 sps:$4 sm:$0xff]  }
  0x82   :  { %1465 = vmatprep.mubr.bf16.mxu0 %v4762_v51  ;;  %2001 = vmatprep.mubr.bf16.mxu1 %v4840_v56  ;;  %v4837_v51 = vld [vmem:[%s6747_s0 + $0x194] ss:$8 sps:$4 sm:$0xff]   ;;  %v4936_v56 = vld [vmem:[%s6747_s0 + $0x5c4] ss:$8 sps:$4 sm:$0xff]  }
  0x89   :  { %1466 = vmatmul.mubr.bf16.gmra.mrb[36].mxu0 %v4764_v54  ;;  %2002 = vmatmul.mubr.bf16.gmra.mrb[36].mxu1 %v4842_v57  ;;  %v4932_v54 = vld [vmem:[%s6747_s0 + $0x5b0] ss:$8 sps:$4 sm:$0xff]   ;;  %v4845_v57 = vld [vmem:[%s6747_s0 + $0x1a0] ss:$8 sps:$4 sm:$0xff]  }
  0x8a   :  { %1473 = vmatprep.mubr.bf16.mxu0 %v4765_v55  ;;  %2009 = vmatprep.mubr.bf16.mxu1 %v4846_v60  ;;  %v4843_v55 = vld [vmem:[%s6747_s0 + $0x1a4] ss:$8 sps:$4 sm:$0xff]  }
  0x91   :  { %1474 = vmatmul.mubr.bf16.gmra.mrb[40].mxu0 %v4767_v58  ;;  %2010 = vmatmul.mubr.bf16.gmra.mrb[40].mxu1 %v4848_v62  ;;  %v4938_v58 = vld [vmem:[%s6747_s0 + $0x5c0] ss:$8 sps:$4 sm:$0xff]  }
  0x92   :  { %1481 = vmatprep.mubr.bf16.mxu0 %v4768_v59  ;;  %2017 = vmatprep.mubr.bf16.mxu1 %v4852_v0  ;;  %v4849_v59 = vld [vmem:[%s6747_s0 + $0x1b4] ss:$8 sps:$4 sm:$0xff]   ;;  %v4944_v0 = vld [vmem:[%s6747_s0 + $0x5d0] ss:$8 sps:$4 sm:$0xff]  }
  0x99   :  { %1482 = vmatmul.mubr.bf16.gmra.mrb[44].mxu0 %v4770_v61  ;;  %2018 = vmatmul.mubr.bf16.gmra.mrb[44].mxu1 %v4854_v2  ;;  %v4942_v61 = vld [vmem:[%s6747_s0 + $0x5d4] ss:$8 sps:$4 sm:$0xff]   ;;  %v4855_v2 = vld [vmem:[%s6747_s0 + $0x1c4] ss:$8 sps:$4 sm:$0xff]  }
  0x9a   :  { %1489 = vmatprep.mubr.bf16.mxu0 %v4771_v63  ;;  %2025 = vmatprep.mubr.bf16.mxu1 %v4858_v4  ;;  %v4851_v63 = vld [vmem:[%s6747_s0 + $0x1b0] ss:$8 sps:$4 sm:$0xff]  }
  0xa1   :  { %1490 = vmatmul.mubr.bf16.gmra.mrb[48].mxu0 %v4773_v1  ;;  %2026 = vmatmul.mubr.bf16.gmra.mrb[48].mxu1 %v4860_v6 }
  0xa2   :  { %1497 = vmatprep.mubr.bf16.mxu0 %v4774_v3  ;;  %2033 = vmatprep.mubr.bf16.mxu1 %v4864_v8  ;;  %v4950_v8 = vld [vmem:[%s6747_s0 + $0x5e0] ss:$8 sps:$4 sm:$0xff]  }
  0xa9   :  { %1498 = vmatmul.mubr.bf16.gmra.mrb[52].mxu0 %v4776_v5  ;;  %2034 = vmatmul.mubr.bf16.gmra.mrb[52].mxu1 %v4866_v10  ;;  %v4948_v5 = vld [vmem:[%s6747_s0 + $0x5e4] ss:$8 sps:$4 sm:$0xff]   ;;  %v4861_v10 = vld [vmem:[%s6747_s0 + $0x1d4] ss:$8 sps:$4 sm:$0xff]  }
  0xaa   :  { %1505 = vmatprep.mubr.bf16.mxu0 %v4777_v7  ;;  %2041 = vmatprep.mubr.bf16.mxu1 %v4870_v12  ;;  %v4857_v7 = vld [vmem:[%s6747_s0 + $0x1c0] ss:$8 sps:$4 sm:$0xff]  }
  0xb1   :  { %1506 = vmatmul.mubr.bf16.gmra.mrb[56].mxu0 %v4779_v9  ;;  %2042 = vmatmul.mubr.bf16.gmra.mrb[56].mxu1 %v4872_v14 }
  0xb2   :  { %1513 = vmatprep.mubr.bf16.mxu0 %v4780_v11  ;;  %2049 = vmatprep.mubr.bf16.mxu1 %v4876_v16  ;;  %v4956_v16 = vld [vmem:[%s6747_s0 + $0x5f0] ss:$8 sps:$4 sm:$0xff]  }
  0xb9   :  { %1514 = vmatmul.mubr.bf16.gmra.mrb[60].mxu0 %v4782_v13  ;;  %2050 = vmatmul.mubr.bf16.gmra.mrb[60].mxu1 %v4878_v18  ;;  %v4954_v13 = vld [vmem:[%s6747_s0 + $0x5f4] ss:$8 sps:$4 sm:$0xff]   ;;  %v4867_v18 = vld [vmem:[%s6747_s0 + $0x1e4] ss:$8 sps:$4 sm:$0xff]  }
  0xba   :  { %1521 = vmatprep.mubr.bf16.mxu0 %v4783_v15  ;;  %2057 = vmatprep.mubr.bf16.mxu1 %v4882_v20  ;;  %v4863_v15 = vld [vmem:[%s6747_s0 + $0x1d0] ss:$8 sps:$4 sm:$0xff]  }
  0xc1   :  { %1522 = vmatmul.mubr.bf16.gmra.mrb[64].mxu0 %v4785_v17  ;;  %2058 = vmatmul.mubr.bf16.gmra.mrb[64].mxu1 %v4884_v22 }
  0xc2   :  { %1529 = vmatprep.mubr.bf16.mxu0 %v4789_v19  ;;  %2065 = vmatprep.mubr.bf16.mxu1 %v4888_v24  ;;  %v4962_v24 = vld [vmem:[%s6747_s0 + $0x600] ss:$8 sps:$4 sm:$0xff]  }
  0xc9   :  { %1530 = vmatmul.mubr.bf16.gmra.mrb[68].mxu0 %v4791_v21  ;;  %2066 = vmatmul.mubr.bf16.gmra.mrb[68].mxu1 %v4890_v26  ;;  %v4960_v21 = vld [vmem:[%s6747_s0 + $0x604] ss:$8 sps:$4 sm:$0xff]   ;;  %v4873_v26 = vld [vmem:[%s6747_s0 + $0x1f4] ss:$8 sps:$4 sm:$0xff]  }
  0xca   :  { %1537 = vmatprep.mubr.bf16.mxu0 %v4795_v23  ;;  %2073 = vmatprep.mubr.bf16.mxu1 %v4894_v28  ;;  %v4869_v23 = vld [vmem:[%s6747_s0 + $0x1e0] ss:$8 sps:$4 sm:$0xff]   ;;  %v6756_v28 = vmov 0.0  }
  0xcb   :  { %4494 = vmatprep.subr.bf16.mxu1 %v6756_v28 }
  0xd1   :  { %1538 = vmatmul.mubr.bf16.gmra.mrb[72].mxu0 %v4797_v25  ;;  %2074 = vmatmul.mubr.bf16.gmra.mrb[72].mxu1 %v4896_v30  ;;  %v4875_v30 = vld [vmem:[%s6747_s0 + $0x1f0] ss:$8 sps:$4 sm:$0xff]  }
  0xd2   :  { %1545 = vmatprep.mubr.bf16.mxu0 %v4801_v27  ;;  %2081 = vmatprep.mubr.bf16.mxu1 %v4900_v32  ;;  %v4967_v32 = vld [vmem:[%s6747_s0 + $0x614] ss:$8 sps:$4 sm:$0xff]  }
  0xd9   :  { %1546 = vmatmul.mubr.bf16.gmra.mrb[76].mxu0 %v4803_v29  ;;  %2082 = vmatmul.mubr.bf16.gmra.mrb[76].mxu1 %v4902_v34  ;;  %v4966_v29 = vld [vmem:[%s6748_s3 + $0x8] sm:$0xff]   ;;  %v4969_v34 = vld [vmem:[%s6747_s0 + $0x610] ss:$8 sps:$4 sm:$0xff]  }
  0xda   :  { %1553 = vmatprep.mubr.bf16.mxu0 %v4807_v31  ;;  %2089 = vmatprep.mubr.bf16.mxu1 %v4906_v36  ;;  %v4879_v36 = vld [vmem:[%s6747_s0 + $0x204] ss:$8 sps:$4 sm:$0xff]  }
  0xdb   :  { %4495 = vmatpush3.bf16.msra.mxu1 %v4966_v29 }
  0xdc   :  { %4500 = vmatprep.subr.bf16.mxu1 %v6756_v28 }
  0xe1   :  { %1554 = vmatmul.mubr.bf16.gmra.mrb[80].mxu0 %v4809_v33  ;;  %2090 = vmatmul.mubr.bf16.gmra.mrb[80].mxu1 %v4908_v38  ;;  %v4881_v38 = vld [vmem:[%s6747_s0 + $0x200] ss:$8 sps:$4 sm:$0xff]  }
  0xe2   :  { %1561 = vmatprep.mubr.bf16.mxu0 %v4813_v35  ;;  %2097 = vmatprep.mubr.bf16.mxu1 %v4912_v40  ;;  %v4973_v40 = vld [vmem:[%s6747_s0 + $0x624] ss:$8 sps:$4 sm:$0xff]  }
  0xe9   :  { %1562 = vmatmul.mubr.bf16.gmra.mrb[84].mxu0 %v4815_v37  ;;  %2098 = vmatmul.mubr.bf16.gmra.mrb[84].mxu1 %v4914_v42  ;;  %v4975_v42 = vld [vmem:[%s6747_s0 + $0x620] ss:$8 sps:$4 sm:$0xff]  }
  0xea   :  { %1569 = vmatprep.mubr.bf16.mxu0 %v4819_v39  ;;  %2105 = vmatprep.mubr.bf16.mxu1 %v4918_v44  ;;  %v4885_v44 = vld [vmem:[%s6747_s0 + $0x214] ss:$8 sps:$4 sm:$0xff]  }
  0xf1   :  { %1570 = vmatmul.mubr.bf16.gmra.mrb[88].mxu0 %v4821_v41  ;;  %2106 = vmatmul.mubr.bf16.gmra.mrb[88].mxu1 %v4920_v46  ;;  %v4887_v46 = vld [vmem:[%s6747_s0 + $0x210] ss:$8 sps:$4 sm:$0xff]  }
  0xf2   :  { %1577 = vmatprep.mubr.bf16.mxu0 %v4825_v43  ;;  %2113 = vmatprep.mubr.bf16.mxu1 %v4924_v48  ;;  %v4979_v48 = vld [vmem:[%s6747_s0 + $0x634] ss:$8 sps:$4 sm:$0xff]  }
  0xf9   :  { %1578 = vmatmul.mubr.bf16.gmra.mrb[92].mxu0 %v4827_v45  ;;  %2114 = vmatmul.mubr.bf16.gmra.mrb[92].mxu1 %v4926_v50  ;;  %v4981_v50 = vld [vmem:[%s6747_s0 + $0x630] ss:$8 sps:$4 sm:$0xff]  }
  0xfa   :  { %1585 = vmatprep.mubr.bf16.mxu0 %v4831_v47  ;;  %2121 = vmatprep.mubr.bf16.mxu1 %v4930_v52  ;;  %v4891_v52 = vld [vmem:[%s6747_s0 + $0x224] ss:$8 sps:$4 sm:$0xff]  }
 0x101   :  { %1586 = vmatmul.mubr.bf16.gmra.mrb[96].mxu0 %v4833_v49  ;;  %2122 = vmatmul.mubr.bf16.gmra.mrb[96].mxu1 %v4932_v54 }
 0x102   :  { %1593 = vmatprep.mubr.bf16.mxu0 %v4837_v51  ;;  %2129 = vmatprep.mubr.bf16.mxu1 %v4936_v56  ;;  %v4893_v56 = vld [vmem:[%s6747_s0 + $0x220] ss:$8 sps:$4 sm:$0xff]  }
 0x109   :  { %1594 = vmatmul.mubr.bf16.gmra.mrb[100].mxu0 %v4839_v53  ;;  %2130 = vmatmul.mubr.bf16.gmra.mrb[100].mxu1 %v4938_v58  ;;  %v4897_v58 = vld [vmem:[%s6747_s0 + $0x234] ss:$8 sps:$4 sm:$0xff]  }
 0x10a   :  { %1601 = vmatprep.mubr.bf16.mxu0 %v4843_v55  ;;  %2137 = vmatprep.mubr.bf16.mxu1 %v4942_v61 }
 0x111   :  { %1602 = vmatmul.mubr.bf16.gmra.mrb[104].mxu0 %v4845_v57  ;;  %2138 = vmatmul.mubr.bf16.gmra.mrb[104].mxu1 %v4944_v0 }
 0x112   :  { %1609 = vmatprep.mubr.bf16.mxu0 %v4849_v59  ;;  %2145 = vmatprep.mubr.bf16.mxu1 %v4948_v5 }
 0x114   :  { %v5530_v60 = vpop.f32.mrb[0].mxu0 }
 0x115   :  { %6814 = vst [vmem:[#allocation2_spill] sm:$0xff] %v5530_v60  ;;  %v1397_v62 = vpop.f32.mrb[1].mxu0 }
 0x116   :  { %v5541_v1 = vpop.f32.mrb[2].mxu0 }
 0x117   :  { %v1400_v3 = vpop.f32.mrb[3].mxu0 }
 0x119   :  { %1610 = vmatmul.mubr.bf16.gmra.mrb[108].mxu0 %v4851_v63  ;;  %2146 = vmatmul.mubr.bf16.gmra.mrb[108].mxu1 %v4950_v8  ;;  %v4899_v63 = vld [vmem:[%s6747_s0 + $0x230] ss:$8 sps:$4 sm:$0xff]  }
 0x11a   :  { %1617 = vmatprep.mubr.bf16.mxu0 %v4855_v2  ;;  %2153 = vmatprep.mubr.bf16.mxu1 %v4954_v13  ;;  %v4903_v2 = vld [vmem:[%s6747_s0 + $0x244] ss:$8 sps:$4 sm:$0xff]  }
 0x11c   :  { %v5546_v4 = vpop.f32.mrb[4].mxu0 }
 0x11d   :  { %6815 = vst [vmem:[#allocation3_spill] sm:$0xff] %v5546_v4  ;;  %v1405_v6 = vpop.f32.mrb[5].mxu0  ;;  %v4999_v4 = vld [vmem:[%s6747_s0 + $0x360] ss:$8 sps:$4 sm:$0xff]  }
 0x11e   :  { %v5557_v9 = vpop.f32.mrb[6].mxu0 }
 0x11f   :  { %6816 = vst [vmem:[#allocation4_spill] sm:$0xff] %v5557_v9  ;;  %v1408_v11 = vpop.f32.mrb[7].mxu0  ;;  %v5002_v9 = vld [vmem:[%s6747_s0 + $0x370] ss:$8 sps:$4 sm:$0xff]  }
 0x121   :  { %1618 = vmatmul.mubr.bf16.gmra.mrb[112].mxu0 %v4857_v7  ;;  %2154 = vmatmul.mubr.bf16.gmra.mrb[112].mxu1 %v4956_v16  ;;  %v4905_v7 = vld [vmem:[%s6747_s0 + $0x240] ss:$8 sps:$4 sm:$0xff]  }
 0x122   :  { %1625 = vmatprep.mubr.bf16.mxu0 %v4861_v10  ;;  %2161 = vmatprep.mubr.bf16.mxu1 %v4960_v21  ;;  %v4909_v10 = vld [vmem:[%s6747_s0 + $0x254] ss:$8 sps:$4 sm:$0xff]  }
 0x124   :  { %v5562_v12 = vpop.f32.mrb[8].mxu0 }
 0x125   :  { %6817 = vst [vmem:[#allocation5_spill] sm:$0xff] %v5562_v12  ;;  %v1413_v14 = vpop.f32.mrb[9].mxu0 }
 0x126   :  { %v5573_v17 = vpop.f32.mrb[10].mxu0 }
 0x127   :  { %6818 = vst [vmem:[#allocation6_spill] sm:$0xff] %v5573_v17  ;;  %v1416_v19 = vpop.f32.mrb[11].mxu0  ;;  %v5005_v17 = vld [vmem:[%s6747_s0 + $0x380] ss:$8 sps:$4 sm:$0xff]  }
 0x129   :  { %1626 = vmatmul.mubr.bf16.gmra.mrb[116].mxu0 %v4863_v15  ;;  %2162 = vmatmul.mubr.bf16.gmra.mrb[116].mxu1 %v4962_v24  ;;  %v4911_v15 = vld [vmem:[%s6747_s0 + $0x250] ss:$8 sps:$4 sm:$0xff]  }
 0x12a   :  { %1633 = vmatprep.mubr.bf16.mxu0 %v4867_v18  ;;  %2169 = vmatprep.mubr.bf16.mxu1 %v4967_v32  ;;  %v4915_v18 = vld [vmem:[%s6747_s0 + $0x264] ss:$8 sps:$4 sm:$0xff]   ;;  %v4923_v32 = vld [vmem:[%s6747_s0 + $0x270] ss:$8 sps:$4 sm:$0xff]  }
 0x12c   :  { %v5578_v20 = vpop.f32.mrb[12].mxu0 }
 0x12d   :  { %6819 = vst [vmem:[#allocation7_spill] sm:$0xff] %v5578_v20  ;;  %v1421_v22 = vpop.f32.mrb[13].mxu0 }
 0x12e   :  { %v5589_v25 = vpop.f32.mrb[14].mxu0 }
 0x12f   :  { %6820 = vst [vmem:[#allocation8_spill] sm:$0xff] %v5589_v25  ;;  %v1424_v27 = vpop.f32.mrb[15].mxu0  ;;  %v5008_v25 = vld [vmem:[%s6747_s0 + $0x390] ss:$8 sps:$4 sm:$0xff]  }
 0x131   :  { %1634 = vmatmul.mubr.bf16.gmra.mrb[120].mxu0 %v4869_v23  ;;  %2170 = vmatmul.mubr.bf16.gmra.mrb[120].mxu1 %v4969_v34  ;;  %v4917_v23 = vld [vmem:[%s6747_s0 + $0x260] ss:$8 sps:$4 sm:$0xff]   ;;  %v4927_v34 = vld [vmem:[%s6747_s0 + $0x284] ss:$8 sps:$4 sm:$0xff]  }
 0x132   :  { %1641 = vmatprep.mubr.bf16.mxu0 %v4873_v26  ;;  %2177 = vmatprep.mubr.bf16.mxu1 %v4973_v40  ;;  %v4921_v26 = vld [vmem:[%s6747_s0 + $0x274] ss:$8 sps:$4 sm:$0xff]   ;;  %v4929_v40 = vld [vmem:[%s6747_s0 + $0x280] ss:$8 sps:$4 sm:$0xff]  }
 0x134   :  { %v5601_v31 = vpop.f32.mrb[16].mxu0 }
 0x135   :  { %6821 = vst [vmem:[#allocation9_spill] sm:$0xff] %v5601_v31  ;;  %v1429_v33 = vpop.f32.mrb[17].mxu0 }
 0x136   :  { %v5610_v35 = vpop.f32.mrb[18].mxu0 }
 0x137   :  { %6822 = vst [vmem:[#allocation10_spill] sm:$0xff] %v5610_v35  ;;  %v1432_v37 = vpop.f32.mrb[19].mxu0  ;;  %v5011_v35 = vld [vmem:[%s6747_s0 + $0x3a0] ss:$8 sps:$4 sm:$0xff]  }
 0x139   :  { %1642 = vmatmul.mubr.bf16.gmra.mrb[124].mxu0 %v4875_v30  ;;  %2178 = vmatmul.mubr.bf16.gmra.mrb[124].mxu1 %v4975_v42  ;;  %v4933_v42 = vld [vmem:[%s6747_s0 + $0x294] ss:$8 sps:$4 sm:$0xff]  }
 0x13a   :  { %1649 = vmatprep.mubr.bf16.mxu0 %v4879_v36  ;;  %2185 = vmatprep.mubr.bf16.mxu1 %v4979_v48 }
 0x13c   :  { %v5618_v39 = vpop.f32.mrb[20].mxu0 }
 0x13d   :  { %6823 = vst [vmem:[#allocation11_spill] sm:$0xff] %v5618_v39  ;;  %v1437_v41 = vpop.f32.mrb[21].mxu0 }
 0x13e   :  { %v5626_v43 = vpop.f32.mrb[22].mxu0 }
 0x13f   :  { %6824 = vst [vmem:[#allocation12_spill] sm:$0xff] %v5626_v43  ;;  %v1440_v45 = vpop.f32.mrb[23].mxu0  ;;  %v5014_v43 = vld [vmem:[%s6747_s0 + $0x3b0] ss:$8 sps:$4 sm:$0xff]  }
 0x141   :  { %1650 = vmatmul.mubr.bf16.gmra.mrb[128].mxu0 %v4881_v38  ;;  %2186 = vmatmul.mubr.bf16.gmra.mrb[128].mxu1 %v4981_v50 }
 0x142   :  { %1657 = vmatprep.mubr.bf16.mxu0 %v4885_v44  ;;  %v5717_v44 = vpop.f32.mrb[0].mxu1 }
 0x144   :  { %v5634_v47 = vpop.f32.mrb[24].mxu0 }
 0x145   :  { %6825 = vst [vmem:[#allocation13_spill] sm:$0xff] %v5634_v47  ;;  %v1445_v49 = vpop.f32.mrb[25].mxu0 }
 0x146   :  { %v5642_v51 = vpop.f32.mrb[26].mxu0 }
 0x147   :  { %6826 = vst [vmem:[#allocation14_spill] sm:$0xff] %v5642_v51  ;;  %v1448_v53 = vpop.f32.mrb[27].mxu0  ;;  %v5017_v51 = vld [vmem:[%s6747_s0 + $0x3c0] ss:$8 sps:$4 sm:$0xff]  }
 0x149   :  { %1658 = vmatmul.mubr.bf16.gmra.mrb[132].mxu0 %v4887_v46  ;;  %v1933_v46 = vpop.f32.mrb[1].mxu1 }
 0x14a   :  { %1665 = vmatprep.mubr.bf16.mxu0 %v4891_v52  ;;  %v5719_v48 = vpop.f32.mrb[2].mxu1 }
 0x14b   :  { %v1936_v49 = vpop.f32.mrb[3].mxu1 }
 0x14c   :  { %v5647_v54 = vpop.f32.mrb[28].mxu0  ;;  %v5721_v50 = vpop.f32.mrb[4].mxu1 }
 0x14d   :  { %6827 = vst [vmem:[#allocation15_spill] sm:$0xff] %v5647_v54  ;;  %v1453_v55 = vpop.f32.mrb[29].mxu0  ;;  %v1941_v52 = vpop.f32.mrb[5].mxu1 }
 0x14e   :  { %v5652_v57 = vpop.f32.mrb[30].mxu0  ;;  %v5725_v55 = vpop.f32.mrb[6].mxu1  ;;  %v4947_v52 = vld [vmem:[%s6747_s0 + $0x2b0] ss:$8 sps:$4 sm:$0xff]  }
 0x14f   :  { %v1456_v59 = vpop.f32.mrb[31].mxu0 }
 0x150   :  { %v1944_v59 = vpop.f32.mrb[7].mxu1 }
 0x151   :  { %1666 = vmatmul.mubr.bf16.gmra.mrb[136].mxu0 %v4893_v56  ;;  %v4951_v59 = vld [vmem:[%s6747_s0 + $0x2c4] ss:$8 sps:$4 sm:$0xff]  }
 0x152   :  { %1673 = vmatprep.mubr.bf16.mxu0 %v4897_v58  ;;  %v4935_v58 = vld [vmem:[%s6747_s0 + $0x290] ss:$8 sps:$4 sm:$0xff]  }
 0x154   :  { %v5657_v61 = vpop.f32.mrb[32].mxu0 }
 0x155   :  { %6828 = vst [vmem:[#allocation16_spill] sm:$0xff] %v5657_v61  ;;  %v1461_v62 = vpop.f32.mrb[33].mxu0 }
 0x156   :  { %v5662_v0 = vpop.f32.mrb[34].mxu0 }
 0x157   :  { %v1464_v3 = vpop.f32.mrb[35].mxu0 }
 0x159   :  { %1674 = vmatmul.mubr.bf16.gmra.mrb[140].mxu0 %v4899_v63  ;;  %v4939_v63 = vld [vmem:[%s6747_s0 + $0x2a4] ss:$8 sps:$4 sm:$0xff]  }
 0x15a   :  { %1681 = vmatprep.mubr.bf16.mxu0 %v4903_v2  ;;  %v5735_v2 = vpop.f32.mrb[8].mxu1 }
 0x15c   :  { %v5667_v5 = vpop.f32.mrb[36].mxu0 }
 0x15d   :  { %6829 = vst [vmem:[#allocation17_spill] sm:$0xff] %v5667_v5  ;;  %v1469_v6 = vpop.f32.mrb[37].mxu0  ;;  %v5024_v5 = vld [vmem:[%s6747_s0 + $0x3f4] ss:$8 sps:$4 sm:$0xff]  }
 0x15e   :  { %v5672_v8 = vpop.f32.mrb[38].mxu0  ;;  %v1949_v6 = vpop.f32.mrb[9].mxu1 }
 0x15f   :  { %v1472_v11 = vpop.f32.mrb[39].mxu0 }
 0x161   :  { %1682 = vmatmul.mubr.bf16.gmra.mrb[144].mxu0 %v4905_v7  ;;  %v5737_v7 = vpop.f32.mrb[10].mxu1 }
 0x162   :  { %1689 = vmatprep.mubr.bf16.mxu0 %v4909_v10  ;;  %v1952_v10 = vpop.f32.mrb[11].mxu1 }
 0x163   :  { %v5739_v11 = vpop.f32.mrb[12].mxu1 }
 0x164   :  { %v5677_v13 = vpop.f32.mrb[40].mxu0 }
 0x165   :  { %6830 = vst [vmem:[#allocation18_spill] sm:$0xff] %v5677_v13  ;;  %v1477_v14 = vpop.f32.mrb[41].mxu0  ;;  %v5029_v13 = vld [vmem:[%s6747_s0 + $0x404] ss:$8 sps:$4 sm:$0xff]  }
 0x166   :  { %v5682_v16 = vpop.f32.mrb[42].mxu0  ;;  %v1957_v14 = vpop.f32.mrb[13].mxu1 }
 0x167   :  { %v1480_v19 = vpop.f32.mrb[43].mxu0 }
 0x169   :  { %1690 = vmatmul.mubr.bf16.gmra.mrb[148].mxu0 %v4911_v15 }
 0x16a   :  { %1697 = vmatprep.mubr.bf16.mxu0 %v4915_v18  ;;  %v5743_v18 = vpop.f32.mrb[14].mxu1 }
 0x16c   :  { %v5687_v21 = vpop.f32.mrb[44].mxu0 }
 0x16d   :  { %6831 = vst [vmem:[#allocation19_spill] sm:$0xff] %v5687_v21  ;;  %v1485_v22 = vpop.f32.mrb[45].mxu0 }
 0x16e   :  { %v5692_v24 = vpop.f32.mrb[46].mxu0  ;;  %v4941_v22 = vld [vmem:[%s6747_s0 + $0x2a0] ss:$8 sps:$4 sm:$0xff]  }
 0x16f   :  { %v1488_v27 = vpop.f32.mrb[47].mxu0 }
 0x170   :  { %v4945_v27 = vld [vmem:[%s6747_s0 + $0x2b4] ss:$8 sps:$4 sm:$0xff]  }
 0x171   :  { %1698 = vmatmul.mubr.bf16.gmra.mrb[152].mxu0 %v4917_v23  ;;  %v1960_v23 = vpop.f32.mrb[15].mxu1 }
 0x172   :  { %1705 = vmatprep.mubr.bf16.mxu0 %v4921_v26 }
 0x174   :  { %v5697_v29 = vpop.f32.mrb[48].mxu0 }
 0x175   :  { %6832 = vst [vmem:[#allocation20_spill] sm:$0xff] %v5697_v29  ;;  %v1493_v30 = vpop.f32.mrb[49].mxu0 }
 0x176   :  { %v5702_v33 = vpop.f32.mrb[50].mxu0  ;;  %v5753_v30 = vpop.f32.mrb[16].mxu1 }
 0x177   :  { %v1496_v36 = vpop.f32.mrb[51].mxu0 }
 0x179   :  { %1706 = vmatmul.mubr.bf16.gmra.mrb[156].mxu0 %v4923_v32 }
 0x17a   :  { %1713 = vmatprep.mubr.bf16.mxu0 %v4927_v34  ;;  %v1965_v34 = vpop.f32.mrb[17].mxu1 }
 0x17b   :  { %v5755_v36 = vpop.f32.mrb[18].mxu1  ;;  %v4953_v34 = vld [vmem:[%s6747_s0 + $0x2c0] ss:$8 sps:$4 sm:$0xff]  }
 0x17c   :  { %v5707_v37 = vpop.f32.mrb[52].mxu0 }
 0x17d   :  { %6833 = vst [vmem:[#allocation21_spill] sm:$0xff] %v5707_v37  ;;  %v1501_v38 = vpop.f32.mrb[53].mxu0 }
 0x17e   :  { %v5712_v41 = vpop.f32.mrb[54].mxu0  ;;  %v1968_v38 = vpop.f32.mrb[19].mxu1 }
 0x17f   :  { %v1504_v45 = vpop.f32.mrb[55].mxu0 }
 0x181   :  { %1714 = vmatmul.mubr.bf16.gmra.mrb[160].mxu0 %v4929_v40  ;;  %v5757_v40 = vpop.f32.mrb[20].mxu1 }
 0x182   :  { %1721 = vmatprep.mubr.bf16.mxu0 %v4933_v42  ;;  %v1973_v42 = vpop.f32.mrb[21].mxu1 }
 0x183   :  { %v5761_v46 = vpop.f32.mrb[22].mxu1 }
 0x184   :  { %v5723_v53 = vpop.f32.mrb[56].mxu0 }
 0x185   :  { %6834 = vst [vmem:[#allocation22_spill] sm:$0xff] %v5723_v53  ;;  %v1509_v56 = vpop.f32.mrb[57].mxu0 }
 0x186   :  { %v5730_v62 = vpop.f32.mrb[58].mxu0  ;;  %v1976_v56 = vpop.f32.mrb[23].mxu1 }
 0x187   :  { %6835 = vst [vmem:[#allocation23_spill] sm:$0xff] %v5730_v62  ;;  %v1512_v3 = vpop.f32.mrb[59].mxu0 }
 0x189   :  { %1722 = vmatmul.mubr.bf16.gmra.mrb[164].mxu0 %v4935_v58 }
 0x18a   :  { %1729 = vmatprep.mubr.bf16.mxu0 %v4939_v63  ;;  %v5771_v63 = vpop.f32.mrb[24].mxu1 }
 0x18b   :  { %v1981_v6 = vpop.f32.mrb[25].mxu1 }
 0x18c   :  { %v5741_v15 = vpop.f32.mrb[60].mxu0  ;;  %v5773_v10 = vpop.f32.mrb[26].mxu1 }
 0x18d   :  { %6836 = vst [vmem:[#allocation24_spill] sm:$0xff] %v5741_v15  ;;  %v1517_v19 = vpop.f32.mrb[61].mxu0  ;;  %v1984_v14 = vpop.f32.mrb[27].mxu1 }
 0x18e   :  { %v5748_v26 = vpop.f32.mrb[62].mxu0  ;;  %v5775_v19 = vpop.f32.mrb[28].mxu1 }
 0x18f   :  { %6837 = vst [vmem:[#allocation25_spill] sm:$0xff] %v5748_v26  ;;  %v1520_v32 = vpop.f32.mrb[63].mxu0 }
 0x191   :  { %1730 = vmatmul.mubr.bf16.gmra.mrb[168].mxu0 %v4941_v22  ;;  %v1989_v22 = vpop.f32.mrb[29].mxu1 }
 0x192   :  { %1737 = vmatprep.mubr.bf16.mxu0 %v4945_v27  ;;  %v5779_v27 = vpop.f32.mrb[30].mxu1 }
 0x193   :  { %v1992_v38 = vpop.f32.mrb[31].mxu1 }
 0x194   :  { %v5759_v45 = vpop.f32.mrb[64].mxu0 }
 0x195   :  { %6838 = vst [vmem:[#allocation26_spill] sm:$0xff] %v5759_v45  ;;  %v1525_v49 = vpop.f32.mrb[65].mxu0 }
 0x196   :  { %v5766_v58 = vpop.f32.mrb[66].mxu0  ;;  %v4957_v49 = vld [vmem:[%s6747_s0 + $0x2d4] ss:$8 sps:$4 sm:$0xff]  }
 0x197   :  { %6839 = vst [vmem:[#allocation27_spill] sm:$0xff] %v5766_v58  ;;  %v1528_v3 = vpop.f32.mrb[67].mxu0 }
 0x199   :  { %1738 = vmatmul.mubr.bf16.gmra.mrb[172].mxu0 %v4947_v52  ;;  %v5789_v52 = vpop.f32.mrb[32].mxu1 }
 0x19a   :  { %1745 = vmatprep.mubr.bf16.mxu0 %v4951_v59  ;;  %6841 = vst [vmem:[#allocation29_spill] sm:$0xff] %v5789_v52  ;;  %v1997_v59 = vpop.f32.mrb[33].mxu1 }
 0x19b   :  { %v5791_v3 = vpop.f32.mrb[34].mxu1 }
 0x19c   :  { %v5777_v23 = vpop.f32.mrb[68].mxu0  ;;  %6842 = vst [vmem:[#allocation30_spill] sm:$0xff] %v5791_v3  ;;  %v2000_v6 = vpop.f32.mrb[35].mxu1 }
 0x19d   :  { %v1533_v32 = vpop.f32.mrb[69].mxu0  ;;  %v5793_v14 = vpop.f32.mrb[36].mxu1 }
 0x19e   :  { %v5784_v42 = vpop.f32.mrb[70].mxu0  ;;  %6843 = vst [vmem:[#allocation31_spill] sm:$0xff] %v5793_v14  ;;  %v2005_v22 = vpop.f32.mrb[37].mxu1 }
 0x19f   :  { %6840 = vst [vmem:[#allocation28_spill] sm:$0xff] %v5784_v42  ;;  %v1536_v56 = vpop.f32.mrb[71].mxu0  ;;  %v5797_v38 = vpop.f32.mrb[38].mxu1  ;;  %v4959_v42 = vld [vmem:[%s6747_s0 + $0x2d0] ss:$8 sps:$4 sm:$0xff]  }
 0x1a0   :  { %6845 = vst [vmem:[#allocation33_spill] sm:$0xff] %v5797_v38  ;;  %v2008_v52 = vpop.f32.mrb[39].mxu1 }
 0x1a1   :  { %1746 = vmatmul.mubr.bf16.gmra.mrb[176].mxu0 %v4953_v34  ;;  %v4963_v34 = vld [vmem:[%s6747_s0 + $0x2e4] ss:$8 sps:$4 sm:$0xff]  }
 0x1a2   :  { %1753 = vmatprep.mubr.bf16.mxu0 %v4957_v49  ;;  %v5807_v49 = vpop.f32.mrb[40].mxu1 }
 0x1a3   :  { %6847 = vst [vmem:[#allocation35_spill] sm:$0xff] %v5807_v49  ;;  %v2013_v6 = vpop.f32.mrb[41].mxu1 }
 0x1a4   :  { %v5795_v32 = vpop.f32.mrb[72].mxu0  ;;  %v5809_v22 = vpop.f32.mrb[42].mxu1 }
 0x1a5   :  { %6844 = vst [vmem:[#allocation32_spill] sm:$0xff] %v5795_v32  ;;  %v1541_v28 = vpop.f32.mrb[73].mxu0  ;;  %6848 = vst [vmem:[#allocation36_spill] sm:$0xff] %v5809_v22  ;;  %v2016_v38 = vpop.f32.mrb[43].mxu1  ;;  %v4965_v32 = vld [vmem:[%s6747_s0 + $0x2e0] ss:$8 sps:$4 sm:$0xff]  }
 0x1a6   :  { %v5802_v56 = vpop.f32.mrb[74].mxu0  ;;  %v5811_v28 = vpop.f32.mrb[44].mxu1 }
 0x1a7   :  { %6846 = vst [vmem:[#allocation34_spill] sm:$0xff] %v5802_v56  ;;  %v1544_v59 = vpop.f32.mrb[75].mxu0  ;;  %6849 = vst [vmem:[#allocation37_spill] sm:$0xff] %v5811_v28  ;;  %v2021_v14 = vpop.f32.mrb[45].mxu1 }
 0x1a8   :  { %v5815_v52 = vpop.f32.mrb[46].mxu1 }
 0x1a9   :  { %1754 = vmatmul.mubr.bf16.gmra.mrb[180].mxu0 %v4959_v42  ;;  %6851 = vst [vmem:[#allocation39_spill] sm:$0xff] %v5815_v52  ;;  %v2024_v49 = vpop.f32.mrb[47].mxu1  ;;  %v4970_v42 = vld [vmem:[%s6747_s0 + $0x2f4] ss:$8 sps:$4 sm:$0xff]  }
 0x1aa   :  { %1761 = vmatprep.mubr.bf16.mxu0 %v4963_v34  ;;  %v5825_v38 = vpop.f32.mrb[48].mxu1 }
 0x1ab   :  { %6853 = vst [vmem:[#allocation41_spill] sm:$0xff] %v5825_v38  ;;  %v2029_v14 = vpop.f32.mrb[49].mxu1 }
 0x1ac   :  { %v5813_v3 = vpop.f32.mrb[76].mxu0  ;;  %v5827_v6 = vpop.f32.mrb[50].mxu1  ;;  %v6923_v26 = vld [vmem:[#allocation32_spill] sm:$0xff] }
 0x1ad   :  { %6850 = vst [vmem:[#allocation38_spill] sm:$0xff] %v5813_v3  ;;  %v1549_v56 = vpop.f32.mrb[77].mxu0  ;;  %6854 = vst [vmem:[#allocation42_spill] sm:$0xff] %v5827_v6  ;;  %v2032_v52 = vpop.f32.mrb[51].mxu1  ;;  %v4972_v3 = vld [vmem:[%s6747_s0 + $0x2f0] ss:$8 sps:$4 sm:$0xff]  }
 0x1ae   :  { %v5820_v59 = vpop.f32.mrb[78].mxu0  ;;  %v5829_v56 = vpop.f32.mrb[52].mxu1 }
 0x1af   :  { %6852 = vst [vmem:[#allocation40_spill] sm:$0xff] %v5820_v59  ;;  %v1552_v34 = vpop.f32.mrb[79].mxu0  ;;  %6855 = vst [vmem:[#allocation43_spill] sm:$0xff] %v5829_v56  ;;  %v2037_v28 = vpop.f32.mrb[53].mxu1 }
 0x1b0   :  { %v5833_v49 = vpop.f32.mrb[54].mxu1 }
 0x1b1   :  { %1762 = vmatmul.mubr.bf16.gmra.mrb[184].mxu0 %v4965_v32  ;;  %6857 = vst [vmem:[#allocation45_spill] sm:$0xff] %v5833_v49  ;;  %v2040_v38 = vpop.f32.mrb[55].mxu1  ;;  %v4976_v32 = vld [vmem:[%s6747_s0 + $0x304] ss:$8 sps:$4 sm:$0xff]  }
 0x1b2   :  { %1769 = vmatprep.mubr.bf16.mxu0 %v4970_v42  ;;  %v5843_v52 = vpop.f32.mrb[56].mxu1 }
 0x1b3   :  { %6859 = vst [vmem:[#allocation47_spill] sm:$0xff] %v5843_v52  ;;  %v2045_v28 = vpop.f32.mrb[57].mxu1 }
 0x1b4   :  { %v5831_v22 = vpop.f32.mrb[80].mxu0  ;;  %v5845_v14 = vpop.f32.mrb[58].mxu1 }
 0x1b5   :  { %6856 = vst [vmem:[#allocation44_spill] sm:$0xff] %v5831_v22  ;;  %v1557_v59 = vpop.f32.mrb[81].mxu0  ;;  %6860 = vst [vmem:[#allocation48_spill] sm:$0xff] %v5845_v14  ;;  %v2048_v49 = vpop.f32.mrb[59].mxu1  ;;  %v4978_v22 = vld [vmem:[%s6747_s0 + $0x300] ss:$8 sps:$4 sm:$0xff]  }
 0x1b6   :  { %v5838_v34 = vpop.f32.mrb[82].mxu0  ;;  %v5847_v59 = vpop.f32.mrb[60].mxu1 }
 0x1b7   :  { %6858 = vst [vmem:[#allocation46_spill] sm:$0xff] %v5838_v34  ;;  %v1560_v42 = vpop.f32.mrb[83].mxu0  ;;  %6861 = vst [vmem:[#allocation49_spill] sm:$0xff] %v5847_v59  ;;  %v2053_v56 = vpop.f32.mrb[61].mxu1 }
 0x1b8   :  { %v5851_v38 = vpop.f32.mrb[62].mxu1 }
 0x1b9   :  { %1770 = vmatmul.mubr.bf16.gmra.mrb[188].mxu0 %v4972_v3  ;;  %6863 = vst [vmem:[#allocation51_spill] sm:$0xff] %v5851_v38  ;;  %v2056_v52 = vpop.f32.mrb[63].mxu1  ;;  %v4982_v3 = vld [vmem:[%s6747_s0 + $0x314] ss:$8 sps:$4 sm:$0xff]  }
 0x1ba   :  { %1777 = vmatprep.mubr.bf16.mxu0 %v4976_v32  ;;  %v5861_v49 = vpop.f32.mrb[64].mxu1 }
 0x1bb   :  { %6865 = vst [vmem:[#allocation53_spill] sm:$0xff] %v5861_v49  ;;  %v2061_v56 = vpop.f32.mrb[65].mxu1 }
 0x1bc   :  { %v5849_v6 = vpop.f32.mrb[84].mxu0  ;;  %v5863_v28 = vpop.f32.mrb[66].mxu1 }
 0x1bd   :  { %6862 = vst [vmem:[#allocation50_spill] sm:$0xff] %v5849_v6  ;;  %v1565_v34 = vpop.f32.mrb[85].mxu0  ;;  %6866 = vst [vmem:[#allocation54_spill] sm:$0xff] %v5863_v28  ;;  %v2064_v38 = vpop.f32.mrb[67].mxu1  ;;  %v4984_v6 = vld [vmem:[%s6747_s0 + $0x310] ss:$8 sps:$4 sm:$0xff]  }
 0x1be   :  { %v5856_v42 = vpop.f32.mrb[86].mxu0  ;;  %v5865_v34 = vpop.f32.mrb[68].mxu1 }
 0x1bf   :  { %6864 = vst [vmem:[#allocation52_spill] sm:$0xff] %v5856_v42  ;;  %v1568_v32 = vpop.f32.mrb[87].mxu0  ;;  %6867 = vst [vmem:[#allocation55_spill] sm:$0xff] %v5865_v34  ;;  %v2069_v59 = vpop.f32.mrb[69].mxu1 }
 0x1c0   :  { %v5869_v52 = vpop.f32.mrb[70].mxu1 }
 0x1c1   :  { %1778 = vmatmul.mubr.bf16.gmra.mrb[192].mxu0 %v4978_v22  ;;  %6869 = vst [vmem:[#allocation57_spill] sm:$0xff] %v5869_v52  ;;  %v2072_v49 = vpop.f32.mrb[71].mxu1  ;;  %v4985_v22 = vld [vmem:[%s6747_s0 + $0x324] ss:$8 sps:$4 sm:$0xff]  }
 0x1c2   :  { %1785 = vmatprep.mubr.bf16.mxu0 %v4982_v3  ;;  %v5879_v38 = vpop.f32.mrb[72].mxu1 }
 0x1c3   :  { %6871 = vst [vmem:[#allocation59_spill] sm:$0xff] %v5879_v38  ;;  %v2077_v59 = vpop.f32.mrb[73].mxu1 }
 0x1c4   :  { %v5867_v14 = vpop.f32.mrb[88].mxu0  ;;  %v5881_v56 = vpop.f32.mrb[74].mxu1 }
 0x1c5   :  { %6868 = vst [vmem:[#allocation56_spill] sm:$0xff] %v5867_v14  ;;  %v1573_v42 = vpop.f32.mrb[89].mxu0  ;;  %6872 = vst [vmem:[#allocation60_spill] sm:$0xff] %v5881_v56  ;;  %v2080_v52 = vpop.f32.mrb[75].mxu1  ;;  %v4987_v14 = vld [vmem:[%s6747_s0 + $0x320] ss:$8 sps:$4 sm:$0xff]  }
 0x1c6   :  { %v5874_v32 = vpop.f32.mrb[90].mxu0  ;;  %v5883_v42 = vpop.f32.mrb[76].mxu1 }
 0x1c7   :  { %6870 = vst [vmem:[#allocation58_spill] sm:$0xff] %v5874_v32  ;;  %v1576_v3 = vpop.f32.mrb[91].mxu0  ;;  %6873 = vst [vmem:[#allocation61_spill] sm:$0xff] %v5883_v42  ;;  %v2085_v34 = vpop.f32.mrb[77].mxu1 }
 0x1c8   :  { %v5887_v49 = vpop.f32.mrb[78].mxu1 }
 0x1c9   :  { %1786 = vmatmul.mubr.bf16.gmra.mrb[196].mxu0 %v4984_v6  ;;  %6875 = vst [vmem:[#allocation63_spill] sm:$0xff] %v5887_v49  ;;  %v2088_v38 = vpop.f32.mrb[79].mxu1  ;;  %v4988_v6 = vld [vmem:[%s6747_s0 + $0x334] ss:$8 sps:$4 sm:$0xff]  }
 0x1ca   :  { %1793 = vmatprep.mubr.bf16.mxu0 %v4985_v22  ;;  %v5897_v52 = vpop.f32.mrb[80].mxu1 }
 0x1cb   :  { %6877 = vst [vmem:[#allocation65_spill] sm:$0xff] %v5897_v52  ;;  %v2093_v34 = vpop.f32.mrb[81].mxu1 }
 0x1cc   :  { %v5885_v28 = vpop.f32.mrb[92].mxu0  ;;  %v5899_v59 = vpop.f32.mrb[82].mxu1 }
 0x1cd   :  { %6874 = vst [vmem:[#allocation62_spill] sm:$0xff] %v5885_v28  ;;  %v1581_v32 = vpop.f32.mrb[93].mxu0  ;;  %6878 = vst [vmem:[#allocation66_spill] sm:$0xff] %v5899_v59  ;;  %v2096_v49 = vpop.f32.mrb[83].mxu1  ;;  %v4990_v28 = vld [vmem:[%s6747_s0 + $0x330] ss:$8 sps:$4 sm:$0xff]  }
 0x1ce   :  { %v5892_v3 = vpop.f32.mrb[94].mxu0  ;;  %v5901_v32 = vpop.f32.mrb[84].mxu1 }
 0x1cf   :  { %6876 = vst [vmem:[#allocation64_spill] sm:$0xff] %v5892_v3  ;;  %v1584_v22 = vpop.f32.mrb[95].mxu0  ;;  %6879 = vst [vmem:[#allocation67_spill] sm:$0xff] %v5901_v32  ;;  %v2101_v42 = vpop.f32.mrb[85].mxu1 }
 0x1d0   :  { %v5905_v38 = vpop.f32.mrb[86].mxu1 }
 0x1d1   :  { %1794 = vmatmul.mubr.bf16.gmra.mrb[200].mxu0 %v4987_v14  ;;  %6881 = vst [vmem:[#allocation69_spill] sm:$0xff] %v5905_v38  ;;  %v2104_v52 = vpop.f32.mrb[87].mxu1  ;;  %v4991_v14 = vld [vmem:[%s6747_s0 + $0x344] ss:$8 sps:$4 sm:$0xff]  }
 0x1d2   :  { %1801 = vmatprep.mubr.bf16.mxu0 %v4988_v6  ;;  %v5915_v49 = vpop.f32.mrb[88].mxu1 }
 0x1d3   :  { %6883 = vst [vmem:[#allocation71_spill] sm:$0xff] %v5915_v49  ;;  %v2109_v42 = vpop.f32.mrb[89].mxu1 }
 0x1d4   :  { %v5903_v56 = vpop.f32.mrb[96].mxu0  ;;  %v5917_v34 = vpop.f32.mrb[90].mxu1 }
 0x1d5   :  { %6880 = vst [vmem:[#allocation68_spill] sm:$0xff] %v5903_v56  ;;  %v1589_v3 = vpop.f32.mrb[97].mxu0  ;;  %6884 = vst [vmem:[#allocation72_spill] sm:$0xff] %v5917_v34  ;;  %v2112_v38 = vpop.f32.mrb[91].mxu1 }
 0x1d6   :  { %v5910_v22 = vpop.f32.mrb[98].mxu0  ;;  %v5919_v3 = vpop.f32.mrb[92].mxu1 }
 0x1d7   :  { %6882 = vst [vmem:[#allocation70_spill] sm:$0xff] %v5910_v22  ;;  %v1592_v6 = vpop.f32.mrb[99].mxu0  ;;  %6885 = vst [vmem:[#allocation73_spill] sm:$0xff] %v5919_v3  ;;  %v2117_v32 = vpop.f32.mrb[93].mxu1 }
 0x1d8   :  { %v5923_v52 = vpop.f32.mrb[94].mxu1  ;;  %v4993_v6 = vld [vmem:[%s6747_s0 + $0x340] ss:$8 sps:$4 sm:$0xff]  }
 0x1d9   :  { %1802 = vmatmul.mubr.bf16.gmra.mrb[204].mxu0 %v4990_v28  ;;  %6887 = vst [vmem:[#allocation75_spill] sm:$0xff] %v5923_v52  ;;  %v2120_v42 = vpop.f32.mrb[95].mxu1  ;;  %v4994_v28 = vld [vmem:[%s6747_s0 + $0x354] ss:$8 sps:$4 sm:$0xff]  }
 0x1da   :  { %1809 = vmatprep.mubr.bf16.mxu0 %v4991_v14  ;;  %v5935_v32 = vpop.f32.mrb[96].mxu1  ;;  %v5000_v42 = vld [vmem:[%s6747_s0 + $0x374] ss:$8 sps:$4 sm:$0xff]  }
 0x1db   :  { %6888 = vst [vmem:[#allocation76_spill] sm:$0xff] %v5935_v32  ;;  %v2125_v52 = vpop.f32.mrb[97].mxu1 }
 0x1dc   :  { %v5921_v59 = vpop.f32.mrb[100].mxu0  ;;  %v5939_v22 = vpop.f32.mrb[98].mxu1  ;;  %v4996_v52 = vld [vmem:[%s6747_s0 + $0x350] ss:$8 sps:$4 sm:$0xff]  }
 0x1dd   :  { %6886 = vst [vmem:[#allocation74_spill] sm:$0xff] %v5921_v59  ;;  %v1597_v56 = vpop.f32.mrb[101].mxu0  ;;  %6889 = vst [vmem:[#allocation77_spill] sm:$0xff] %v5939_v22 }
 0x1de   :  { %v5930_v34 = vpop.f32.mrb[102].mxu0  ;;  %v2128_v56 = vpop.f32.mrb[99].mxu1 }
 0x1df   :  { %v1600_v14 = vpop.f32.mrb[103].mxu0  ;;  %v5941_v3 = vpop.f32.mrb[100].mxu1 }
 0x1e0   :  { %v2133_v49 = vpop.f32.mrb[101].mxu1  ;;  %v6920_v53 = vmax.f32 %v5717_v44, %v5941_v3 }
 0x1e1   :  { %1810 = vmatmul.mubr.bf16.gmra.mrb[208].mxu0 %v4993_v6  ;;  %v5947_v60 = vpop.f32.mrb[102].mxu1  ;;  %v4997_v49 = vld [vmem:[%s6747_s0 + $0x364] ss:$8 sps:$4 sm:$0xff]  }
 0x1e2   :  { %1817 = vmatprep.mubr.bf16.mxu0 %v4994_v28  ;;  %v2136_v28 = vpop.f32.mrb[103].mxu1 }
 0x1e4   :  { %v5945_v59 = vpop.f32.mrb[104].mxu0 }
 0x1e5   :  { %6890 = vst [vmem:[#allocation78_spill] sm:$0xff] %v5945_v59  ;;  %v1605_v14 = vpop.f32.mrb[105].mxu0 }
 0x1e6   :  { %v5956_v56 = vpop.f32.mrb[106].mxu0  ;;  %v5963_v14 = vpop.f32.mrb[104].mxu1 }
 0x1e7   :  { %6891 = vst [vmem:[#allocation79_spill] sm:$0xff] %v5956_v56  ;;  %v1608_v22 = vpop.f32.mrb[107].mxu0  ;;  %v2141_v38 = vpop.f32.mrb[105].mxu1 }
 0x1e8   :  { %v5967_v59 = vpop.f32.mrb[106].mxu1 }
 0x1e9   :  { %1818 = vmatmul.mubr.bf16.gmra.mrb[212].mxu0 %v4996_v52 }
 0x1ea   :  { %1825 = vmatprep.mubr.bf16.mxu0 %v4997_v49  ;;  %v2144_v49 = vpop.f32.mrb[107].mxu1 }
 0x1ec   :  { %v5965_v32 = vpop.f32.mrb[108].mxu0 }
 0x1ed   :  { %6892 = vst [vmem:[#allocation80_spill] sm:$0xff] %v5965_v32  ;;  %v1613_v6 = vpop.f32.mrb[109].mxu0  ;;  %v5985_v32 = vpop.f32.mrb[108].mxu1 }
 0x1ee   :  { %v5978_v38 = vpop.f32.mrb[110].mxu0  ;;  %v2149_v12 = vpop.f32.mrb[109].mxu1  ;;  %v5003_v6 = vld [vmem:[%s6747_s0 + $0x384] ss:$8 sps:$4 sm:$0xff]  }
 0x1ef   :  { %6893 = vst [vmem:[#allocation81_spill] sm:$0xff] %v5978_v38  ;;  %v1616_v28 = vpop.f32.mrb[111].mxu0  ;;  %v5989_v56 = vpop.f32.mrb[110].mxu1 }
 0x1f1   :  { %1826 = vmatmul.mubr.bf16.gmra.mrb[216].mxu0 %v4999_v4 }
 0x1f2   :  { %1833 = vmatprep.mubr.bf16.mxu0 %v5000_v42  ;;  %v2152_v42 = vpop.f32.mrb[111].mxu1 }
 0x1f4   :  { %v5987_v22 = vpop.f32.mrb[112].mxu0 }
 0x1f5   :  { %6894 = vst [vmem:[#allocation82_spill] sm:$0xff] %v5987_v22  ;;  %v1621_v52 = vpop.f32.mrb[113].mxu0  ;;  %v6007_v22 = vpop.f32.mrb[112].mxu1 }
 0x1f6   :  { %v6000_v12 = vpop.f32.mrb[114].mxu0  ;;  %v2157_v20 = vpop.f32.mrb[113].mxu1  ;;  %v5006_v52 = vld [vmem:[%s6747_s0 + $0x394] ss:$8 sps:$4 sm:$0xff]  }
 0x1f7   :  { %6895 = vst [vmem:[#allocation83_spill] sm:$0xff] %v6000_v12  ;;  %v1624_v49 = vpop.f32.mrb[115].mxu0  ;;  %v6011_v38 = vpop.f32.mrb[114].mxu1 }
 0x1f9   :  { %1834 = vmatmul.mubr.bf16.gmra.mrb[220].mxu0 %v5002_v9 }
 0x1fa   :  { %1841 = vmatprep.mubr.bf16.mxu0 %v5003_v6  ;;  %v2160_v6 = vpop.f32.mrb[115].mxu1 }
 0x1fc   :  { %v6009_v28 = vpop.f32.mrb[116].mxu0 }
 0x1fd   :  { %6896 = vst [vmem:[#allocation84_spill] sm:$0xff] %v6009_v28  ;;  %v1629_v4 = vpop.f32.mrb[117].mxu0  ;;  %v6029_v28 = vpop.f32.mrb[116].mxu1 }
 0x1fe   :  { %v6022_v20 = vpop.f32.mrb[118].mxu0  ;;  %v2165_v31 = vpop.f32.mrb[117].mxu1  ;;  %v5009_v4 = vld [vmem:[%s6747_s0 + $0x3a4] ss:$8 sps:$4 sm:$0xff]  }
 0x1ff   :  { %6897 = vst [vmem:[#allocation85_spill] sm:$0xff] %v6022_v20  ;;  %v1632_v42 = vpop.f32.mrb[119].mxu0  ;;  %v6033_v12 = vpop.f32.mrb[118].mxu1 }
 0x201   :  { %1842 = vmatmul.mubr.bf16.gmra.mrb[224].mxu0 %v5005_v17 }
 0x202   :  { %1849 = vmatprep.mubr.bf16.mxu0 %v5006_v52  ;;  %v2168_v52 = vpop.f32.mrb[119].mxu1 }
 0x204   :  { %v6031_v49 = vpop.f32.mrb[120].mxu0 }
 0x205   :  { %6898 = vst [vmem:[#allocation86_spill] sm:$0xff] %v6031_v49  ;;  %v1637_v9 = vpop.f32.mrb[121].mxu0  ;;  %v6051_v49 = vpop.f32.mrb[120].mxu1 }
 0x206   :  { %v6044_v31 = vpop.f32.mrb[122].mxu0  ;;  %v2173_v39 = vpop.f32.mrb[121].mxu1  ;;  %v5012_v9 = vld [vmem:[%s6747_s0 + $0x3b4] ss:$8 sps:$4 sm:$0xff]  }
 0x207   :  { %6899 = vst [vmem:[#allocation87_spill] sm:$0xff] %v6044_v31  ;;  %v1640_v6 = vpop.f32.mrb[123].mxu0  ;;  %v6055_v20 = vpop.f32.mrb[122].mxu1 }
 0x209   :  { %1850 = vmatmul.mubr.bf16.gmra.mrb[228].mxu0 %v5008_v25 }
 0x20a   :  { %1857 = vmatprep.mubr.bf16.mxu0 %v5009_v4  ;;  %v2176_v4 = vpop.f32.mrb[123].mxu1 }
 0x20c   :  { %v6053_v42 = vpop.f32.mrb[124].mxu0 }
 0x20d   :  { %6900 = vst [vmem:[#allocation88_spill] sm:$0xff] %v6053_v42  ;;  %v1645_v17 = vpop.f32.mrb[125].mxu0  ;;  %v6073_v42 = vpop.f32.mrb[124].mxu1 }
 0x20e   :  { %v6066_v39 = vpop.f32.mrb[126].mxu0  ;;  %v2181_v47 = vpop.f32.mrb[125].mxu1  ;;  %v5015_v17 = vld [vmem:[%s6747_s0 + $0x3c4] ss:$8 sps:$4 sm:$0xff]  }
 0x20f   :  { %6901 = vst [vmem:[#allocation89_spill] sm:$0xff] %v6066_v39  ;;  %v1648_v52 = vpop.f32.mrb[127].mxu0  ;;  %v6077_v31 = vpop.f32.mrb[126].mxu1 }
 0x211   :  { %1858 = vmatmul.mubr.bf16.gmra.mrb[232].mxu0 %v5011_v35 }
 0x212   :  { %1865 = vmatprep.mubr.bf16.mxu0 %v5012_v9  ;;  %v2184_v9 = vpop.f32.mrb[127].mxu1 }
 0x214   :  { %v6075_v6 = vpop.f32.mrb[128].mxu0 }
 0x215   :  { %6902 = vst [vmem:[#allocation90_spill] sm:$0xff] %v6075_v6  ;;  %v1653_v25 = vpop.f32.mrb[129].mxu0  ;;  %v6095_v6 = vpop.f32.mrb[128].mxu1 }
 0x216   :  { %v6088_v47 = vpop.f32.mrb[130].mxu0  ;;  %v2189_v54 = vpop.f32.mrb[129].mxu1  ;;  %v5018_v25 = vld [vmem:[%s6747_s0 + $0x3d4] ss:$8 sps:$4 sm:$0xff]  }
 0x217   :  { %6903 = vst [vmem:[#allocation91_spill] sm:$0xff] %v6088_v47  ;;  %v1656_v4 = vpop.f32.mrb[131].mxu0  ;;  %v6099_v39 = vpop.f32.mrb[130].mxu1  ;;  %v5021_v47 = vld [vmem:[%s6747_s0 + $0x3e4] ss:$8 sps:$4 sm:$0xff]  }
 0x219   :  { %1866 = vmatmul.mubr.bf16.gmra.mrb[236].mxu0 %v5014_v43 }
 0x21a   :  { %1873 = vmatprep.mubr.bf16.mxu0 %v5015_v17  ;;  %v2192_v17 = vpop.f32.mrb[131].mxu1 }
 0x21b   :  { %v5020_v17 = vld [vmem:[%s6747_s0 + $0x3d0] ss:$8 sps:$4 sm:$0xff]  }
 0x21c   :  { %v6097_v52 = vpop.f32.mrb[132].mxu0 }
 0x21d   :  { %6904 = vst [vmem:[#allocation92_spill] sm:$0xff] %v6097_v52  ;;  %v1661_v35 = vpop.f32.mrb[133].mxu0 }
 0x21e   :  { %v6110_v54 = vpop.f32.mrb[134].mxu0  ;;  %v5023_v35 = vld [vmem:[%s6747_s0 + $0x3e0] ss:$8 sps:$4 sm:$0xff]  }
 0x21f   :  { %v1664_v9 = vpop.f32.mrb[135].mxu0 }
 0x221   :  { %1874 = vmatmul.mubr.bf16.gmra.mrb[240].mxu0 %v5017_v51  ;;  %v5026_v51 = vld [vmem:[%s6747_s0 + $0x3f0] ss:$8 sps:$4 sm:$0xff]  }
 0x222   :  { %1881 = vmatprep.mubr.bf16.mxu0 %v5018_v25 }
 0x224   :  { %v6117_v52 = vpop.f32.mrb[136].mxu0 }
 0x225   :  { %6905 = vst [vmem:[#allocation93_spill] sm:$0xff] %v6117_v52  ;;  %v1669_v61 = vpop.f32.mrb[137].mxu0 }
 0x226   :  { %v6124_v43 = vpop.f32.mrb[138].mxu0 }
 0x227   :  { %v1672_v25 = vpop.f32.mrb[139].mxu0 }
 0x229   :  { %1882 = vmatmul.mubr.bf16.gmra.mrb[244].mxu0 %v5020_v17 }
 0x22a   :  { %1889 = vmatprep.mubr.bf16.mxu0 %v5021_v47 }
 0x22c   :  { %v6131_v9 = vpop.f32.mrb[140].mxu0 }
 0x22d   :  { %6906 = vst [vmem:[#allocation94_spill] sm:$0xff] %v6131_v9  ;;  %v1677_v4 = vpop.f32.mrb[141].mxu0 }
 0x22e   :  { %v6138_v52 = vpop.f32.mrb[142].mxu0 }
 0x22f   :  { %v1680_v47 = vpop.f32.mrb[143].mxu0 }
 0x230   :  { %v6909_v47 = vmov 0.0  }
 0x231   :  { %1890 = vmatmul.mubr.bf16.gmra.mrb[248].mxu0 %v5023_v35  ;;  %4496 = vmatprep.mubr.msk.bf16.mxu1 %vm5078_vm0, %v6909_v47 }
 0x232   :  { %1897 = vmatprep.mubr.bf16.mxu0 %v5024_v5 }
 0x234   :  { %v6145_v25 = vpop.f32.mrb[144].mxu0 }
 0x235   :  { %6907 = vst [vmem:[#allocation95_spill] sm:$0xff] %v6145_v25  ;;  %v1685_v61 = vpop.f32.mrb[145].mxu0  ;;  %v5027_v25 = vld [vmem:[%s6747_s0 + $0x400] ss:$8 sps:$4 sm:$0xff]  }
 0x236   :  { %v6152_v9 = vpop.f32.mrb[146].mxu0 }
 0x237   :  { %6908 = vst [vmem:[#allocation96_spill] sm:$0xff] %v6152_v9  ;;  %v1688_v5 = vpop.f32.mrb[147].mxu0  ;;  %v5035_v9 = vld [vmem:[%s6747_s0 + $0x424] ss:$8 sps:$4 sm:$0xff]  }
 0x238   :  { %v5032_v5 = vld [vmem:[%s6747_s0 + $0x414] ss:$8 sps:$4 sm:$0xff]  }
 0x239   :  { %1898 = vmatmul.mubr.bf16.gmra.mrb[252].mxu0 %v5026_v51  ;;  %v5033_v51 = vld [vmem:[%s6747_s0 + $0x420] ss:$8 sps:$4 sm:$0xff]  }
 0x23a   :  { %1905 = vmatprep.mubr.bf16.mxu0 %v5029_v13 }
 0x23c   :  { %v6161_v61 = vpop.f32.mrb[148].mxu0 }
 0x23d   :  { %6910 = vst [vmem:[#allocation97_spill] sm:$0xff] %v6161_v61  ;;  %v1693_v17 = vpop.f32.mrb[149].mxu0  ;;  %v5030_v61 = vld [vmem:[%s6747_s0 + $0x410] ss:$8 sps:$4 sm:$0xff]  }
 0x23e   :  { %v6168_v21 = vpop.f32.mrb[150].mxu0 }
 0x23f   :  { %6911 = vst [vmem:[#allocation98_spill] sm:$0xff] %v6168_v21  ;;  %v1696_v13 = vpop.f32.mrb[151].mxu0 }
 0x241   :  { %1906 = vmatmul.mubr.bf16.gmra.mrb[0].mxu0 %v5027_v25 }
 0x242   :  { %1913 = vmatprep.mubr.bf16.mxu0 %v5032_v5 }
 0x244   :  { %v6175_v35 = vpop.f32.mrb[152].mxu0 }
 0x245   :  { %6912 = vst [vmem:[#allocation99_spill] sm:$0xff] %v6175_v35  ;;  %v1701_v4 = vpop.f32.mrb[153].mxu0 }
 0x246   :  { %v6182_v29 = vpop.f32.mrb[154].mxu0 }
 0x247   :  { %6913 = vst [vmem:[#allocation100_spill] sm:$0xff] %v6182_v29  ;;  %v1704_v5 = vpop.f32.mrb[155].mxu0 }
 0x249   :  { %1914 = vmatmul.mubr.bf16.gmra.mrb[4].mxu0 %v5030_v61 }
 0x24a   :  { %1921 = vmatprep.mubr.bf16.mxu0 %v5035_v9 }
 0x24c   :  { %v6189_v13 = vpop.f32.mrb[156].mxu0 }
 0x24d   :  { %6914 = vst [vmem:[#allocation101_spill] sm:$0xff] %v6189_v13  ;;  %v1709_v17 = vpop.f32.mrb[157].mxu0 }
 0x24e   :  { %v6196_v35 = vpop.f32.mrb[158].mxu0 }
 0x24f   :  { %6915 = vst [vmem:[#allocation102_spill] sm:$0xff] %v6196_v35  ;;  %v1712_v21 = vpop.f32.mrb[159].mxu0 }
 0x251   :  { %1922 = vmatmul.mubr.bf16.gmra.mrb[8].mxu0 %v5033_v51 }
 0x254   :  { %v6200_v5 = vpop.f32.mrb[160].mxu0 }
 0x255   :  { %6916 = vst [vmem:[#allocation103_spill] sm:$0xff] %v6200_v5  ;;  %v1717_v61 = vpop.f32.mrb[161].mxu0 }
 0x256   :  { %v6204_v25 = vpop.f32.mrb[162].mxu0 }
 0x257   :  { %6917 = vst [vmem:[#allocation104_spill] sm:$0xff] %v6204_v25  ;;  %v1720_v4 = vpop.f32.mrb[163].mxu0 }
 0x258   :  { %v6220_v4 = vld [vmem:[%s6749_s2] ss:$0 sm:$0xff] }
 0x25c   :  { %v6208_v13 = vpop.f32.mrb[164].mxu0 }
 0x25d   :  { %6918 = vst [vmem:[#allocation105_spill] sm:$0xff] %v6208_v13  ;;  %v1725_v37 = vpop.f32.mrb[165].mxu0  ;;  %v6921_v13 = vld [vmem:[#allocation28_spill] sm:$0xff] }
 0x25e   :  { %v6212_v21 = vpop.f32.mrb[166].mxu0 }
 0x25f   :  { %6919 = vst [vmem:[#allocation106_spill] sm:$0xff] %v6212_v21  ;;  %v1728_v35 = vpop.f32.mrb[167].mxu0 }
 0x260   :  { %v6922_v35 = vmax.f32 %v5719_v48, %v5947_v60  ;;  %v6926_v48 = vmax.f32 %v5725_v55, %v5967_v59  ;;  %v6930_v59 = vmax.f32 %v5737_v7, %v5989_v56  ;;  %v6934_v56 = vmax.f32 %v5743_v18, %v6011_v38 }
 0x261   :  { %v6938_v38 = vmax.f32 %v5755_v36, %v6033_v12  ;;  %v6942_v12 = vmax.f32 %v5761_v46, %v6055_v20  ;;  %v6946_v20 = vmax.f32 %v5773_v10, %v6077_v31  ;;  %v6950_v31 = vmax.f32 %v5779_v27, %v6099_v39 }
 0x262   :  { %v6956_v39 = vmax.f32 %v5541_v1, %v5930_v34  ;;  %v6962_v34 = vld [vmem:[#allocation4_spill] sm:$0xff] }
 0x264   :  { %v1731_v9 = vpop.f32.mrb[168].mxu0 }
 0x265   :  { %v2228_v61 = vmax.f32 %v5777_v23, %v1731_v9  ;;  %v1733_v5 = vpop.f32.mrb[169].mxu0 }
 0x266   :  { %v1734_v17 = vpop.f32.mrb[170].mxu0 }
 0x267   :  { %v2328_v37 = vmax.f32 %v2228_v61, %v6920_v53  ;;  %v2229_v45 = vmax.f32 %v6921_v13, %v1734_v17  ;;  %v1736_v25 = vpop.f32.mrb[171].mxu0  ;;  %v6924_v53 = vmax.f32 %v5721_v50, %v5963_v14  ;;  %v6929_v14 = vld [vmem:[#allocation40_spill] sm:$0xff] }
 0x268   :  { %v6925_v25 = vld [vmem:[#allocation34_spill] sm:$0xff] }
 0x269   :  { %v2385_v51 = vadd.f32 %v6220_v4, %v2328_v37  ;;  %v2329_v23 = vmax.f32 %v2229_v45, %v6922_v35 }
 0x26b   :  { %v2386_v5 = vadd.f32 %v6220_v4, %v2329_v23  ;;  %v2435_v21 = vmax.f32 %v2385_v51, 0.0 }
 0x26c   :  { %v1739_v9 = vpop.f32.mrb[172].mxu0 }
 0x26d   :  { %v2436_v58 = vmax.f32 %v2386_v5, 0.0  ;;  %v2230_v15 = vmax.f32 %v6923_v26, %v1739_v9  ;;  %v1741_v62 = vpop.f32.mrb[173].mxu0 }
 0x26e   :  { %v1742_v29 = vpop.f32.mrb[174].mxu0 }
 0x26f   :  { %v6232_v44 = vpack.c.bf16 %v2436_v58, %v2435_v21  ;;  %v2330_v3 = vmax.f32 %v2230_v15, %v6924_v53  ;;  %v2231_v13 = vmax.f32 %v6925_v25, %v1742_v29  ;;  %v1744_v17 = vpop.f32.mrb[175].mxu0  ;;  %v6927_v58 = vld [vmem:[#allocation38_spill] sm:$0xff]  ;;  %v6928_v29 = vmax.f32 %v5735_v2, %v5985_v32 }
 0x270   :  { %v6931_v17 = vld [vmem:[#allocation44_spill] sm:$0xff]  ;;  %v6932_v32 = vmax.f32 %v5739_v11, %v6007_v22  ;;  %v6936_v22 = vmax.f32 %v5753_v30, %v6029_v28  ;;  %v6940_v28 = vmax.f32 %v5757_v40, %v6051_v49  ;;  %v6944_v49 = vmax.f32 %v5771_v63, %v6073_v42 }
 0x271   :  { %v2387_v60 = vadd.f32 %v6220_v4, %v2330_v3  ;;  %v2331_v45 = vmax.f32 %v2231_v13, %v6926_v48  ;;  %v6948_v42 = vmax.f32 %v5775_v19, %v6095_v6  ;;  %v6952_v6 = vld [vmem:[#allocation2_spill] sm:$0xff] }
 0x273   :  { %v2388_v51 = vadd.f32 %v6220_v4, %v2331_v45  ;;  %v2437_v62 = vmax.f32 %v2387_v60, 0.0 }
 0x274   :  { %v1747_v26 = vpop.f32.mrb[176].mxu0 }
 0x275   :  { %v2438_v61 = vmax.f32 %v2388_v51, 0.0  ;;  %v2232_v21 = vmax.f32 %v6927_v58, %v1747_v26  ;;  %v1749_v37 = vpop.f32.mrb[177].mxu0  ;;  %v6933_v26 = vld [vmem:[#allocation46_spill] sm:$0xff] }
 0x276   :  { %v1750_v35 = vpop.f32.mrb[178].mxu0 }
 0x277   :  { %v6244_v50 = vpack.c.bf16 %v2438_v61, %v2437_v62  ;;  %v2332_v15 = vmax.f32 %v2232_v21, %v6928_v29  ;;  %v2233_v23 = vmax.f32 %v6929_v14, %v1750_v35  ;;  %v1752_v5 = vpop.f32.mrb[179].mxu0 }
 0x279   :  { %v2389_v55 = vadd.f32 %v6220_v4, %v2332_v15  ;;  %v2333_v9 = vmax.f32 %v2233_v23, %v6930_v59  ;;  %v6935_v15 = vld [vmem:[#allocation50_spill] sm:$0xff]  ;;  %v6937_v59 = vld [vmem:[#allocation52_spill] sm:$0xff] }
 0x27b   :  { %v2390_v53 = vadd.f32 %v6220_v4, %v2333_v9  ;;  %v2439_v25 = vmax.f32 %v2389_v55, 0.0 }
 0x27c   :  { %v1755_v3 = vpop.f32.mrb[180].mxu0 }
 0x27d   :  { %v2440_v13 = vmax.f32 %v2390_v53, 0.0  ;;  %v2234_v60 = vmax.f32 %v6931_v17, %v1755_v3  ;;  %v1757_v48 = vpop.f32.mrb[181].mxu0 }
 0x27e   :  { %v1758_v45 = vpop.f32.mrb[182].mxu0  ;;  %v6939_v48 = vld [vmem:[#allocation56_spill] sm:$0xff] }
 0x27f   :  { %v6256_v2 = vpack.c.bf16 %v2440_v13, %v2439_v25  ;;  %v2334_v51 = vmax.f32 %v2234_v60, %v6932_v32  ;;  %v2235_v62 = vmax.f32 %v6933_v26, %v1758_v45  ;;  %v1760_v61 = vpop.f32.mrb[183].mxu0 }
 0x281   :  { %v2391_v7 = vadd.f32 %v6220_v4, %v2334_v51  ;;  %v2335_v58 = vmax.f32 %v2235_v62, %v6934_v56  ;;  %v6941_v62 = vld [vmem:[#allocation58_spill] sm:$0xff] }
 0x283   :  { %v2392_v21 = vadd.f32 %v6220_v4, %v2335_v58  ;;  %v2441_v35 = vmax.f32 %v2391_v7, 0.0 }
 0x284   :  { %v1763_v37 = vpop.f32.mrb[184].mxu0 }
 0x285   :  { %v2442_v29 = vmax.f32 %v2392_v21, 0.0  ;;  %v2236_v14 = vmax.f32 %v6935_v15, %v1763_v37  ;;  %v1765_v23 = vpop.f32.mrb[185].mxu0 }
 0x286   :  { %v1766_v5 = vpop.f32.mrb[186].mxu0 }
 0x287   :  { %v6268_v11 = vpack.c.bf16 %v2442_v29, %v2441_v35  ;;  %v2336_v55 = vmax.f32 %v2236_v14, %v6936_v22  ;;  %v2237_v9 = vmax.f32 %v6937_v59, %v1766_v5  ;;  %v1768_v53 = vpop.f32.mrb[187].mxu0  ;;  %v6943_v29 = vld [vmem:[#allocation62_spill] sm:$0xff]  ;;  %v6945_v22 = vld [vmem:[#allocation64_spill] sm:$0xff] }
 0x289   :  { %v2393_v18 = vadd.f32 %v6220_v4, %v2336_v55  ;;  %v2337_v3 = vmax.f32 %v2237_v9, %v6938_v38 }
 0x28b   :  { %v2394_v25 = vadd.f32 %v6220_v4, %v2337_v3  ;;  %v2443_v17 = vmax.f32 %v2393_v18, 0.0 }
 0x28c   :  { %v1771_v13 = vpop.f32.mrb[188].mxu0 }
 0x28d   :  { %v2444_v60 = vmax.f32 %v2394_v25, 0.0  ;;  %v2238_v45 = vmax.f32 %v6939_v48, %v1771_v13  ;;  %v1773_v32 = vpop.f32.mrb[189].mxu0  ;;  %v6947_v25 = vld [vmem:[#allocation68_spill] sm:$0xff] }
 0x28e   :  { %v1774_v51 = vpop.f32.mrb[190].mxu0 }
 0x28f   :  { %v6280_v30 = vpack.c.bf16 %v2444_v60, %v2443_v17  ;;  %v2338_v26 = vmax.f32 %v2238_v45, %v6940_v28  ;;  %v2239_v61 = vmax.f32 %v6941_v62, %v1774_v51  ;;  %v1776_v7 = vpop.f32.mrb[191].mxu0  ;;  %v6949_v45 = vld [vmem:[#allocation70_spill] sm:$0xff] }
 0x291   :  { %v2395_v36 = vadd.f32 %v6220_v4, %v2338_v26  ;;  %v2339_v56 = vmax.f32 %v2239_v61, %v6942_v12 }
 0x293   :  { %v2396_v58 = vadd.f32 %v6220_v4, %v2339_v56  ;;  %v2445_v37 = vmax.f32 %v2395_v36, 0.0  ;;  %v6951_v36 = vld [vmem:[#allocation29_spill] sm:$0xff] }
 0x294   :  { %v1779_v21 = vpop.f32.mrb[192].mxu0 }
 0x295   :  { %v2446_v35 = vmax.f32 %v2396_v58, 0.0  ;;  %v2240_v15 = vmax.f32 %v6943_v29, %v1779_v21  ;;  %v1781_v14 = vpop.f32.mrb[193].mxu0  ;;  %v6953_v21 = vld [vmem:[#allocation74_spill] sm:$0xff] }
 0x296   :  { %v1782_v23 = vpop.f32.mrb[194].mxu0  ;;  %v6955_v29 = vld [vmem:[#allocation30_spill] sm:$0xff] }
 0x297   :  { %v6292_v40 = vpack.c.bf16 %v2446_v35, %v2445_v37  ;;  %v2340_v5 = vmax.f32 %v2240_v15, %v6944_v49  ;;  %v2241_v55 = vmax.f32 %v6945_v22, %v1782_v23  ;;  %v1784_v59 = vpop.f32.mrb[195].mxu0  ;;  %v6954_v37 = vmax.f32 %v6952_v6, %v6953_v21  ;;  %v6969_v21 = vld [vmem:[#allocation36_spill] sm:$0xff] }
 0x298   :  { %v6957_v59 = vld [vmem:[#allocation31_spill] sm:$0xff] }
 0x299   :  { %v2397_v46 = vadd.f32 %v6220_v4, %v2340_v5  ;;  %v2341_v9 = vmax.f32 %v2241_v55, %v6946_v20 }
 0x29b   :  { %v2398_v53 = vadd.f32 %v6220_v4, %v2341_v9  ;;  %v2447_v38 = vmax.f32 %v2397_v46, 0.0 }
 0x29c   :  { %v1787_v18 = vpop.f32.mrb[196].mxu0 }
 0x29d   :  { %v2448_v3 = vmax.f32 %v2398_v53, 0.0  ;;  %v2242_v13 = vmax.f32 %v6947_v25, %v1787_v18  ;;  %v1789_v17 = vpop.f32.mrb[197].mxu0  ;;  %v6958_v18 = vld [vmem:[#allocation3_spill] sm:$0xff] }
 0x29e   :  { %v1790_v60 = vpop.f32.mrb[198].mxu0 }
 0x29f   :  { %v6304_v63 = vpack.c.bf16 %v2448_v3, %v2447_v38  ;;  %v2342_v48 = vmax.f32 %v2242_v13, %v6948_v42  ;;  %v2243_v32 = vmax.f32 %v6949_v45, %v1790_v60  ;;  %v1792_v51 = vpop.f32.mrb[199].mxu0  ;;  %v6959_v38 = vld [vmem:[#allocation78_spill] sm:$0xff]  ;;  %v6961_v13 = vld [vmem:[#allocation33_spill] sm:$0xff]  ;;  %v6963_v42 = vld [vmem:[#allocation79_spill] sm:$0xff] }
 0x2a0   :  { %v6960_v3 = vmax.f32 %v6958_v18, %v6959_v38  ;;  %v6974_v38 = vld [vmem:[#allocation7_spill] sm:$0xff] }
 0x2a1   :  { %v2399_v10 = vadd.f32 %v6220_v4, %v2342_v48  ;;  %v2343_v28 = vmax.f32 %v2243_v32, %v6950_v31  ;;  %v6964_v48 = vmax.f32 %v6962_v34, %v6963_v42  ;;  %v6978_v42 = vld [vmem:[#allocation8_spill] sm:$0xff] }
 0x2a3   :  { %v2400_v26 = vadd.f32 %v6220_v4, %v2343_v28  ;;  %v2449_v61 = vmax.f32 %v2399_v10, 0.0  ;;  %v6965_v28 = vld [vmem:[#allocation35_spill] sm:$0xff] }
 0x2a4   :  { %v1795_v62 = vpop.f32.mrb[200].mxu0 }
 0x2a5   :  { %v2450_v7 = vmax.f32 %v2400_v26, 0.0  ;;  %v2244_v12 = vmax.f32 %v1795_v62, %v6951_v36  ;;  %v1797_v56 = vpop.f32.mrb[201].mxu0 }
 0x2a6   :  { %v1798_v58 = vpop.f32.mrb[202].mxu0  ;;  %v6967_v56 = vld [vmem:[#allocation80_spill] sm:$0xff] }
 0x2a7   :  { %v6316_v19 = vpack.c.bf16 %v2450_v7, %v2449_v61  ;;  %v2294_v35 = vmax.f32 %v6954_v37, %v2244_v12  ;;  %v2245_v15 = vmax.f32 %v1798_v58, %v6955_v29  ;;  %v1800_v14 = vpop.f32.mrb[203].mxu0  ;;  %v5036_v7 = vld [vmem:[%s6748_s3] sm:$0xff]   ;;  %v6966_v12 = vld [vmem:[#allocation5_spill] sm:$0xff] }
 0x2a8   :  { %v6968_v58 = vmax.f32 %v6966_v12, %v6967_v56  ;;  %v6971_v14 = vld [vmem:[#allocation81_spill] sm:$0xff]  ;;  %v6983_v56 = vld [vmem:[#allocation84_spill] sm:$0xff] }
 0x2a9   :  { %v2351_v27 = vadd.f32 %v6220_v4, %v2294_v35  ;;  %v2295_v23 = vmax.f32 %v6956_v39, %v2245_v15  ;;  %v6970_v15 = vld [vmem:[#allocation6_spill] sm:$0xff]  ;;  %v6982_v12 = vld [vmem:[#allocation9_spill] sm:$0xff] }
 0x2ab   :  { %v2352_v49 = vadd.f32 %v6220_v4, %v2295_v23  ;;  %v2401_v22 = vmax.f32 %v2351_v27, 0.0  ;;  %v6972_v27 = vmax.f32 %v6970_v15, %v6971_v14  ;;  %v6986_v15 = vld [vmem:[#allocation10_spill] sm:$0xff]  ;;  %v6987_v14 = vld [vmem:[#allocation85_spill] sm:$0xff] }
 0x2ac   :  { %v1803_v5 = vpop.f32.mrb[204].mxu0 }
 0x2ad   :  { %v2402_v55 = vmax.f32 %v2352_v49, 0.0  ;;  %v2246_v46 = vmax.f32 %v1803_v5, %v6957_v59  ;;  %v1805_v20 = vpop.f32.mrb[205].mxu0 }
 0x2ae   :  { %v1806_v9 = vpop.f32.mrb[206].mxu0 }
 0x2af   :  { %v2451_v53 = vpack.c.bf16 %v2402_v55, %v2401_v22  ;;  %v2296_v25 = vmax.f32 %v6960_v3, %v2246_v46  ;;  %v2247_v17 = vmax.f32 %v1806_v9, %v6961_v13  ;;  %v1808_v60 = vpop.f32.mrb[207].mxu0  ;;  %v6973_v55 = vld [vmem:[#allocation37_spill] sm:$0xff]  ;;  %v5037_v9 = vld [vmem:[%s6748_s3 + $0x10] sm:$0xff]   ;;  %v6975_v3 = vld [vmem:[#allocation82_spill] sm:$0xff] }
 0x2b1   :  { %v2353_v1 = vadd.f32 %v6220_v4, %v2296_v25  ;;  %v2297_v45 = vmax.f32 %v6964_v48, %v2247_v17  ;;  %v6976_v25 = vmax.f32 %v6974_v38, %v6975_v3  ;;  %v6977_v17 = vld [vmem:[#allocation39_spill] sm:$0xff]  ;;  %v6991_v3 = vld [vmem:[#allocation86_spill] sm:$0xff] }
 0x2b2   :  { %v6979_v48 = vld [vmem:[#allocation83_spill] sm:$0xff] }
 0x2b3   :  { %v2354_v32 = vadd.f32 %v6220_v4, %v2297_v45  ;;  %v2403_v10 = vmax.f32 %v2353_v1, 0.0  ;;  %v6980_v45 = vmax.f32 %v6978_v42, %v6979_v48  ;;  %v6990_v38 = vld [vmem:[#allocation11_spill] sm:$0xff]  ;;  %v6994_v42 = vld [vmem:[#allocation12_spill] sm:$0xff] }
 0x2b4   :  { %v1811_v51 = vpop.f32.mrb[208].mxu0  ;;  %v6995_v48 = vld [vmem:[#allocation87_spill] sm:$0xff] }
 0x2b5   :  { %v2404_v31 = vmax.f32 %v2354_v32, 0.0  ;;  %v2248_v26 = vmax.f32 %v1811_v51, %v6965_v28  ;;  %v1813_v62 = vpop.f32.mrb[209].mxu0 }
 0x2b6   :  { %v1814_v61 = vpop.f32.mrb[210].mxu0 }
 0x2b7   :  { %v2452_v36 = vpack.c.bf16 %v2404_v31, %v2403_v10  ;;  %v2298_v6 = vmax.f32 %v6968_v58, %v2248_v26  ;;  %v2249_v37 = vmax.f32 %v1814_v61, %v6969_v21  ;;  %v1816_v35 = vpop.f32.mrb[211].mxu0  ;;  %v6981_v26 = vld [vmem:[#allocation41_spill] sm:$0xff]  ;;  %v6984_v58 = vmax.f32 %v6982_v12, %v6983_v56  ;;  %v6985_v21 = vld [vmem:[#allocation42_spill] sm:$0xff]  ;;  %v6999_v56 = vld [vmem:[#allocation88_spill] sm:$0xff] }
 0x2b8   :  { %v6998_v12 = vld [vmem:[#allocation13_spill] sm:$0xff] }
 0x2b9   :  { %v2355_v29 = vadd.f32 %v6220_v4, %v2298_v6  ;;  %v2299_v39 = vmax.f32 %v6972_v27, %v2249_v37  ;;  %4497 = vmatmul.mubr.msk.bf16.vlgmr.msra.gmra.mrb[132].mxu1 %vm2487_vm1, %v2452_v36  ;;  %v5038_v36 = vld [vmem:[%s6748_s3 + $0x18] sm:$0xff]   ;;  %v6988_v27 = vmax.f32 %v6986_v15, %v6987_v14  ;;  %v7002_v15 = vld [vmem:[#allocation14_spill] sm:$0xff] }
 0x2ba   :  { %4501 = vmatpush3.bf16.msra.mxu1 %v5036_v7  ;;  %4502 = vmatprep.mubr.msk.bf16.mxu1 %vm5078_vm0, %v6909_v47  ;;  %v7003_v14 = vld [vmem:[#allocation89_spill] sm:$0xff] }
 0x2bb   :  { %v2356_v23 = vadd.f32 %v6220_v4, %v2299_v39  ;;  %4506 = vmatprep.subr.bf16.mxu1 %v6909_v47  ;;  %v2405_v5 = vmax.f32 %v2355_v29, 0.0 }
 0x2bc   :  { %v1819_v49 = vpop.f32.mrb[212].mxu0 }
 0x2bd   :  { %v2406_v22 = vmax.f32 %v2356_v23, 0.0  ;;  %v2250_v59 = vmax.f32 %v1819_v49, %v6973_v55  ;;  %v1821_v46 = vpop.f32.mrb[213].mxu0  ;;  %v6989_v55 = vld [vmem:[#allocation43_spill] sm:$0xff] }
 0x2be   :  { %v1822_v20 = vpop.f32.mrb[214].mxu0 }
 0x2bf   :  { %v2453_v18 = vpack.c.bf16 %v2406_v22, %v2405_v5  ;;  %v2300_v13 = vmax.f32 %v6976_v25, %v2250_v59  ;;  %v2251_v60 = vmax.f32 %v1822_v20, %v6977_v17  ;;  %v1824_v1 = vpop.f32.mrb[215].mxu0  ;;  %v6992_v25 = vmax.f32 %v6990_v38, %v6991_v3  ;;  %v6993_v17 = vld [vmem:[#allocation45_spill] sm:$0xff]  ;;  %v7006_v38 = vld [vmem:[#allocation15_spill] sm:$0xff]  ;;  %v7007_v3 = vld [vmem:[#allocation90_spill] sm:$0xff] }
 0x2c1   :  { %v2357_v34 = vadd.f32 %v6220_v4, %v2300_v13  ;;  %v2301_v32 = vmax.f32 %v6980_v45, %v2251_v60  ;;  %4503 = vmatmul.mubr.msk.bf16.vlgmr.msra.gmra.mrb[136].mxu1 %vm2487_vm1, %v2451_v53  ;;  %v6996_v45 = vmax.f32 %v6994_v42, %v6995_v48  ;;  %v7010_v42 = vld [vmem:[#allocation91_spill] sm:$0xff] }
 0x2c2   :  { %4507 = vmatpush3.bf16.msra.mxu1 %v5037_v9  ;;  %4508 = vmatprep.mubr.msk.bf16.mxu1 %vm5078_vm0, %v6909_v47  ;;  %v5039_v9 = vld [vmem:[%s6748_s3 + $0x20] sm:$0xff]   ;;  %v7011_v48 = vmax.f32 %v5652_v57, %v7010_v42  ;;  %v5042_v57 = vld [vmem:[%s6748_s3 + $0x38] sm:$0xff]   ;;  %v7024_v42 = vld [vmem:[#allocation59_spill] sm:$0xff] }
 0x2c3   :  { %v2358_v51 = vadd.f32 %v6220_v4, %v2301_v32  ;;  %4512 = vmatprep.subr.bf16.mxu1 %v6909_v47  ;;  %v2407_v31 = vmax.f32 %v2357_v34, 0.0 }
 0x2c4   :  { %v1827_v10 = vpop.f32.mrb[216].mxu0 }
 0x2c5   :  { %v2408_v28 = vmax.f32 %v2358_v51, 0.0  ;;  %v2252_v62 = vmax.f32 %v1827_v10, %v6981_v26  ;;  %v1829_v61 = vpop.f32.mrb[217].mxu0  ;;  %v6997_v26 = vld [vmem:[#allocation47_spill] sm:$0xff] }
 0x2c6   :  { %v1830_v7 = vpop.f32.mrb[218].mxu0 }
 0x2c7   :  { %v2454_v53 = vpack.c.bf16 %v2408_v28, %v2407_v31  ;;  %v2302_v6 = vmax.f32 %v6984_v58, %v2252_v62  ;;  %v2253_v37 = vmax.f32 %v1830_v7, %v6985_v21  ;;  %v1832_v35 = vpop.f32.mrb[219].mxu0  ;;  %v7000_v58 = vmax.f32 %v6998_v12, %v6999_v56  ;;  %v7001_v21 = vld [vmem:[#allocation48_spill] sm:$0xff] }
 0x2c9   :  { %v2359_v29 = vadd.f32 %v6220_v4, %v2302_v6  ;;  %v2303_v39 = vmax.f32 %v6988_v27, %v2253_v37  ;;  %4509 = vmatmul.mubr.msk.bf16.vlgmr.msra.gmra.mrb[140].mxu1 %vm2487_vm1, %v2453_v18  ;;  %v7004_v27 = vmax.f32 %v7002_v15, %v7003_v14 }
 0x2ca   :  { %4513 = vmatpush3.bf16.msra.mxu1 %v5038_v36  ;;  %4514 = vmatprep.mubr.msk.bf16.mxu1 %vm5078_vm0, %v6909_v47  ;;  %v5040_v36 = vld [vmem:[%s6748_s3 + $0x28] sm:$0xff]  }
 0x2cb   :  { %v2360_v23 = vadd.f32 %v6220_v4, %v2303_v39  ;;  %4518 = vmatprep.subr.bf16.mxu1 %v6909_v47  ;;  %v2409_v5 = vmax.f32 %v2359_v29, 0.0 }
 0x2cc   :  { %v1835_v49 = vpop.f32.mrb[220].mxu0 }
 0x2cd   :  { %v2410_v22 = vmax.f32 %v2360_v23, 0.0  ;;  %v2254_v59 = vmax.f32 %v1835_v49, %v6989_v55  ;;  %v1837_v46 = vpop.f32.mrb[221].mxu0  ;;  %v7005_v55 = vld [vmem:[#allocation49_spill] sm:$0xff] }
 0x2ce   :  { %v1838_v20 = vpop.f32.mrb[222].mxu0 }
 0x2cf   :  { %v2455_v18 = vpack.c.bf16 %v2410_v22, %v2409_v5  ;;  %v2304_v13 = vmax.f32 %v6992_v25, %v2254_v59  ;;  %v2255_v60 = vmax.f32 %v1838_v20, %v6993_v17  ;;  %v1840_v1 = vpop.f32.mrb[223].mxu0  ;;  %v7008_v25 = vmax.f32 %v7006_v38, %v7007_v3  ;;  %v7009_v17 = vld [vmem:[#allocation51_spill] sm:$0xff] }
 0x2d1   :  { %v2361_v34 = vadd.f32 %v6220_v4, %v2304_v13  ;;  %v2305_v32 = vmax.f32 %v6996_v45, %v2255_v60  ;;  %4515 = vmatmul.mubr.msk.bf16.vlgmr.msra.gmra.mrb[144].mxu1 %vm2487_vm1, %v2454_v53 }
 0x2d2   :  { %4519 = vmatpush3.bf16.msra.mxu1 %v5039_v9  ;;  %4520 = vmatprep.mubr.msk.bf16.mxu1 %vm5078_vm0, %v6909_v47  ;;  %v5041_v9 = vld [vmem:[%s6748_s3 + $0x30] sm:$0xff]  }
 0x2d3   :  { %v2362_v51 = vadd.f32 %v6220_v4, %v2305_v32  ;;  %4524 = vmatprep.subr.bf16.mxu1 %v6909_v47  ;;  %v2411_v31 = vmax.f32 %v2361_v34, 0.0 }
 0x2d4   :  { %v1843_v10 = vpop.f32.mrb[224].mxu0 }
 0x2d5   :  { %v2412_v28 = vmax.f32 %v2362_v51, 0.0  ;;  %v2256_v62 = vmax.f32 %v1843_v10, %v6997_v26  ;;  %v1845_v61 = vpop.f32.mrb[225].mxu0 }
 0x2d6   :  { %v1846_v7 = vpop.f32.mrb[226].mxu0 }
 0x2d7   :  { %v2456_v53 = vpack.c.bf16 %v2412_v28, %v2411_v31  ;;  %v2306_v6 = vmax.f32 %v7000_v58, %v2256_v62  ;;  %v2257_v37 = vmax.f32 %v1846_v7, %v7001_v21  ;;  %v1848_v35 = vpop.f32.mrb[227].mxu0  ;;  %v7012_v28 = vld [vmem:[#allocation53_spill] sm:$0xff]  ;;  %v7016_v58 = vld [vmem:[#allocation54_spill] sm:$0xff] }
 0x2d8   :  { %v7017_v35 = vmax.f32 %v5662_v0, %v6110_v54  ;;  %v5043_v0 = vld [vmem:[%s6748_s3 + $0x40] sm:$0xff]  }
 0x2d9   :  { %v2363_v29 = vadd.f32 %v6220_v4, %v2306_v6  ;;  %v2307_v39 = vmax.f32 %v7004_v27, %v2257_v37  ;;  %4521 = vmatmul.mubr.msk.bf16.vlgmr.msra.gmra.mrb[148].mxu1 %vm2487_vm1, %v2455_v18 }
 0x2da   :  { %4525 = vmatpush3.bf16.msra.mxu1 %v5040_v36  ;;  %4526 = vmatprep.mubr.msk.bf16.mxu1 %vm5078_vm0, %v6909_v47  ;;  %v7013_v36 = vld [vmem:[#allocation16_spill] sm:$0xff] }
 0x2db   :  { %v2364_v23 = vadd.f32 %v6220_v4, %v2307_v39  ;;  %4530 = vmatprep.subr.bf16.mxu1 %v6909_v47  ;;  %v2413_v5 = vmax.f32 %v2363_v29, 0.0 }
 0x2dc   :  { %v1851_v49 = vpop.f32.mrb[228].mxu0 }
 0x2dd   :  { %v2414_v22 = vmax.f32 %v2364_v23, 0.0  ;;  %v2258_v59 = vmax.f32 %v1851_v49, %v7005_v55  ;;  %v1853_v46 = vpop.f32.mrb[229].mxu0  ;;  %v7018_v23 = vld [vmem:[#allocation55_spill] sm:$0xff]  ;;  %v7019_v55 = vld [vmem:[#allocation17_spill] sm:$0xff] }
 0x2de   :  { %v1854_v20 = vpop.f32.mrb[230].mxu0 }
 0x2df   :  { %v2457_v18 = vpack.c.bf16 %v2414_v22, %v2413_v5  ;;  %v2308_v13 = vmax.f32 %v7008_v25, %v2258_v59  ;;  %v2259_v60 = vmax.f32 %v1854_v20, %v7009_v17  ;;  %v1856_v1 = vpop.f32.mrb[231].mxu0  ;;  %v7020_v59 = vld [vmem:[#allocation93_spill] sm:$0xff]  ;;  %v7023_v25 = vmax.f32 %v5672_v8, %v6124_v43  ;;  %v5044_v8 = vld [vmem:[%s6748_s3 + $0x48] sm:$0xff]  }
 0x2e0   :  { %v7021_v46 = vmax.f32 %v7019_v55, %v7020_v59 }
 0x2e1   :  { %v2365_v34 = vadd.f32 %v6220_v4, %v2308_v13  ;;  %v2309_v45 = vmax.f32 %v7011_v48, %v2259_v60  ;;  %4527 = vmatmul.mubr.msk.bf16.vlgmr.msra.gmra.mrb[152].mxu1 %vm2487_vm1, %v2456_v53  ;;  %v7014_v53 = vld [vmem:[#allocation92_spill] sm:$0xff] }
 0x2e2   :  { %4531 = vmatpush3.bf16.msra.mxu1 %v5041_v9  ;;  %4532 = vmatprep.mubr.msk.bf16.mxu1 %vm5078_vm0, %v6909_v47  ;;  %v7015_v12 = vmax.f32 %v7013_v36, %v7014_v53  ;;  %v7022_v9 = vld [vmem:[#allocation57_spill] sm:$0xff] }
 0x2e3   :  { %v2366_v32 = vadd.f32 %v6220_v4, %v2309_v45  ;;  %4536 = vmatprep.subr.bf16.mxu1 %v6909_v47  ;;  %v2415_v10 = vmax.f32 %v2365_v34, 0.0 }
 0x2e4   :  { %v1859_v51 = vpop.f32.mrb[232].mxu0 }
 0x2e5   :  { %v2416_v31 = vmax.f32 %v2366_v32, 0.0  ;;  %v2260_v26 = vmax.f32 %v1859_v51, %v7012_v28  ;;  %v1861_v62 = vpop.f32.mrb[233].mxu0  ;;  %v7025_v51 = vld [vmem:[#allocation18_spill] sm:$0xff] }
 0x2e6   :  { %v1862_v61 = vpop.f32.mrb[234].mxu0 }
 0x2e7   :  { %v2458_v7 = vpack.c.bf16 %v2416_v31, %v2415_v10  ;;  %v2310_v56 = vmax.f32 %v7015_v12, %v2260_v26  ;;  %v2261_v6 = vmax.f32 %v1862_v61, %v7016_v58  ;;  %v1864_v21 = vpop.f32.mrb[235].mxu0  ;;  %v7026_v10 = vld [vmem:[#allocation94_spill] sm:$0xff]  ;;  %v7028_v26 = vld [vmem:[#allocation60_spill] sm:$0xff] }
 0x2e8   :  { %v7027_v31 = vmax.f32 %v7025_v51, %v7026_v10 }
 0x2e9   :  { %v2367_v37 = vadd.f32 %v6220_v4, %v2310_v56  ;;  %v2311_v29 = vmax.f32 %v7017_v35, %v2261_v6  ;;  %4533 = vmatmul.mubr.msk.bf16.vlgmr.msra.gmra.mrb[156].mxu1 %vm2487_vm1, %v2457_v18  ;;  %v7030_v6 = vld [vmem:[#allocation61_spill] sm:$0xff] }
 0x2ea   :  { %4537 = vmatpush3.bf16.msra.mxu1 %v5042_v57  ;;  %4538 = vmatprep.mubr.msk.bf16.mxu1 %vm5078_vm0, %v6909_v47 }
 0x2eb   :  { %v2368_v15 = vadd.f32 %v6220_v4, %v2311_v29  ;;  %4542 = vmatprep.subr.bf16.mxu1 %v6909_v47  ;;  %v2417_v27 = vmax.f32 %v2367_v37, 0.0  ;;  %v7031_v29 = vld [vmem:[#allocation19_spill] sm:$0xff] }
 0x2ec   :  { %v1867_v14 = vpop.f32.mrb[236].mxu0 }
 0x2ed   :  { %v2418_v39 = vmax.f32 %v2368_v15, 0.0  ;;  %v2262_v49 = vmax.f32 %v1867_v14, %v7018_v23  ;;  %v1869_v5 = vpop.f32.mrb[237].mxu0  ;;  %v7032_v15 = vld [vmem:[#allocation95_spill] sm:$0xff] }
 0x2ee   :  { %v1870_v22 = vpop.f32.mrb[238].mxu0  ;;  %v7033_v14 = vmax.f32 %v7031_v29, %v7032_v15 }
 0x2ef   :  { %v2459_v54 = vpack.c.bf16 %v2418_v39, %v2417_v27  ;;  %v2312_v20 = vmax.f32 %v7021_v46, %v2262_v49  ;;  %v2263_v18 = vmax.f32 %v1870_v22, %v7022_v9  ;;  %v1872_v38 = vpop.f32.mrb[239].mxu0  ;;  %v7034_v39 = vld [vmem:[#allocation63_spill] sm:$0xff]  ;;  %v7035_v22 = vld [vmem:[#allocation96_spill] sm:$0xff]  ;;  %v7037_v9 = vld [vmem:[#allocation65_spill] sm:$0xff] }
 0x2f1   :  { %v2369_v3 = vadd.f32 %v6220_v4, %v2312_v20  ;;  %v2313_v13 = vmax.f32 %v7023_v25, %v2263_v18  ;;  %4539 = vmatmul.mubr.msk.bf16.vlgmr.msra.gmra.mrb[160].mxu1 %vm2487_vm1, %v2458_v7  ;;  %v7029_v7 = vmax.f32 %v5682_v16, %v6138_v52  ;;  %v5045_v16 = vld [vmem:[%s6748_s3 + $0x50] sm:$0xff]  }
 0x2f2   :  { %4543 = vmatpush3.bf16.msra.mxu1 %v5043_v0  ;;  %4544 = vmatprep.mubr.msk.bf16.mxu1 %vm5078_vm0, %v6909_v47  ;;  %v7036_v0 = vmax.f32 %v5692_v24, %v7035_v22  ;;  %v5046_v24 = vld [vmem:[%s6748_s3 + $0x58] sm:$0xff]  }
 0x2f3   :  { %v2370_v17 = vadd.f32 %v6220_v4, %v2313_v13  ;;  %4548 = vmatprep.subr.bf16.mxu1 %v6909_v47  ;;  %v2419_v1 = vmax.f32 %v2369_v3, 0.0  ;;  %v7038_v13 = vld [vmem:[#allocation20_spill] sm:$0xff] }
 0x2f4   :  { %v1875_v60 = vpop.f32.mrb[240].mxu0 }
 0x2f5   :  { %v2420_v34 = vmax.f32 %v2370_v17, 0.0  ;;  %v2264_v48 = vmax.f32 %v1875_v60, %v7024_v42  ;;  %v1877_v45 = vpop.f32.mrb[241].mxu0  ;;  %v7039_v17 = vld [vmem:[#allocation97_spill] sm:$0xff] }
 0x2f6   :  { %v1878_v32 = vpop.f32.mrb[242].mxu0  ;;  %v7040_v60 = vmax.f32 %v7038_v13, %v7039_v17 }
 0x2f7   :  { %v2460_v43 = vpack.c.bf16 %v2420_v34, %v2419_v1  ;;  %v2314_v28 = vmax.f32 %v7027_v31, %v2264_v48  ;;  %v2265_v62 = vmax.f32 %v1878_v32, %v7028_v26  ;;  %v1880_v61 = vpop.f32.mrb[243].mxu0  ;;  %v7041_v34 = vld [vmem:[#allocation66_spill] sm:$0xff]  ;;  %v7044_v26 = vld [vmem:[#allocation67_spill] sm:$0xff] }
 0x2f8   :  { %v7042_v32 = vld [vmem:[#allocation98_spill] sm:$0xff] }
 0x2f9   :  { %v2371_v57 = vadd.f32 %v6220_v4, %v2314_v28  ;;  %v2315_v36 = vmax.f32 %v7029_v7, %v2265_v62  ;;  %4545 = vmatmul.mubr.msk.bf16.vlgmr.msra.gmra.mrb[164].mxu1 %vm2487_vm1, %v2459_v54 }
 0x2fa   :  { %4549 = vmatpush3.bf16.msra.mxu1 %v5044_v8  ;;  %4550 = vmatprep.mubr.msk.bf16.mxu1 %vm5078_vm0, %v6909_v47  ;;  %v7043_v8 = vmax.f32 %v5702_v33, %v7042_v32  ;;  %v5047_v33 = vld [vmem:[%s6748_s3 + $0x60] sm:$0xff]   ;;  %v5049_v32 = vld [vmem:[%s6748_s3 + $0x70] sm:$0xff]  }
 0x2fb   :  { %v2372_v53 = vadd.f32 %v6220_v4, %v2315_v36  ;;  %4554 = vmatprep.subr.bf16.mxu1 %v6909_v47  ;;  %v2421_v56 = vmax.f32 %v2371_v57, 0.0  ;;  %v7045_v36 = vld [vmem:[#allocation21_spill] sm:$0xff] }
 0x2fc   :  { %v1883_v12 = vpop.f32.mrb[244].mxu0 }
 0x2fd   :  { %v2422_v58 = vmax.f32 %v2372_v53, 0.0  ;;  %v2266_v21 = vmax.f32 %v1883_v12, %v7030_v6  ;;  %v1885_v37 = vpop.f32.mrb[245].mxu0  ;;  %v7046_v53 = vld [vmem:[#allocation99_spill] sm:$0xff] }
 0x2fe   :  { %v1886_v35 = vpop.f32.mrb[246].mxu0  ;;  %v7047_v12 = vmax.f32 %v7045_v36, %v7046_v53 }
 0x2ff   :  { %v2461_v52 = vpack.c.bf16 %v2422_v58, %v2421_v56  ;;  %v2316_v27 = vmax.f32 %v7033_v14, %v2266_v21  ;;  %v2267_v23 = vmax.f32 %v1886_v35, %v7034_v39  ;;  %v1888_v49 = vpop.f32.mrb[247].mxu0  ;;  %v7048_v58 = vld [vmem:[#allocation69_spill] sm:$0xff]  ;;  %v7049_v35 = vld [vmem:[#allocation100_spill] sm:$0xff]  ;;  %v7051_v39 = vld [vmem:[#allocation71_spill] sm:$0xff] }
 0x301   :  { %v2373_v5 = vadd.f32 %v6220_v4, %v2316_v27  ;;  %v2317_v54 = vmax.f32 %v7036_v0, %v2267_v23  ;;  %4551 = vmatmul.mubr.msk.bf16.vlgmr.msra.gmra.mrb[168].mxu1 %vm2487_vm1, %v2460_v43  ;;  %v7052_v0 = vld [vmem:[#allocation22_spill] sm:$0xff] }
 0x302   :  { %4555 = vmatpush3.bf16.msra.mxu1 %v5045_v16  ;;  %4556 = vmatprep.mubr.msk.bf16.mxu1 %vm5078_vm0, %v6909_v47  ;;  %v7050_v16 = vmax.f32 %v5712_v41, %v7049_v35  ;;  %v5048_v41 = vld [vmem:[%s6748_s3 + $0x68] sm:$0xff]  }
 0x303   :  { %v2374_v55 = vadd.f32 %v6220_v4, %v2317_v54  ;;  %4560 = vmatprep.subr.bf16.mxu1 %v6909_v47  ;;  %v2423_v46 = vmax.f32 %v2373_v5, 0.0  ;;  %v7053_v54 = vld [vmem:[#allocation101_spill] sm:$0xff] }
 0x304   :  { %v1891_v59 = vpop.f32.mrb[248].mxu0 }
 0x305   :  { %v2424_v20 = vmax.f32 %v2374_v55, 0.0  ;;  %v2268_v18 = vmax.f32 %v1891_v59, %v7037_v9  ;;  %v1893_v38 = vpop.f32.mrb[249].mxu0  ;;  %v7054_v55 = vmax.f32 %v7052_v0, %v7053_v54 }
 0x306   :  { %v1894_v3 = vpop.f32.mrb[250].mxu0  ;;  %v7056_v38 = vld [vmem:[#allocation23_spill] sm:$0xff] }
 0x307   :  { %v2462_v25 = vpack.c.bf16 %v2424_v20, %v2423_v46  ;;  %v2318_v1 = vmax.f32 %v7040_v60, %v2268_v18  ;;  %v2269_v42 = vmax.f32 %v1894_v3, %v7041_v34  ;;  %v1896_v48 = vpop.f32.mrb[251].mxu0  ;;  %v7055_v46 = vld [vmem:[#allocation72_spill] sm:$0xff]  ;;  %v7057_v3 = vld [vmem:[#allocation102_spill] sm:$0xff]  ;;  %v7059_v34 = vld [vmem:[#allocation73_spill] sm:$0xff] }
 0x309   :  { %v2375_v45 = vadd.f32 %v6220_v4, %v2318_v1  ;;  %v2319_v43 = vmax.f32 %v7043_v8, %v2269_v42  ;;  %4557 = vmatmul.mubr.msk.bf16.vlgmr.msra.gmra.mrb[172].mxu1 %vm2487_vm1, %v2461_v52 }
 0x30a   :  { %4561 = vmatpush3.bf16.msra.mxu1 %v5046_v24  ;;  %4562 = vmatprep.mubr.msk.bf16.mxu1 %vm5078_vm0, %v6909_v47  ;;  %v7058_v24 = vmax.f32 %v7056_v38, %v7057_v3  ;;  %v5054_v38 = vld [vmem:[%s6748_s3 + $0x98] sm:$0xff]  }
 0x30b   :  { %v2376_v51 = vadd.f32 %v6220_v4, %v2319_v43  ;;  %4566 = vmatprep.subr.bf16.mxu1 %v6909_v47  ;;  %v2425_v31 = vmax.f32 %v2375_v45, 0.0  ;;  %v7060_v43 = vld [vmem:[#allocation24_spill] sm:$0xff] }
 0x30c   :  { %v1899_v10 = vpop.f32.mrb[252].mxu0 }
 0x30d   :  { %v2426_v28 = vmax.f32 %v2376_v51, 0.0  ;;  %v2270_v62 = vmax.f32 %v1899_v10, %v7044_v26  ;;  %v1901_v61 = vpop.f32.mrb[253].mxu0  ;;  %v7061_v51 = vld [vmem:[#allocation103_spill] sm:$0xff] }
 0x30e   :  { %v1902_v57 = vpop.f32.mrb[254].mxu0  ;;  %v7062_v10 = vmax.f32 %v7060_v43, %v7061_v51 }
 0x30f   :  { %v2463_v7 = vpack.c.bf16 %v2426_v28, %v2425_v31  ;;  %v2320_v56 = vmax.f32 %v7047_v12, %v2270_v62  ;;  %v2271_v6 = vmax.f32 %v1902_v57, %v7048_v58  ;;  %v1904_v21 = vpop.f32.mrb[255].mxu0  ;;  %v7063_v28 = vld [vmem:[#allocation75_spill] sm:$0xff]  ;;  %v7064_v57 = vld [vmem:[#allocation25_spill] sm:$0xff] }
 0x311   :  { %v2377_v37 = vadd.f32 %v6220_v4, %v2320_v56  ;;  %v2321_v52 = vmax.f32 %v7050_v16, %v2271_v6  ;;  %4563 = vmatmul.mubr.msk.bf16.vlgmr.msra.gmra.mrb[176].mxu1 %vm2487_vm1, %v2462_v25  ;;  %v7067_v6 = vld [vmem:[#allocation76_spill] sm:$0xff]  ;;  %v5050_v16 = vld [vmem:[%s6748_s3 + $0x78] sm:$0xff]  }
 0x312   :  { %4567 = vmatpush3.bf16.msra.mxu1 %v5047_v33  ;;  %4568 = vmatprep.mubr.msk.bf16.mxu1 %vm5078_vm0, %v6909_v47  ;;  %v7065_v33 = vld [vmem:[#allocation104_spill] sm:$0xff] }
 0x313   :  { %v2378_v29 = vadd.f32 %v6220_v4, %v2321_v52  ;;  %4572 = vmatprep.subr.bf16.mxu1 %v6909_v47  ;;  %v2427_v14 = vmax.f32 %v2377_v37, 0.0 }
 0x314   :  { %v1907_v15 = vpop.f32.mrb[0].mxu0 }
 0x315   :  { %v2428_v27 = vmax.f32 %v2378_v29, 0.0  ;;  %v2272_v23 = vmax.f32 %v1907_v15, %v7051_v39  ;;  %v1909_v49 = vpop.f32.mrb[1].mxu0  ;;  %v7068_v29 = vld [vmem:[#allocation26_spill] sm:$0xff]  ;;  %v7069_v15 = vld [vmem:[#allocation105_spill] sm:$0xff] }
 0x316   :  { %v1910_v5 = vpop.f32.mrb[2].mxu0  ;;  %v7071_v39 = vld [vmem:[#allocation77_spill] sm:$0xff] }
 0x317   :  { %v2464_v22 = vpack.c.bf16 %v2428_v27, %v2427_v14  ;;  %v2322_v59 = vmax.f32 %v7054_v55, %v2272_v23  ;;  %v2273_v20 = vmax.f32 %v1910_v5, %v7055_v46  ;;  %v1912_v9 = vpop.f32.mrb[3].mxu0  ;;  %v7070_v14 = vmax.f32 %v7068_v29, %v7069_v15 }
 0x319   :  { %v2379_v18 = vadd.f32 %v6220_v4, %v2322_v59  ;;  %v2323_v25 = vmax.f32 %v7058_v24, %v2273_v20  ;;  %4569 = vmatmul.mubr.msk.bf16.vlgmr.msra.gmra.mrb[180].mxu1 %vm2487_vm1, %v2463_v7  ;;  %v7066_v7 = vmax.f32 %v7064_v57, %v7065_v33  ;;  %v5051_v20 = vld [vmem:[%s6748_s3 + $0x80] sm:$0xff]  }
 0x31a   :  { %4573 = vmatpush3.bf16.msra.mxu1 %v5048_v41  ;;  %4574 = vmatprep.mubr.msk.bf16.mxu1 %vm5078_vm0, %v6909_v47  ;;  %v7072_v41 = vld [vmem:[#allocation27_spill] sm:$0xff] }
 0x31b   :  { %v2380_v13 = vadd.f32 %v6220_v4, %v2323_v25  ;;  %4578 = vmatprep.subr.bf16.mxu1 %v6909_v47  ;;  %v2429_v60 = vmax.f32 %v2379_v18, 0.0  ;;  %v5053_v18 = vld [vmem:[%s6748_s3 + $0x90] sm:$0xff]  }
 0x31c   :  { %v1915_v17 = vpop.f32.mrb[4].mxu0 }
 0x31d   :  { %v2430_v1 = vmax.f32 %v2380_v13, 0.0  ;;  %v2274_v42 = vmax.f32 %v1915_v17, %v7059_v34  ;;  %v1917_v48 = vpop.f32.mrb[5].mxu0 }
 0x31e   :  { %v1918_v45 = vpop.f32.mrb[6].mxu0 }
 0x31f   :  { %v2465_v8 = vpack.c.bf16 %v2430_v1, %v2429_v60  ;;  %v2324_v31 = vmax.f32 %v7062_v10, %v2274_v42  ;;  %v2275_v26 = vmax.f32 %v1918_v45, %v7063_v28  ;;  %v1920_v62 = vpop.f32.mrb[7].mxu0 }
 0x321   :  { %v2381_v61 = vadd.f32 %v6220_v4, %v2324_v31  ;;  %v2325_v36 = vmax.f32 %v7066_v7, %v2275_v26  ;;  %4575 = vmatmul.mubr.msk.bf16.vlgmr.msra.gmra.mrb[184].mxu1 %vm2487_vm1, %v2464_v22  ;;  %v7073_v22 = vld [vmem:[#allocation106_spill] sm:$0xff] }
 0x322   :  { %4579 = vmatpush3.bf16.msra.mxu1 %v5049_v32  ;;  %4580 = vmatprep.mubr.msk.bf16.mxu1 %vm5078_vm0, %v6909_v47  ;;  %v7074_v0 = vmax.f32 %v7072_v41, %v7073_v22 }
 0x323   :  { %v2382_v53 = vadd.f32 %v6220_v4, %v2325_v36  ;;  %4584 = vmatprep.subr.bf16.mxu1 %v6909_v47  ;;  %v2431_v56 = vmax.f32 %v2381_v61, 0.0 }
 0x324   :  { %v1923_v12 = vpop.f32.mrb[8].mxu0 }
 0x325   :  { %v2432_v58 = vmax.f32 %v2382_v53, 0.0  ;;  %v2276_v21 = vmax.f32 %v1923_v12, %v7067_v6  ;;  %v1925_v37 = vpop.f32.mrb[9].mxu0  ;;  %v5060_v6 = vld [vmem:[%s6750_s5] sm:$0xff]  }
 0x326   :  { %v1926_v35 = vpop.f32.mrb[10].mxu0 }
 0x327   :  { %v2466_v52 = vpack.c.bf16 %v2432_v58, %v2431_v56  ;;  %v2326_v27 = vmax.f32 %v7070_v14, %v2276_v21  ;;  %v2277_v23 = vmax.f32 %v1926_v35, %v7071_v39  ;;  %v1928_v49 = vpop.f32.mrb[11].mxu0  ;;  %v5061_v35 = vld [vmem:[%s6750_s5 + $0x8] sm:$0xff]   ;;  %v5062_v14 = vld [vmem:[%s6750_s5 + $0x10] sm:$0xff]  }
 0x329   :  { %v2383_v5 = vadd.f32 %v6220_v4, %v2326_v27  ;;  %v2327_v54 = vmax.f32 %v7074_v0, %v2277_v23  ;;  %4581 = vmatmul.mubr.msk.bf16.vlgmr.msra.gmra.mrb[188].mxu1 %vm2487_vm1, %v2465_v8  ;;  %v5063_v23 = vld [vmem:[%s6750_s5 + $0x18] sm:$0xff]   ;;  %v5064_v0 = vld [vmem:[%s6750_s5 + $0x20] sm:$0xff]  }
 0x32a   :  { %4585 = vmatpush3.bf16.msra.mxu1 %v5050_v16  ;;  %4586 = vmatprep.mubr.msk.bf16.mxu1 %vm5078_vm0, %v6909_v47 }
 0x32b   :  { %v2384_v55 = vadd.f32 %v6220_v4, %v2327_v54  ;;  %4590 = vmatprep.subr.bf16.mxu1 %v6909_v47  ;;  %v2433_v59 = vmax.f32 %v2383_v5, 0.0  ;;  %v5052_v4 = vld [vmem:[%s6748_s3 + $0x88] sm:$0xff]  }
 0x32d   :  { %v2434_v46 = vmax.f32 %v2384_v55, 0.0 }
 0x32f   :  { %v2467_v9 = vpack.c.bf16 %v2434_v46, %v2433_v59  ;;  %v5065_v59 = vld [vmem:[%s6750_s5 + $0x28] sm:$0xff]  }
 0x331   :  { %4587 = vmatmul.mubr.msk.bf16.vlgmr.msra.gmra.mrb[192].mxu1 %vm2487_vm1, %v2466_v52 }
 0x332   :  { %4591 = vmatpush3.bf16.msra.mxu1 %v5051_v20  ;;  %4592 = vmatprep.mubr.msk.bf16.mxu1 %vm5078_vm0, %v6909_v47 }
 0x333   :  { %4596 = vmatprep.subr.bf16.mxu1 %v6909_v47 }
 0x339   :  { %4593 = vmatmul.mubr.msk.bf16.vlgmr.msra.gmra.mrb[196].mxu1 %vm2487_vm1, %v2467_v9 }
 0x33a   :  { %4597 = vmatpush3.bf16.msra.mxu1 %v5052_v4  ;;  %4598 = vmatprep.mubr.msk.bf16.mxu1 %vm5078_vm0, %v6909_v47 }
 0x33b   :  { %4602 = vmatprep.subr.bf16.mxu1 %v6909_v47 }
 0x341   :  { %4599 = vmatmul.mubr.msk.bf16.vlgmr.msra.gmra.mrb[200].mxu1 %vm2487_vm1, %v6232_v44  ;;  %v5055_v44 = vld [vmem:[%s6748_s3 + $0xa0] sm:$0xff]  }
 0x342   :  { %4603 = vmatpush3.bf16.msra.mxu1 %v5053_v18  ;;  %4604 = vmatprep.mubr.msk.bf16.mxu1 %vm5078_vm0, %v6909_v47  ;;  %v5066_v18 = vld [vmem:[%s6750_s5 + $0x30] sm:$0xff]  }
 0x343   :  { %4608 = vmatprep.subr.bf16.mxu1 %v6909_v47 }
 0x349   :  { %4605 = vmatmul.mubr.msk.bf16.vlgmr.msra.gmra.mrb[204].mxu1 %vm2487_vm1, %v6244_v50  ;;  %v5056_v50 = vld [vmem:[%s6748_s3 + $0xa8] sm:$0xff]  }
 0x34a   :  { %4609 = vmatpush3.bf16.msra.mxu1 %v5054_v38  ;;  %4610 = vmatprep.mubr.msk.bf16.mxu1 %vm5078_vm0, %v6909_v47 }
 0x34b   :  { %4614 = vmatprep.subr.bf16.mxu1 %v6909_v47 }
 0x351   :  { %4611 = vmatmul.mubr.msk.bf16.vlgmr.msra.gmra.mrb[208].mxu1 %vm2487_vm1, %v6256_v2  ;;  %v5057_v2 = vld [vmem:[%s6748_s3 + $0xb0] sm:$0xff]  }
 0x352   :  { %4615 = vmatpush3.bf16.msra.mxu1 %v5055_v44  ;;  %4616 = vmatprep.mubr.msk.bf16.mxu1 %vm5078_vm0, %v6909_v47 }
 0x353   :  { %4620 = vmatprep.subr.bf16.mxu1 %v6909_v47 }
 0x359   :  { %4617 = vmatmul.mubr.msk.bf16.vlgmr.msra.gmra.mrb[212].mxu1 %vm2487_vm1, %v6268_v11  ;;  %v5058_v11 = vld [vmem:[%s6748_s3 + $0xb8] sm:$0xff]  }
 0x35a   :  { %4621 = vmatpush3.bf16.msra.mxu1 %v5056_v50  ;;  %4622 = vmatprep.mubr.msk.bf16.mxu1 %vm5078_vm0, %v6909_v47  ;;  %v5067_v50 = vld [vmem:[%s6750_s5 + $0x38] sm:$0xff]  }
 0x35b   :  { %4626 = vmatprep.subr.bf16.mxu1 %v6909_v47 }
 0x361   :  { %4623 = vmatmul.mubr.msk.bf16.vlgmr.msra.gmra.mrb[216].mxu1 %vm2487_vm1, %v6280_v30  ;;  %v5059_v30 = vld [vmem:[%s6748_s3 + $0xc0] sm:$0xff]  }
 0x362   :  { %4627 = vmatpush3.bf16.msra.mxu1 %v5057_v2  ;;  %4628 = vmatprep.mubr.msk.bf16.mxu1 %vm5078_vm0, %v6909_v47 }
 0x363   :  { %4632 = vmatprep.subr.bf16.mxu1 %v6909_v47 }
 0x369   :  { %4629 = vmatmul.mubr.msk.bf16.vlgmr.msra.gmra.mrb[220].mxu1 %vm2487_vm1, %v6292_v40 }
 0x36a   :  { %4633 = vmatpush3.bf16.msra.mxu1 %v5058_v11  ;;  %4634 = vmatprep.mubr.msk.bf16.mxu1 %vm5078_vm0, %v6909_v47 }
 0x36b   :  { %4638 = vmatprep.subr.bf16.mxu1 %v6909_v47 }
 0x371   :  { %4635 = vmatmul.mubr.msk.bf16.vlgmr.msra.gmra.mrb[224].mxu1 %vm2487_vm1, %v6304_v63 }
 0x372   :  { %4639 = vmatpush3.bf16.msra.mxu1 %v5059_v30  ;;  %4640 = vmatprep.mubr.msk.bf16.mxu1 %vm5078_vm0, %v6909_v47 }
 0x373   :  { %4644 = vmatprep.subr.bf16.mxu1 %v6909_v47 }
 0x379   :  { %4641 = vmatmul.mubr.msk.bf16.vlgmr.msra.gmra.mrb[228].mxu1 %vm2487_vm1, %v6316_v19 }
 0x37a   :  { %4660 = vmatprep.mubr.msk.bf16.mxu1 %vm5078_vm0, %v6909_v47  ;;  %4645 = vmatpush3.bf16.msra.mxu1 %v5060_v6 }
 0x37b   :  { %4646 = vmatprep.subr.bf16.mxu1 %v6909_v47 }
 0x37e   :  { %4647 = vmatpush3.bf16.msra.mxu1 %v5061_v35 }
 0x37f   :  { %4648 = vmatprep.subr.bf16.mxu1 %v6909_v47 }
 0x382   :  { %4649 = vmatpush3.bf16.msra.mxu1 %v5062_v14 }
 0x383   :  { %4650 = vmatprep.subr.bf16.mxu1 %v6909_v47 }
 0x386   :  { %4651 = vmatpush3.bf16.msra.mxu1 %v5063_v23 }
 0x387   :  { %4652 = vmatprep.subr.bf16.mxu1 %v6909_v47 }
 0x38a   :  { %4653 = vmatpush3.bf16.msra.mxu1 %v5064_v0 }
 0x38b   :  { %4654 = vmatprep.subr.bf16.mxu1 %v6909_v47 }
 0x38c   :  { %v2525_v40 = vpop.f32.mrb[132].mxu1 }
 0x38d   :  { %v4498_v3 = vpop.f32.mrb[133].mxu1 }
 0x38e   :  { %v2528_v24 = vpop.f32.mrb[134].mxu1  ;;  %4655 = vmatpush3.bf16.msra.mxu1 %v5065_v59 }
 0x38f   :  { %v4499_v25 = vpop.f32.mrb[135].mxu1  ;;  %4656 = vmatprep.subr.bf16.mxu1 %v6909_v47 }
 0x392   :  { %4657 = vmatpush3.bf16.msra.mxu1 %v5066_v18 }
 0x393   :  { %4658 = vmatprep.subr.bf16.mxu1 %v6909_v47 }
 0x394   :  { %v2575_v13 = vpop.f32.mrb[136].mxu1 }
 0x395   :  { %v2576_v17 = vadd.f32 %v2575_v13, %v2525_v40  ;;  %v4504_v60 = vpop.f32.mrb[137].mxu1 }
 0x396   :  { %v2578_v63 = vpop.f32.mrb[138].mxu1  ;;  %4659 = vmatpush3.bf16.msra.mxu1 %v5067_v50 }
 0x397   :  { %v2579_v1 = vadd.f32 %v2578_v63, %v2528_v24  ;;  %v4505_v34 = vpop.f32.mrb[139].mxu1  ;;  %4664 = vmatprep.subr.bf16.mxu1 %v6909_v47 }
 0x39c   :  { %v2628_v42 = vpop.f32.mrb[140].mxu1 }
 0x39d   :  { %v2635_v48 = vadd.f32 %v2628_v42, %v2576_v17  ;;  %v4510_v45 = vpop.f32.mrb[141].mxu1 }
 0x39e   :  { %v2631_v32 = vpop.f32.mrb[142].mxu1 }
 0x39f   :  { %v2636_v8 = vadd.f32 %v2631_v32, %v2579_v1  ;;  %v4511_v43 = vpop.f32.mrb[143].mxu1 }
 0x3a4   :  { %v2683_v19 = vpop.f32.mrb[144].mxu1 }
 0x3a5   :  { %v2690_v51 = vadd.f32 %v2683_v19, %v2635_v48  ;;  %v4516_v10 = vpop.f32.mrb[145].mxu1 }
 0x3a6   :  { %v2686_v31 = vpop.f32.mrb[146].mxu1 }
 0x3a7   :  { %v2691_v28 = vadd.f32 %v2686_v31, %v2636_v8  ;;  %v4517_v26 = vpop.f32.mrb[147].mxu1 }
 0x3ac   :  { %v2738_v62 = vpop.f32.mrb[148].mxu1 }
 0x3ad   :  { %v2745_v61 = vadd.f32 %v2738_v62, %v2690_v51  ;;  %v4522_v57 = vpop.f32.mrb[149].mxu1 }
 0x3ae   :  { %v2741_v33 = vpop.f32.mrb[150].mxu1 }
 0x3af   :  { %v2746_v7 = vadd.f32 %v2741_v33, %v2691_v28  ;;  %v4523_v36 = vpop.f32.mrb[151].mxu1 }
 0x3b4   :  { %v2793_v53 = vpop.f32.mrb[152].mxu1 }
 0x3b5   :  { %v2800_v12 = vadd.f32 %v2793_v53, %v2745_v61  ;;  %v4528_v56 = vpop.f32.mrb[153].mxu1 }
 0x3b6   :  { %v2796_v58 = vpop.f32.mrb[154].mxu1 }
 0x3b7   :  { %v2801_v21 = vadd.f32 %v2796_v58, %v2746_v7  ;;  %v4529_v37 = vpop.f32.mrb[155].mxu1 }
 0x3bc   :  { %v2848_v16 = vpop.f32.mrb[156].mxu1 }
 0x3bd   :  { %v2855_v52 = vadd.f32 %v2848_v16, %v2800_v12  ;;  %v4534_v29 = vpop.f32.mrb[157].mxu1 }
 0x3be   :  { %v2851_v15 = vpop.f32.mrb[158].mxu1 }
 0x3bf   :  { %v2856_v27 = vadd.f32 %v2851_v15, %v2801_v21  ;;  %v4535_v39 = vpop.f32.mrb[159].mxu1 }
 0x3c4   :  { %v2903_v49 = vpop.f32.mrb[160].mxu1 }
 0x3c5   :  { %v2910_v5 = vadd.f32 %v2903_v49, %v2855_v52  ;;  %v4540_v41 = vpop.f32.mrb[161].mxu1 }
 0x3c6   :  { %v2906_v22 = vpop.f32.mrb[162].mxu1 }
 0x3c7   :  { %v2911_v54 = vadd.f32 %v2906_v22, %v2856_v27  ;;  %v4541_v55 = vpop.f32.mrb[163].mxu1 }
 0x3cc   :  { %v2958_v46 = vpop.f32.mrb[164].mxu1 }
 0x3cd   :  { %v2965_v20 = vadd.f32 %v2958_v46, %v2910_v5  ;;  %v4546_v9 = vpop.f32.mrb[165].mxu1 }
 0x3ce   :  { %v2961_v4 = vpop.f32.mrb[166].mxu1 }
 0x3cf   :  { %v2966_v38 = vadd.f32 %v2961_v4, %v2911_v54  ;;  %v4547_v44 = vpop.f32.mrb[167].mxu1 }
 0x3d4   :  { %v3013_v2 = vpop.f32.mrb[168].mxu1 }
 0x3d5   :  { %v3020_v11 = vadd.f32 %v3013_v2, %v2965_v20  ;;  %v4552_v30 = vpop.f32.mrb[169].mxu1 }
 0x3d6   :  { %v3016_v40 = vpop.f32.mrb[170].mxu1 }
 0x3d7   :  { %v3021_v3 = vadd.f32 %v3016_v40, %v2966_v38  ;;  %v4553_v24 = vpop.f32.mrb[171].mxu1 }
 0x3dc   :  { %v3068_v25 = vpop.f32.mrb[172].mxu1 }
 0x3dd   :  { %v3075_v13 = vadd.f32 %v3068_v25, %v3020_v11  ;;  %v4558_v17 = vpop.f32.mrb[173].mxu1 }
 0x3de   :  { %v3071_v60 = vpop.f32.mrb[174].mxu1 }
 0x3df   :  { %v3076_v63 = vadd.f32 %v3071_v60, %v3021_v3  ;;  %v4559_v1 = vpop.f32.mrb[175].mxu1 }
 0x3e4   :  { %v3123_v34 = vpop.f32.mrb[176].mxu1 }
 0x3e5   :  { %v3130_v42 = vadd.f32 %v3123_v34, %v3075_v13  ;;  %v4564_v48 = vpop.f32.mrb[177].mxu1 }
 0x3e6   :  { %v3126_v45 = vpop.f32.mrb[178].mxu1 }
 0x3e7   :  { %v3131_v32 = vadd.f32 %v3126_v45, %v3076_v63  ;;  %v4565_v8 = vpop.f32.mrb[179].mxu1 }
 0x3ec   :  { %v3178_v43 = vpop.f32.mrb[180].mxu1 }
 0x3ed   :  { %v3185_v19 = vadd.f32 %v3178_v43, %v3130_v42  ;;  %v4570_v51 = vpop.f32.mrb[181].mxu1 }
 0x3ee   :  { %v3181_v10 = vpop.f32.mrb[182].mxu1 }
 0x3ef   :  { %v3186_v31 = vadd.f32 %v3181_v10, %v3131_v32  ;;  %v4571_v28 = vpop.f32.mrb[183].mxu1 }
 0x3f4   :  { %v3233_v26 = vpop.f32.mrb[184].mxu1 }
 0x3f5   :  { %v3240_v62 = vadd.f32 %v3233_v26, %v3185_v19  ;;  %v4576_v61 = vpop.f32.mrb[185].mxu1 }
 0x3f6   :  { %v3236_v57 = vpop.f32.mrb[186].mxu1 }
 0x3f7   :  { %v3241_v33 = vadd.f32 %v3236_v57, %v3186_v31  ;;  %v4577_v7 = vpop.f32.mrb[187].mxu1 }
 0x3fc   :  { %v3288_v36 = vpop.f32.mrb[188].mxu1 }
 0x3fd   :  { %v3295_v53 = vadd.f32 %v3288_v36, %v3240_v62  ;;  %v4582_v12 = vpop.f32.mrb[189].mxu1 }
 0x3fe   :  { %v3291_v56 = vpop.f32.mrb[190].mxu1 }
 0x3ff   :  { %v3296_v58 = vadd.f32 %v3291_v56, %v3241_v33  ;;  %v4583_v6 = vpop.f32.mrb[191].mxu1  ;;  %v4407_v33 = vld [vmem:[%s6752_s4] ss:$0 sm:$0xff] }
 0x404   :  { %v3343_v21 = vpop.f32.mrb[192].mxu1 }
 0x405   :  { %v3350_v37 = vadd.f32 %v3343_v21, %v3295_v53  ;;  %v4588_v35 = vpop.f32.mrb[193].mxu1 }
 0x406   :  { %v3346_v16 = vpop.f32.mrb[194].mxu1  ;;  %v5068_v35 = vld [vmem:[%s6751_s7] sm:$0xff]  }
 0x407   :  { %v3351_v52 = vadd.f32 %v3346_v16, %v3296_v58  ;;  %v4589_v29 = vpop.f32.mrb[195].mxu1 }
 0x408   :  { %v5070_v29 = vld [vmem:[%s6751_s7 + $0x10] sm:$0xff]  }
 0x40c   :  { %v3398_v15 = vpop.f32.mrb[196].mxu1 }
 0x40d   :  { %v3405_v14 = vadd.f32 %v3398_v15, %v3350_v37  ;;  %v4594_v27 = vpop.f32.mrb[197].mxu1  ;;  %v5071_v15 = vld [vmem:[%s6751_s7 + $0x18] sm:$0xff]  }
 0x40e   :  { %v3401_v39 = vpop.f32.mrb[198].mxu1  ;;  %v5073_v27 = vld [vmem:[%s6751_s7 + $0x28] sm:$0xff]  }
 0x40f   :  { %v3406_v23 = vadd.f32 %v3401_v39, %v3351_v52  ;;  %v4595_v49 = vpop.f32.mrb[199].mxu1  ;;  %v5069_v52 = vld [vmem:[%s6751_s7 + $0x8] sm:$0xff]   ;;  %v5074_v39 = vld [vmem:[%s6751_s7 + $0x30] sm:$0xff]  }
 0x410   :  { %v4408_v49 = vld [vmem:[%s6753_s6] ss:$0 sm:$0xff] }
 0x414   :  { %v3453_v5 = vpop.f32.mrb[200].mxu1 }
 0x415   :  { %v3460_v41 = vadd.f32 %v3453_v5, %v3405_v14  ;;  %v4600_v22 = vpop.f32.mrb[201].mxu1  ;;  %v5072_v14 = vld [vmem:[%s6751_s7 + $0x20] sm:$0xff]  }
 0x416   :  { %v3456_v0 = vpop.f32.mrb[202].mxu1 }
 0x417   :  { %v3461_v54 = vadd.f32 %v3456_v0, %v3406_v23  ;;  %v4601_v55 = vpop.f32.mrb[203].mxu1  ;;  %v5075_v23 = vld [vmem:[%s6751_s7 + $0x38] sm:$0xff]  }
 0x41c   :  { %v3508_v59 = vpop.f32.mrb[204].mxu1 }
 0x41d   :  { %v3515_v46 = vadd.f32 %v3508_v59, %v3460_v41  ;;  %v4606_v20 = vpop.f32.mrb[205].mxu1 }
 0x41e   :  { %v3511_v9 = vpop.f32.mrb[206].mxu1 }
 0x41f   :  { %v3516_v4 = vadd.f32 %v3511_v9, %v3461_v54  ;;  %v4607_v18 = vpop.f32.mrb[207].mxu1 }
 0x424   :  { %v3563_v38 = vpop.f32.mrb[208].mxu1 }
 0x425   :  { %v3570_v44 = vadd.f32 %v3563_v38, %v3515_v46  ;;  %v4612_v50 = vpop.f32.mrb[209].mxu1 }
 0x426   :  { %v3566_v2 = vpop.f32.mrb[210].mxu1 }
 0x427   :  { %v3571_v11 = vadd.f32 %v3566_v2, %v3516_v4  ;;  %v4613_v30 = vpop.f32.mrb[211].mxu1 }
 0x42c   :  { %v3618_v40 = vpop.f32.mrb[212].mxu1 }
 0x42d   :  { %v3625_v3 = vadd.f32 %v3618_v40, %v3570_v44  ;;  %v4618_v24 = vpop.f32.mrb[213].mxu1 }
 0x42e   :  { %v3621_v25 = vpop.f32.mrb[214].mxu1 }
 0x42f   :  { %v3626_v13 = vadd.f32 %v3621_v25, %v3571_v11  ;;  %v4619_v17 = vpop.f32.mrb[215].mxu1 }
 0x434   :  { %v3673_v60 = vpop.f32.mrb[216].mxu1 }
 0x435   :  { %v3680_v63 = vadd.f32 %v3673_v60, %v3625_v3  ;;  %v4624_v1 = vpop.f32.mrb[217].mxu1 }
 0x436   :  { %v3676_v34 = vpop.f32.mrb[218].mxu1 }
 0x437   :  { %v3681_v42 = vadd.f32 %v3676_v34, %v3626_v13  ;;  %v4625_v48 = vpop.f32.mrb[219].mxu1 }
 0x43c   :  { %v3728_v45 = vpop.f32.mrb[220].mxu1 }
 0x43d   :  { %v3735_v32 = vadd.f32 %v3728_v45, %v3680_v63  ;;  %v4630_v8 = vpop.f32.mrb[221].mxu1 }
 0x43e   :  { %v3731_v43 = vpop.f32.mrb[222].mxu1 }
 0x43f   :  { %v3736_v19 = vadd.f32 %v3731_v43, %v3681_v42  ;;  %v4631_v51 = vpop.f32.mrb[223].mxu1 }
 0x444   :  { %v3783_v10 = vpop.f32.mrb[224].mxu1 }
 0x445   :  { %v3790_v31 = vadd.f32 %v3783_v10, %v3735_v32  ;;  %v4636_v28 = vpop.f32.mrb[225].mxu1 }
 0x446   :  { %v3786_v26 = vpop.f32.mrb[226].mxu1 }
 0x447   :  { %v3791_v62 = vadd.f32 %v3786_v26, %v3736_v19  ;;  %v4637_v61 = vpop.f32.mrb[227].mxu1 }
 0x44c   :  { %v3838_v57 = vpop.f32.mrb[228].mxu1 }
 0x44d   :  { %v3845_v7 = vadd.f32 %v3838_v57, %v3790_v31  ;;  %v4642_v36 = vpop.f32.mrb[229].mxu1 }
 0x44e   :  { %v3841_v53 = vpop.f32.mrb[230].mxu1 }
 0x44f   :  { %v3854_v12 = vadd.f32 %v4407_v33, %v3845_v7  ;;  %v3846_v56 = vadd.f32 %v3841_v53, %v3791_v62  ;;  %v4643_v58 = vpop.f32.mrb[231].mxu1 }
 0x451   :  { %v3855_v6 = vadd.f32 %v4407_v33, %v3846_v56  ;;  %v3856_v21 = vmax.f32 %v3854_v12, 0.0 }
 0x453   :  { %v3857_v37 = vmax.f32 %v3855_v6, 0.0 }
 0x455   :  { %v3858_v16 = vpack.c.bf16 %v3857_v37, %v3856_v21 }
 0x457   :  { %4661 = vmatmul.mubr.bf16.vlgmr.msra.gmra.mrb[232].mxu1 %v3858_v16 }
 0x458   :  { %4665 = vmatpush3.bf16.msra.mxu1 %v5068_v35  ;;  %4680 = vmatprep.mubr.msk.bf16.mxu1 %vm5078_vm0, %v6909_v47 }
 0x459   :  { %4666 = vmatprep.subr.bf16.mxu1 %v6909_v47 }
 0x45c   :  { %4667 = vmatpush3.bf16.msra.mxu1 %v5069_v52 }
 0x45d   :  { %4668 = vmatprep.subr.bf16.mxu1 %v6909_v47 }
 0x460   :  { %4669 = vmatpush3.bf16.msra.mxu1 %v5070_v29 }
 0x461   :  { %4670 = vmatprep.subr.bf16.mxu1 %v6909_v47 }
 0x464   :  { %4671 = vmatpush3.bf16.msra.mxu1 %v5071_v15 }
 0x465   :  { %4672 = vmatprep.subr.bf16.mxu1 %v6909_v47 }
 0x468   :  { %4673 = vmatpush3.bf16.msra.mxu1 %v5072_v14 }
 0x469   :  { %4674 = vmatprep.subr.bf16.mxu1 %v6909_v47 }
 0x46c   :  { %4675 = vmatpush3.bf16.msra.mxu1 %v5073_v27 }
 0x46d   :  { %4676 = vmatprep.subr.bf16.mxu1 %v6909_v47 }
 0x470   :  { %4677 = vmatpush3.bf16.msra.mxu1 %v5074_v39 }
 0x471   :  { %4678 = vmatprep.subr.bf16.mxu1 %v6909_v47  ;;  %v4417_v47 = vld [vmem:[%s6754_s8] ss:$0 sm:$0xff] }
 0x474   :  { %4679 = vmatpush3.bf16.msra.mxu1 %v5075_v23 }
 0x52a   :  { %v3964_v5 = vpop.f32.mrb[232].mxu1 }
 0x52b   :  { %v3965_v41 = vadd.f32 %v4408_v49, %v3964_v5  ;;  %v4662_v22 = vpop.f32.mrb[233].mxu1 }
 0x52c   :  { %v3967_v0 = vpop.f32.mrb[234].mxu1 }
 0x52d   :  { %v3968_v54 = vadd.f32 %v4408_v49, %v3967_v0  ;;  %v4663_v55 = vpop.f32.mrb[235].mxu1  ;;  %v3971_v59 = vmax.f32 %v3965_v41, 0.0 }
 0x52f   :  { %v3972_v46 = vmax.f32 %v3968_v54, 0.0 }
 0x531   :  { %v3973_v20 = vpack.c.bf16 %v3972_v46, %v3971_v59 }
 0x533   :  { %4681 = vmatmul.mubr.bf16.vlgmr.msra.gmra.mrb[236].mxu1 %v3973_v20 }
 0x606   :  { %v4079_v9 = vpop.f32.mrb[236].mxu1 }
 0x607   :  { %v4080_v4 = vadd.f32 %v4417_v47, %v4079_v9  ;;  %v4682_v18 = vpop.f32.mrb[237].mxu1 }
 0x608   :  { %v4082_v38 = vpop.f32.mrb[238].mxu1 }
 0x609   :  { %4086 = vst [vmem:[%s6755_s9] sm:$0xff] %v4080_v4  ;;  %v4083_v44 = vadd.f32 %v4417_v47, %v4082_v38  ;;  %v4683_v50 = vpop.f32.mrb[239].mxu1 }
 0x60b   :  { %4087 = vst [vmem:[%s6755_s9 + $0x8] sm:$0xff] %v4083_v44 }

</bundles_post_ra>
